<compile_context>
chip_gen: v6e
topology: v6e:2x2x1
jax: 0.10.0
libtpu: 0.0.40
codegen_flags: <defaults>
</compile_context>

<pallas_src>
import jax
import jax.numpy as jnp
import numpy as np
from jax.experimental import pallas as pl
from jax.experimental.pallas import tpu as pltpu

HIDDEN = 1024


def _round_up(x, m):
    return (x + m - 1) // m * m


def _cdiv(a, b):
    return (a + b - 1) // b


def _vmem_budget_bytes():
    """~75% of physical VMEM; v7x-safe fallback if the query is unavailable."""
    try:
        cap = int(pltpu.get_tpu_info().vmem_capacity_bytes)
    except Exception:
        cap = 64 << 20
    return (cap * 3) // 4


def _plan_tiles(n, ch, budget):
    """Pick (tile_n_fit, tile_k, ch_pad, w1_resident) fitting the VMEM budget."""
    n_cap = _round_up(max(n, 1), 8)
    fixed = HIDDEN * HIDDEN * 2 + 4 * HIDDEN * 4   # W2 (single buffer) + biases
    slack = 2 << 20                                # headroom for compiler scratch
    avail = max(budget - fixed - slack, 4 << 20)

    def cost(tn, tk, w1_bufs):
        return (2 * tn * tk * 4            # x blocks (f32, double-buffered)
                + w1_bufs * tk * HIDDEN * 2  # W1 blocks (bf16)
                + 2 * tn * HIDDEN * 4)       # out blocks (f32, double-buffered)

    tn_cands = [t for t in (512, 256, 128, 64, 32, 16, 8) if t <= n_cap] or [n_cap]

    # 1) Full-K: W1 fully VMEM-resident (single buffer), streamed from HBM once.
    for tn in tn_cands:
        if cost(tn, ch, 1) <= avail:
            return tn, ch, ch, True

    # 2) Stream W1 along K; prefer a multiple-of-128 tile that divides ch
    #    exactly so x / W1 need no K padding.
    for tn in tn_cands:
        max_tk = (avail - 8 * tn * HIDDEN) // (8 * tn + 4 * HIDDEN)
        max_tk = (max_tk // 128) * 128
        if max_tk < 128:
            continue
        tk = next((t * 128 for t in range(max_tk // 128, 0, -1)
                   if ch % (t * 128) == 0), 0)
        if tk == 0:
            tk = max_tk
        return tn, tk, _round_up(ch, tk), False

    # Fallback: tiny tiles.
    return 8, 128, _round_up(ch, 128), False


def _boxhead_kernel(x_ref, w1_ref, b1_ref, w2_ref, b2_ref, o_ref):
    k = pl.program_id(1)

    @pl.when(k == 0)
    def _():
        o_ref[...] = jnp.zeros_like(o_ref)

    # First matmul: cast the f32 activation tile to bf16 in-register (VPU),
    # bf16 x bf16 -> f32 on the MXU, accumulate into the resident f32 output.
    o_ref[...] += jnp.dot(
        x_ref[...].astype(jnp.bfloat16), w1_ref[...],
        preferred_element_type=jnp.float32,
    )

    @pl.when(k == pl.num_programs(1) - 1)
    def _():
        # Epilogue in f32: bias + SiLU, second matmul (bf16 MXU path), bias + SiLU.
        h = o_ref[...] + b1_ref[...]
        h = h * jax.nn.sigmoid(h)
        y = jnp.dot(h.astype(w2_ref.dtype), w2_ref[...],
                    preferred_element_type=jnp.float32)
        y = y + b2_ref[...]
        o_ref[...] = y * jax.nn.sigmoid(y)


def box_head_forward(x_nchw, params):
    """x_nchw: (N, C, H, W) float32; params: w1 (ch,1024), b1 (1,1024),
    w2 (1024,1024), b2 (1,1024).  Returns (N, 1024) float32."""
    n = x_nchw.shape[0]
    x_flat = x_nchw.reshape(n, -1).astype(jnp.float32)  # flatten(start_dim=1)
    ch = x_flat.shape[1]

    w1 = params["w1"].astype(jnp.bfloat16)
    w2 = params["w2"].astype(jnp.bfloat16)
    b1 = params["b1"].astype(jnp.float32)
    b2 = params["b2"].astype(jnp.float32)
    assert w1.shape == (ch, HIDDEN) and w2.shape == (HIDDEN, HIDDEN)

    budget = _vmem_budget_bytes()
    tn_fit, tile_k, ch_pad, w1_resident = _plan_tiles(n, ch, budget)

    # Batch tiling: largest tile that fits, sized to minimise row padding;
    # when W1 is resident keep >=2 batch tiles so the "parallel" axis can
    # shard across TensorCores (v7x megacore) at ~zero extra HBM cost.
    n_cap = _round_up(max(n, 1), 8)
    n_tiles = _cdiv(n_cap, tn_fit)
    if w1_resident and n_tiles < 2 and n_cap >= 16:
        n_tiles = 2
    tile_n = _round_up(_cdiv(n_cap, n_tiles), 8)
    n_pad = tile_n * n_tiles

    k_tiles = ch_pad // tile_k

    x_p = x_flat
    if n_pad != n or ch_pad != ch:
        x_p = jnp.pad(x_flat, ((0, n_pad - n), (0, ch_pad - ch)))
    if ch_pad != ch:
        w1 = jnp.pad(w1, ((0, ch_pad - ch), (0, 0)))

    w1_stream_factor = 1 if w1_resident else n_tiles
    flops = 2 * n_pad * (ch_pad + HIDDEN) * HIDDEN
    bytes_accessed = (
        x_p.size * 4                           # f32 activations in
        + w1.size * 2 * w1_stream_factor       # bf16 W1 (restreamed if tiled on K)
        + w2.size * 2                          # bf16 W2 (resident, fetched once)
        + (b1.size + b2.size) * 4              # f32 biases
        + n_pad * HIDDEN * 4                   # f32 output
    )

    out = pl.pallas_call(
        _boxhead_kernel,
        out_shape=jax.ShapeDtypeStruct((n_pad, HIDDEN), jnp.float32),
        grid=(n_tiles, k_tiles),
        in_specs=[
            pl.BlockSpec((tile_n, tile_k), lambda i, k: (i, k)),        # x (f32)
            pl.BlockSpec((tile_k, HIDDEN), lambda i, k: (k, 0),         # W1 (bf16)
                         pipeline_mode=(pl.Buffered(1) if w1_resident else None)),
            pl.BlockSpec((1, HIDDEN), lambda i, k: (0, 0),              # b1
                         pipeline_mode=pl.Buffered(1)),
            pl.BlockSpec((HIDDEN, HIDDEN), lambda i, k: (0, 0),         # W2 (bf16)
                         pipeline_mode=pl.Buffered(1)),
            pl.BlockSpec((1, HIDDEN), lambda i, k: (0, 0),              # b2
                         pipeline_mode=pl.Buffered(1)),
        ],
        out_specs=pl.BlockSpec((tile_n, HIDDEN), lambda i, k: (i, 0)),
        compiler_params=pltpu.CompilerParams(
            dimension_semantics=("parallel", "arbitrary"),
            vmem_limit_bytes=int(budget),
        ),
        cost_estimate=pl.CostEstimate(
            flops=flops,
            transcendentals=2 * n_pad * HIDDEN,
            bytes_accessed=int(bytes_accessed),
        ),
    )(x_p, w1, b1, w2, b2)
    return out[:n]


def init_params(key, ch):
    """Deterministic init mimicking PyTorch Linear default (uniform +-1/sqrt(fan_in))."""
    k1, k2, k3, k4 = jax.random.split(key, 4)
    lim1 = 1.0 / np.sqrt(ch)
    lim2 = 1.0 / np.sqrt(HIDDEN)
    return {
        "w1": jax.random.uniform(k1, (ch, HIDDEN), jnp.float32, -lim1, lim1),
        "b1": jax.random.uniform(k2, (1, HIDDEN), jnp.float32, -lim1, lim1),
        "w2": jax.random.uniform(k3, (HIDDEN, HIDDEN), jnp.float32, -lim2, lim2),
        "b2": jax.random.uniform(k4, (1, HIDDEN), jnp.float32, -lim2, lim2),
    }


def _reference_f32(x_nchw, params):
    x = x_nchw.reshape(x_nchw.shape[0], -1)
    h = x @ params["w1"] + params["b1"]
    h = h * jax.nn.sigmoid(h)
    y = h @ params["w2"] + params["b2"]
    return y * jax.nn.sigmoid(y)


def _reference_bf16(x_nchw, params):
    # Same bf16-operand / f32-accumulate recipe as the kernel.
    x = x_nchw.reshape(x_nchw.shape[0], -1).astype(jnp.bfloat16)
    w1 = params["w1"].astype(jnp.bfloat16)
    w2 = params["w2"].astype(jnp.bfloat16)
    h = jnp.dot(x, w1, preferred_element_type=jnp.float32) + params["b1"]
    h = h * jax.nn.sigmoid(h)
    y = jnp.dot(h.astype(jnp.bfloat16), w2,
                preferred_element_type=jnp.float32) + params["b2"]
    return y * jax.nn.sigmoid(y)


if __name__ == "__main__":
    key = jax.random.PRNGKey(0)
    kx, kp = jax.random.split(key)

    # Small example input: N=2, C=4, H=W=16 -> ch = 4*16*16 = 1024
    x = jax.random.normal(kx, (2, 4, 16, 16), jnp.float32)
    params = init_params(kp, ch=4 * 16 * 16)

    out = jax.block_until_ready(box_head_forward(x, params))

    ref_bf16 = jax.block_until_ready(_reference_bf16(x, params))
    ref_f32 = jax.block_until_ready(_reference_f32(x, params))

    # Tight check against a reference doing the same bf16-operand math.
    np.testing.assert_allclose(np.asarray(out), np.asarray(ref_bf16),
                               rtol=5e-3, atol=5e-3)
    # Loose check against the full-f32 PyTorch-equivalent reference
    # (bf16 input/weight quantization on the MXU path).
    np.testing.assert_allclose(np.asarray(out), np.asarray(ref_f32),
                               rtol=5e-2, atol=5e-2)

    print("KERNEL_OK")
</pallas_src>

<mosaic_0001>
module attributes {stable_mosaic.version = 11 : i64} {
  func.func @_boxhead_kernel(%arg0: i32, %arg1: i32, %arg2: memref<8x1024xf32, #tpu.memory_space<vmem>>, %arg3: memref<1024x1024xbf16, #tpu.memory_space<vmem>>, %arg4: memref<1x1024xf32, #tpu.memory_space<vmem>>, %arg5: memref<1024x1024xbf16, #tpu.memory_space<vmem>>, %arg6: memref<1x1024xf32, #tpu.memory_space<vmem>>, %arg7: memref<8x1024xf32, #tpu.memory_space<vmem>>) attributes {dimension_semantics = [#tpu.dimension_semantics<parallel>, #tpu.dimension_semantics<arbitrary>], iteration_bounds = array<i64: 1, 1>, scalar_prefetch = 0 : i64, scratch_operands = 0 : i64, tpu.core_type = #tpu.core_type<tc>, window_params = [{transform_indices = @transform_0, window_bounds = array<i64: 8, 1024>}, {pipeline_mode = #tpu.pipeline_mode<synchronous>, transform_indices = @transform_1, window_bounds = array<i64: 1024, 1024>}, {pipeline_mode = #tpu.pipeline_mode<synchronous>, transform_indices = @transform_2, window_bounds = array<i64: 1, 1024>}, {pipeline_mode = #tpu.pipeline_mode<synchronous>, transform_indices = @transform_3, window_bounds = array<i64: 1024, 1024>}, {pipeline_mode = #tpu.pipeline_mode<synchronous>, transform_indices = @transform_4, window_bounds = array<i64: 1, 1024>}, {transform_indices = @transform_5, window_bounds = array<i64: 8, 1024>}]} {
    %c0_i32 = arith.constant 0 : i32
    %0 = arith.cmpi eq, %arg1, %c0_i32 : i32
    %1 = arith.extui %0 : i1 to i32
    %c0_i32_0 = arith.constant 0 : i32
    %2 = arith.cmpi ne, %1, %c0_i32_0 : i32
    scf.if %2 {
      %cst_10 = arith.constant 0.000000e+00 : f32
      %13 = vector.broadcast %cst_10 : f32 to vector<8x1024xf32>
      %c0_11 = arith.constant 0 : index
      %c0_12 = arith.constant 0 : index
      %14 = vector.load %arg7[%c0_11, %c0_12] : memref<8x1024xf32, #tpu.memory_space<vmem>>, vector<8x1024xf32>
      tpu.vector_store %arg7[%c0_11, %c0_12], %13 {strides = array<i32>} : memref<8x1024xf32, #tpu.memory_space<vmem>>, vector<8x1024xf32>,
    } else {
    }
    %c0 = arith.constant 0 : index
    %c0_1 = arith.constant 0 : index
    %3 = vector.load %arg7[%c0, %c0_1] : memref<8x1024xf32, #tpu.memory_space<vmem>>, vector<8x1024xf32>
    %c0_2 = arith.constant 0 : index
    %c0_3 = arith.constant 0 : index
    %4 = vector.load %arg2[%c0_2, %c0_3] : memref<8x1024xf32, #tpu.memory_space<vmem>>, vector<8x1024xf32>
    %5 = arith.truncf %4 : vector<8x1024xf32> to vector<8x1024xbf16>
    %c0_4 = arith.constant 0 : index
    %c0_5 = arith.constant 0 : index
    %6 = vector.load %arg3[%c0_4, %c0_5] : memref<1024x1024xbf16, #tpu.memory_space<vmem>>, vector<1024x1024xbf16>
    %cst = arith.constant dense<0.000000e+00> : vector<8x1024xf32>
    %7 = tpu.matmul %5, %6, %cst {dimension_numbers = #tpu.dot_dimension_numbers<[1], [0], [0], [1], [0, 0, 1, 1], [], []>} : vector<8x1024xbf16>, vector<1024x1024xbf16>, vector<8x1024xf32> -> vector<8x1024xf32>
    %8 = arith.addf %3, %7 : vector<8x1024xf32>
    %c0_6 = arith.constant 0 : index
    %c0_7 = arith.constant 0 : index
    %9 = vector.load %arg7[%c0_6, %c0_7] : memref<8x1024xf32, #tpu.memory_space<vmem>>, vector<8x1024xf32>
    tpu.vector_store %arg7[%c0_6, %c0_7], %8 {strides = array<i32>} : memref<8x1024xf32, #tpu.memory_space<vmem>>, vector<8x1024xf32>,
    %c0_i32_8 = arith.constant 0 : i32
    %10 = arith.cmpi eq, %arg1, %c0_i32_8 : i32
    %11 = arith.extui %10 : i1 to i32
    %c0_i32_9 = arith.constant 0 : i32
    %12 = arith.cmpi ne, %11, %c0_i32_9 : i32
    scf.if %12 {
      %c0_10 = arith.constant 0 : index
      %c0_11 = arith.constant 0 : index
      %13 = vector.load %arg7[%c0_10, %c0_11] : memref<8x1024xf32, #tpu.memory_space<vmem>>, vector<8x1024xf32>
      %c0_12 = arith.constant 0 : index
      %c0_13 = arith.constant 0 : index
      %14 = vector.load %arg4[%c0_12, %c0_13] : memref<1x1024xf32, #tpu.memory_space<vmem>>, vector<1x1024xf32>
      %15 = vector.broadcast %14 : vector<1x1024xf32> to vector<8x1024xf32>
      %16 = arith.addf %13, %15 : vector<8x1024xf32>
      %17 = arith.negf %16 : vector<8x1024xf32>
      %18 = math.exp %17 : vector<8x1024xf32>
      %cst_14 = arith.constant 1.000000e+00 : f32
      %19 = vector.broadcast %cst_14 : f32 to vector<8x1024xf32>
      %20 = arith.addf %19, %18 : vector<8x1024xf32>
      %21 = arith.divf %19, %20 : vector<8x1024xf32>
      %22 = arith.mulf %16, %21 : vector<8x1024xf32>
      %23 = arith.truncf %22 : vector<8x1024xf32> to vector<8x1024xbf16>
      %c0_15 = arith.constant 0 : index
      %c0_16 = arith.constant 0 : index
      %24 = vector.load %arg5[%c0_15, %c0_16] : memref<1024x1024xbf16, #tpu.memory_space<vmem>>, vector<1024x1024xbf16>
      %cst_17 = arith.constant dense<0.000000e+00> : vector<8x1024xf32>
      %25 = tpu.matmul %23, %24, %cst_17 {dimension_numbers = #tpu.dot_dimension_numbers<[1], [0], [0], [1], [0, 0, 1, 1], [], []>} : vector<8x1024xbf16>, vector<1024x1024xbf16>, vector<8x1024xf32> -> vector<8x1024xf32>
      %c0_18 = arith.constant 0 : index
      %c0_19 = arith.constant 0 : index
      %26 = vector.load %arg6[%c0_18, %c0_19] : memref<1x1024xf32, #tpu.memory_space<vmem>>, vector<1x1024xf32>
      %27 = vector.broadcast %26 : vector<1x1024xf32> to vector<8x1024xf32>
      %28 = arith.addf %25, %27 : vector<8x1024xf32>
      %29 = arith.negf %28 : vector<8x1024xf32>
      %30 = math.exp %29 : vector<8x1024xf32>
      %cst_20 = arith.constant 1.000000e+00 : f32
      %31 = vector.broadcast %cst_20 : f32 to vector<8x1024xf32>
      %32 = arith.addf %31, %30 : vector<8x1024xf32>
      %33 = arith.divf %31, %32 : vector<8x1024xf32>
      %34 = arith.mulf %28, %33 : vector<8x1024xf32>
      %c0_21 = arith.constant 0 : index
      %c0_22 = arith.constant 0 : index
      %35 = vector.load %arg7[%c0_21, %c0_22] : memref<8x1024xf32, #tpu.memory_space<vmem>>, vector<8x1024xf32>
      tpu.vector_store %arg7[%c0_21, %c0_22], %34 {strides = array<i32>} : memref<8x1024xf32, #tpu.memory_space<vmem>>, vector<8x1024xf32>,
    } else {
    }
    return
  }
  func.func @transform_0(%arg0: i32, %arg1: i32) -> (i32, i32) {
    %c0_i32 = arith.constant 0 : i32
    return %arg0, %arg1 : i32, i32
  }
  func.func @transform_1(%arg0: i32, %arg1: i32) -> (i32, i32) {
    %c0_i32 = arith.constant 0 : i32
    %c0_i32_0 = arith.constant 0 : i32
    return %arg1, %c0_i32 : i32, i32
  }
  func.func @transform_2(%arg0: i32, %arg1: i32) -> (i32, i32) {
    %c0_i32 = arith.constant 0 : i32
    %c0_i32_0 = arith.constant 0 : i32
    %c0_i32_1 = arith.constant 0 : i32
    return %c0_i32, %c0_i32_0 : i32, i32
  }
  func.func @transform_3(%arg0: i32, %arg1: i32) -> (i32, i32) {
    %c0_i32 = arith.constant 0 : i32
    %c0_i32_0 = arith.constant 0 : i32
    %c0_i32_1 = arith.constant 0 : i32
    return %c0_i32, %c0_i32_0 : i32, i32
  }
  func.func @transform_4(%arg0: i32, %arg1: i32) -> (i32, i32) {
    %c0_i32 = arith.constant 0 : i32
    %c0_i32_0 = arith.constant 0 : i32
    %c0_i32_1 = arith.constant 0 : i32
    return %c0_i32, %c0_i32_0 : i32, i32
  }
  func.func @transform_5(%arg0: i32, %arg1: i32) -> (i32, i32) {
    %c0_i32 = arith.constant 0 : i32
    %c0_i32_0 = arith.constant 0 : i32
    return %arg0, %c0_i32 : i32, i32
  }
}

</mosaic_0001>

<bundles_post_ra>
// kernel: tpu_custom_call.1
= control target key start
LH: loop header
LB: loop body
LE: loop exit
PB: predicated region body
PF: predicated region fallthrough
CT: control target
= control target key end

     0   :  { %10 = vsyncpa [#allocation3], 0  ;;  %s9432_s0 = inlined_call_operand.hbm [shape: f32[8,1024], index: 0, kind: input, shape index: {}]   ;;  %s9433_s1 = inlined_call_operand.hbm [shape: bf16[1024,1024], index: 1, kind: input, shape index: {}]   ;;  %s9434_s2 = inlined_call_operand.hbm [shape: f32[1,1024], index: 2, kind: input, shape index: {}]   ;;  %s9435_s3 = inlined_call_operand.hbm [shape: bf16[1024,1024], index: 3, kind: input, shape index: {}]   ;;  %s9436_s4 = inlined_call_operand.hbm [shape: f32[1,1024], index: 4, kind: input, shape index: {}]   ;;  %s9437_s5 = inlined_call_operand.hbm [shape: f32[8,1024], index: 5, kind: output, shape index: {}]  }
   0x1   :  { %11 = vsyncpa [#allocation6], 0 }
   0x2   :  { %12 = vsyncpa [#allocation9], 0 }
   0x3   :  { %13 = vsyncpa [#allocation4], 0  ;;  %s9082_s18 = smov [#allocation5]  }
   0x4   :  { %s29_s19 = sshll.u32 %s9082_s18, 4  ;;  %s30_s19 = int_to_ptr.vmem [resolvable:$true] %s29_s19 }
   0x5   :  { %s8962_s20 = scalar_lea.vmem %s30_s19, 65536  ;;  %p8967_p1 = scmp.lt.s32.totalorder %s30_s19, %s30_s19 }
   0x6   :  { %p8963_p0 = scmp.ne.s32.totalorder %s30_s19, %s8962_s20  ;;  %p8968_p2 = scmp.lt.s32.totalorder %s8962_s20, %s8962_s20 }
   0x8   :  { %p8969_p3 = por %p8968_p2, %p8967_p1 }
   0xa   :  { %p8970_p4 = pnand %p8969_p3, %p8963_p0 }
   0xc   :  { %8973 = shalt.err (!%p8970_p4)
}
   0xd   :  { %s9083_s21 = smov 512   ;;  %s9084_s22 = smov 32  }
   0xe   :  { %35 = dma.hbm_to_vmem [thread:$0]  %s9433_s1, 65536, %s30_s19, [#allocation6], %s9083_s21, %s9083_s21, %s9084_s22  }
   0xf   :  { %s9085_s25 = smov [#allocation8]   ;;  %s9086_s27 = smov [#allocation2]  }
  0x10   :  { %s51_s26 = sshll.u32 %s9085_s25, 4  ;;  %s20_s28 = sshll.u32 %s9086_s27, 4  ;;  %s52_s26 = int_to_ptr.vmem [resolvable:$true] %s51_s26  ;;  %s21_s28 = int_to_ptr.vmem [resolvable:$true] %s20_s28 }
  0x11   :  { %s8982_s29 = scalar_lea.vmem %s52_s26, 65536  ;;  %p8987_p6 = scmp.lt.s32.totalorder %s52_s26, %s52_s26 }
  0x12   :  { %p8983_p5 = scmp.ne.s32.totalorder %s52_s26, %s8982_s29  ;;  %p8988_p7 = scmp.lt.s32.totalorder %s8982_s29, %s8982_s29 }
  0x14   :  { %p8989_p8 = por %p8988_p7, %p8987_p6 }
  0x16   :  { %p8990_p9 = pnand %p8989_p8, %p8983_p5 }
  0x18   :  { %8993 = shalt.err (!%p8990_p9)
}
  0x19   :  { %57 = dma.hbm_to_vmem [thread:$0]  %s9435_s3, 65536, %s52_s26, [#allocation9], %s9083_s21, %s9083_s21, %s9084_s22  }
  0x1a   :  { %s9002_s7 = scalar_lea.vmem %s21_s28, 1024  ;;  %p9007_p11 = scmp.lt.s32.totalorder %s21_s28, %s21_s28 }
  0x1b   :  { %p9003_p10 = scmp.ne.s32.totalorder %s21_s28, %s9002_s7  ;;  %p9008_p12 = scmp.lt.s32.totalorder %s9002_s7, %s9002_s7 }
  0x1d   :  { %p9009_p13 = por %p9008_p12, %p9007_p11 }
  0x1f   :  { %p9010_p0 = pnand %p9009_p13, %p9003_p10 }
  0x21   :  { %9013 = shalt.err (!%p9010_p0)
}
  0x22   :  { %23 = dma.hbm_to_vmem [thread:$0]  %s9432_s0, 1024, %s21_s28, [#allocation3]  }
  0x23   :  { %s9087_s9 = smov [#allocation7]   ;;  %s9088_s11 = smov [#allocation10]  }
  0x24   :  { %s42_s10 = sshll.u32 %s9087_s9, 4  ;;  %s64_s12 = sshll.u32 %s9088_s11, 4  ;;  %s43_s10 = int_to_ptr.vmem [resolvable:$true] %s42_s10  ;;  %s65_s12 = int_to_ptr.vmem [resolvable:$true] %s64_s12 }
  0x25   :  { %s9022_s13 = scalar_lea.vmem %s43_s10, 128  ;;  %p9027_p2 = scmp.lt.s32.totalorder %s43_s10, %s43_s10 }
  0x26   :  { %p9023_p1 = scmp.ne.s32.totalorder %s43_s10, %s9022_s13  ;;  %p9028_p3 = scmp.lt.s32.totalorder %s9022_s13, %s9022_s13 }
  0x28   :  { %p9029_p4 = por %p9028_p3, %p9027_p2 }
  0x2a   :  { %p9030_p5 = pnand %p9029_p4, %p9023_p1 }
  0x2c   :  { %9033 = shalt.err (!%p9030_p5)
}
  0x2d   :  { %45 = dma.hbm_to_vmem [thread:$0]  %s9434_s2, 128, %s43_s10, [#allocation6]  }
  0x2e   :  { %s9042_s15 = scalar_lea.vmem %s65_s12, 128  ;;  %p9047_p7 = scmp.lt.s32.totalorder %s65_s12, %s65_s12 }
  0x2f   :  { %p9043_p6 = scmp.ne.s32.totalorder %s65_s12, %s9042_s15  ;;  %p9048_p8 = scmp.lt.s32.totalorder %s9042_s15, %s9042_s15 }
  0x31   :  { %p9049_p9 = por %p9048_p8, %p9047_p7 }
  0x33   :  { %p9050_p10 = pnand %p9049_p9, %p9043_p6 }
  0x35   :  { %9053 = shalt.err (!%p9050_p10)
}
  0x36   :  { %67 = dma.hbm_to_vmem [thread:$0]  %s9436_s4, 128, %s65_s12, [#allocation9]  }
  0x37   :  { %9074 = dma.done.wait [#allocation3], 1024  }
  0x38   :  { %9075 = vsyncadd [#allocation3], 4294966272 }
  0x39   :  { %9076 = dma.done.wait [#allocation6], 65664  }
  0x3a   :  { %9077 = vsyncadd [#allocation6], 4294901632 }
  0x3b   :  { %9078 = dma.done.wait [#allocation9], 65664  }
  0x3c   :  { %9079 = vsyncadd [#allocation9], 4294901632  ;;  %v175_v0 = vld [vmem:[#allocation5 + $0x1c0] sm:$0xff]  ;;  %v104_v53 = vld [vmem:[#allocation2 + $0x8] sm:$0xff]  ;;  %s9089_s2 = smov [#allocation11]  }
  0x3d   :  { %v179_v1 = vld [vmem:[#allocation5 + $0x1e0] sm:$0xff]  ;;  %v106_v54 = vld [vmem:[#allocation2 + $0x18] sm:$0xff]  ;;  %v9135_v58 = vpack.c.bf16 %v104_v53, %v104_v53  ;;  %s7828_s4 = sshll.u32 %s9089_s2, 4  ;;  %s7829_s4 = int_to_ptr.vmem [resolvable:$true] %s7828_s4 }
  0x3e   :  { %v303_v2 = vld [vmem:[#allocation5 + $0x5c0] sm:$0xff]  ;;  %v7896_v3 = vcombine.high %v175_v0, %v179_v1  ;;  %v7895_v5 = vcombine.low %v175_v0, %v179_v1  ;;  %v9137_v59 = vpack.c.bf16 %v106_v54, %v106_v54  ;;  %s9054_s17 = scalar_lea.vmem %s7829_s4, 1024  ;;  %p9059_p12 = scmp.lt.s32.totalorder %s7829_s4, %s7829_s4 }
  0x3f   :  { %v307_v4 = vld [vmem:[#allocation5 + $0x5e0] sm:$0xff]  ;;  %3223 = vmatprep.mubr.bf16.mxu0 %v9135_v58  ;;  %p9055_p11 = scmp.ne.s32.totalorder %s7829_s4, %s9054_s17  ;;  %p9060_p13 = scmp.lt.s32.totalorder %s9054_s17, %s9054_s17 }
  0x40   :  { %v167_v6 = vld [vmem:[#allocation5 + $0x180] sm:$0xff]  ;;  %v8024_v8 = vcombine.high %v303_v2, %v307_v4  ;;  %v8023_v9 = vcombine.low %v303_v2, %v307_v4  ;;  %3191 = vmatprep.subr.bf16.mxu0 %v7896_v3  ;;  %3264 = vmatprep.mubr.bf16.mxu1 %v9137_v59 }
  0x41   :  { %v171_v7 = vld [vmem:[#allocation5 + $0x1a0] sm:$0xff]  ;;  %3192 = vmatpush1.bf16.msra.mxu0 %v7895_v5  ;;  %p9061_p0 = por %p9060_p13, %p9059_p12 }
  0x42   :  { %v7888_v10 = vcombine.high %v167_v6, %v171_v7  ;;  %v295_v11 = vld [vmem:[#allocation5 + $0x580] sm:$0xff]  ;;  %3232 = vmatprep.subr.bf16.mxu1 %v8024_v8  ;;  %v7887_v18 = vcombine.low %v167_v6, %v171_v7 }
  0x43   :  { %v299_v12 = vld [vmem:[#allocation5 + $0x5a0] sm:$0xff]  ;;  %3233 = vmatpush1.bf16.msra.mxu1 %v8023_v9  ;;  %p9062_p1 = pnand %p9061_p0, %p9055_p11 }
  0x44   :  { %v159_v13 = vld [vmem:[#allocation5 + $0x140] sm:$0xff]  ;;  %v8016_v14 = vcombine.high %v295_v11, %v299_v12  ;;  %3193 = vmatprep.subr.bf16.mxu0 %v7888_v10  ;;  %v8015_v19 = vcombine.low %v295_v11, %v299_v12 }
  0x45   :  { %v163_v15 = vld [vmem:[#allocation5 + $0x160] sm:$0xff]  ;;  %3194 = vmatpush1.bf16.msra.mxu0 %v7887_v18 }
  0x46   :  { %v287_v16 = vld [vmem:[#allocation5 + $0x540] sm:$0xff]  ;;  %v7880_v20 = vcombine.high %v159_v13, %v163_v15  ;;  %3234 = vmatprep.subr.bf16.mxu1 %v8016_v14  ;;  %v7879_v26 = vcombine.low %v159_v13, %v163_v15 }
  0x47   :  { %v291_v17 = vld [vmem:[#allocation5 + $0x560] sm:$0xff]  ;;  %3235 = vmatpush1.bf16.msra.mxu1 %v8015_v19 }
  0x48   :  { %v8008_v21 = vcombine.high %v287_v16, %v291_v17  ;;  %v151_v22 = vld [vmem:[#allocation5 + $0x100] sm:$0xff]  ;;  %3195 = vmatprep.subr.bf16.mxu0 %v7880_v20  ;;  %v8007_v27 = vcombine.low %v287_v16, %v291_v17 }
  0x49   :  { %v155_v23 = vld [vmem:[#allocation5 + $0x120] sm:$0xff]  ;;  %3196 = vmatpush1.bf16.msra.mxu0 %v7879_v26 }
  0x4a   :  { %v279_v24 = vld [vmem:[#allocation5 + $0x500] sm:$0xff]  ;;  %v7872_v28 = vcombine.high %v151_v22, %v155_v23  ;;  %3236 = vmatprep.subr.bf16.mxu1 %v8008_v21  ;;  %v7871_v34 = vcombine.low %v151_v22, %v155_v23 }
  0x4b   :  { %v283_v25 = vld [vmem:[#allocation5 + $0x520] sm:$0xff]  ;;  %3237 = vmatpush1.bf16.msra.mxu1 %v8007_v27 }
  0x4c   :  { %v8000_v29 = vcombine.high %v279_v24, %v283_v25  ;;  %v143_v30 = vld [vmem:[#allocation5 + $0xc0] sm:$0xff]  ;;  %3197 = vmatprep.subr.bf16.mxu0 %v7872_v28  ;;  %v7999_v35 = vcombine.low %v279_v24, %v283_v25 }
  0x4d   :  { %v147_v31 = vld [vmem:[#allocation5 + $0xe0] sm:$0xff]  ;;  %3198 = vmatpush1.bf16.msra.mxu0 %v7871_v34 }
  0x4e   :  { %v271_v32 = vld [vmem:[#allocation5 + $0x4c0] sm:$0xff]  ;;  %v7864_v36 = vcombine.high %v143_v30, %v147_v31  ;;  %3238 = vmatprep.subr.bf16.mxu1 %v8000_v29  ;;  %v7863_v42 = vcombine.low %v143_v30, %v147_v31 }
  0x4f   :  { %v275_v33 = vld [vmem:[#allocation5 + $0x4e0] sm:$0xff]  ;;  %3239 = vmatpush1.bf16.msra.mxu1 %v7999_v35 }
  0x50   :  { %v7992_v37 = vcombine.high %v271_v32, %v275_v33  ;;  %v135_v38 = vld [vmem:[#allocation5 + $0x80] sm:$0xff]  ;;  %3199 = vmatprep.subr.bf16.mxu0 %v7864_v36  ;;  %v7991_v43 = vcombine.low %v271_v32, %v275_v33 }
  0x51   :  { %v139_v39 = vld [vmem:[#allocation5 + $0xa0] sm:$0xff]  ;;  %3200 = vmatpush1.bf16.msra.mxu0 %v7863_v42 }
  0x52   :  { %v263_v40 = vld [vmem:[#allocation5 + $0x480] sm:$0xff]  ;;  %v7856_v44 = vcombine.high %v135_v38, %v139_v39  ;;  %3240 = vmatprep.subr.bf16.mxu1 %v7992_v37  ;;  %v7855_v50 = vcombine.low %v135_v38, %v139_v39 }
  0x53   :  { %v267_v41 = vld [vmem:[#allocation5 + $0x4a0] sm:$0xff]  ;;  %3241 = vmatpush1.bf16.msra.mxu1 %v7991_v43 }
  0x54   :  { %v7984_v45 = vcombine.high %v263_v40, %v267_v41  ;;  %v127_v46 = vld [vmem:[#allocation5 + $0x40] sm:$0xff]  ;;  %3201 = vmatprep.subr.bf16.mxu0 %v7856_v44  ;;  %v7983_v51 = vcombine.low %v263_v40, %v267_v41 }
  0x55   :  { %v131_v47 = vld [vmem:[#allocation5 + $0x60] sm:$0xff]  ;;  %3202 = vmatpush1.bf16.msra.mxu0 %v7855_v50 }
  0x56   :  { %v255_v48 = vld [vmem:[#allocation5 + $0x440] sm:$0xff]  ;;  %v7848_v52 = vcombine.high %v127_v46, %v131_v47  ;;  %3242 = vmatprep.subr.bf16.mxu1 %v7984_v45  ;;  %v7847_v62 = vcombine.low %v127_v46, %v131_v47 }
  0x57   :  { %v259_v49 = vld [vmem:[#allocation5 + $0x460] sm:$0xff]  ;;  %3243 = vmatpush1.bf16.msra.mxu1 %v7983_v51 }
  0x58   :  { %v7976_v55 = vcombine.high %v255_v48, %v259_v49  ;;  %v119_v56 = vld [vmem:[#allocation5] sm:$0xff]  ;;  %3203 = vmatprep.subr.bf16.mxu0 %v7848_v52  ;;  %v7975_v63 = vcombine.low %v255_v48, %v259_v49 }
  0x59   :  { %v123_v57 = vld [vmem:[#allocation5 + $0x20] sm:$0xff]  ;;  %3204 = vmatpush1.bf16.msra.mxu0 %v7847_v62 }
  0x5a   :  { %v247_v60 = vld [vmem:[#allocation5 + $0x400] sm:$0xff]  ;;  %v7840_v0 = vcombine.high %v119_v56, %v123_v57  ;;  %3244 = vmatprep.subr.bf16.mxu1 %v7976_v55  ;;  %v7839_v6 = vcombine.low %v119_v56, %v123_v57 }
  0x5b   :  { %v251_v61 = vld [vmem:[#allocation5 + $0x420] sm:$0xff]  ;;  %3245 = vmatpush1.bf16.msra.mxu1 %v7975_v63 }
  0x5c   :  { %v7968_v1 = vcombine.high %v247_v60, %v251_v61  ;;  %v239_v2 = vld [vmem:[#allocation5 + $0x3c0] sm:$0xff]  ;;  %3205 = vmatprep.subr.bf16.mxu0 %v7840_v0  ;;  %v7967_v7 = vcombine.low %v247_v60, %v251_v61 }
  0x5d   :  { %v243_v3 = vld [vmem:[#allocation5 + $0x3e0] sm:$0xff]  ;;  %3206 = vmatpush1.bf16.msra.mxu0 %v7839_v6 }
  0x5e   :  { %v367_v4 = vld [vmem:[#allocation5 + $0x7c0] sm:$0xff]  ;;  %v7960_v8 = vcombine.high %v239_v2, %v243_v3  ;;  %3246 = vmatprep.subr.bf16.mxu1 %v7968_v1  ;;  %v7959_v14 = vcombine.low %v239_v2, %v243_v3 }
  0x5f   :  { %v371_v5 = vld [vmem:[#allocation5 + $0x7e0] sm:$0xff]  ;;  %3247 = vmatpush1.bf16.msra.mxu1 %v7967_v7 }
  0x60   :  { %v8088_v9 = vcombine.high %v367_v4, %v371_v5  ;;  %v231_v10 = vld [vmem:[#allocation5 + $0x380] sm:$0xff]  ;;  %3207 = vmatprep.subr.bf16.mxu0 %v7960_v8  ;;  %v8087_v15 = vcombine.low %v367_v4, %v371_v5 }
  0x61   :  { %v235_v11 = vld [vmem:[#allocation5 + $0x3a0] sm:$0xff]  ;;  %3208 = vmatpush2.bf16.msra.mxu0 %v7959_v14 }
  0x62   :  { %v359_v12 = vld [vmem:[#allocation5 + $0x780] sm:$0xff]  ;;  %v7952_v16 = vcombine.high %v231_v10, %v235_v11  ;;  %3248 = vmatprep.subr.bf16.mxu1 %v8088_v9  ;;  %v7951_v22 = vcombine.low %v231_v10, %v235_v11  ;;  %v105_v11 = vld [vmem:[#allocation2 + $0x10] sm:$0xff] }
  0x63   :  { %v363_v13 = vld [vmem:[#allocation5 + $0x7a0] sm:$0xff]  ;;  %3249 = vmatpush2.bf16.msra.mxu1 %v8087_v15 }
  0x64   :  { %v8080_v17 = vcombine.high %v359_v12, %v363_v13  ;;  %v223_v18 = vld [vmem:[#allocation5 + $0x340] sm:$0xff]  ;;  %3209 = vmatprep.subr.bf16.mxu0 %v7952_v16  ;;  %v8079_v23 = vcombine.low %v359_v12, %v363_v13 }
  0x65   :  { %v227_v19 = vld [vmem:[#allocation5 + $0x360] sm:$0xff]  ;;  %3210 = vmatpush2.bf16.msra.mxu0 %v7951_v22  ;;  %v110_v22 = vld [vmem:[#allocation2 + $0x38] sm:$0xff] }
  0x66   :  { %v351_v20 = vld [vmem:[#allocation5 + $0x740] sm:$0xff]  ;;  %v7944_v24 = vcombine.high %v223_v18, %v227_v19  ;;  %3250 = vmatprep.subr.bf16.mxu1 %v8080_v17  ;;  %v7943_v30 = vcombine.low %v223_v18, %v227_v19  ;;  %v108_v19 = vld [vmem:[#allocation2 + $0x28] sm:$0xff] }
  0x67   :  { %v355_v21 = vld [vmem:[#allocation5 + $0x760] sm:$0xff]  ;;  %3251 = vmatpush2.bf16.msra.mxu1 %v8079_v23 }
  0x68   :  { %v8072_v25 = vcombine.high %v351_v20, %v355_v21  ;;  %v215_v26 = vld [vmem:[#allocation5 + $0x300] sm:$0xff]  ;;  %3211 = vmatprep.subr.bf16.mxu0 %v7944_v24  ;;  %v8071_v31 = vcombine.low %v351_v20, %v355_v21  ;;  %v9143_v20 = vpack.c.bf16 %v105_v11, %v105_v11 }
  0x69   :  { %v219_v27 = vld [vmem:[#allocation5 + $0x320] sm:$0xff]  ;;  %3212 = vmatpush2.bf16.msra.mxu0 %v7943_v30 }
  0x6a   :  { %v343_v28 = vld [vmem:[#allocation5 + $0x700] sm:$0xff]  ;;  %v7936_v32 = vcombine.high %v215_v26, %v219_v27  ;;  %3252 = vmatprep.subr.bf16.mxu1 %v8072_v25  ;;  %v7935_v38 = vcombine.low %v215_v26, %v219_v27 }
  0x6b   :  { %v347_v29 = vld [vmem:[#allocation5 + $0x720] sm:$0xff]  ;;  %3253 = vmatpush2.bf16.msra.mxu1 %v8071_v31  ;;  %v9148_v31 = vpack.c.bf16 %v110_v22, %v110_v22 }
  0x6c   :  { %v8064_v33 = vcombine.high %v343_v28, %v347_v29  ;;  %v207_v34 = vld [vmem:[#allocation5 + $0x2c0] sm:$0xff]  ;;  %3213 = vmatprep.subr.bf16.mxu0 %v7936_v32  ;;  %v8063_v39 = vcombine.low %v343_v28, %v347_v29  ;;  %v9145_v28 = vpack.c.bf16 %v108_v19, %v108_v19 }
  0x6d   :  { %v211_v35 = vld [vmem:[#allocation5 + $0x2e0] sm:$0xff]  ;;  %3214 = vmatpush2.bf16.msra.mxu0 %v7935_v38 }
  0x6e   :  { %v335_v36 = vld [vmem:[#allocation5 + $0x6c0] sm:$0xff]  ;;  %v7928_v40 = vcombine.high %v207_v34, %v211_v35  ;;  %3254 = vmatprep.subr.bf16.mxu1 %v8064_v33  ;;  %v7927_v46 = vcombine.low %v207_v34, %v211_v35 }
  0x6f   :  { %v339_v37 = vld [vmem:[#allocation5 + $0x6e0] sm:$0xff]  ;;  %3255 = vmatpush2.bf16.msra.mxu1 %v8063_v39 }
  0x70   :  { %v8056_v41 = vcombine.high %v335_v36, %v339_v37  ;;  %v199_v42 = vld [vmem:[#allocation5 + $0x280] sm:$0xff]  ;;  %3215 = vmatprep.subr.bf16.mxu0 %v7928_v40  ;;  %v8055_v47 = vcombine.low %v335_v36, %v339_v37 }
  0x71   :  { %v203_v43 = vld [vmem:[#allocation5 + $0x2a0] sm:$0xff]  ;;  %3216 = vmatpush2.bf16.msra.mxu0 %v7927_v46 }
  0x72   :  { %v327_v44 = vld [vmem:[#allocation5 + $0x680] sm:$0xff]  ;;  %v7920_v48 = vcombine.high %v199_v42, %v203_v43  ;;  %3256 = vmatprep.subr.bf16.mxu1 %v8056_v41  ;;  %v7919_v54 = vcombine.low %v199_v42, %v203_v43 }
  0x73   :  { %v331_v45 = vld [vmem:[#allocation5 + $0x6a0] sm:$0xff]  ;;  %3257 = vmatpush2.bf16.msra.mxu1 %v8055_v47 }
  0x74   :  { %v8048_v49 = vcombine.high %v327_v44, %v331_v45  ;;  %v191_v50 = vld [vmem:[#allocation5 + $0x240] sm:$0xff]  ;;  %3217 = vmatprep.subr.bf16.mxu0 %v7920_v48  ;;  %v8047_v55 = vcombine.low %v327_v44, %v331_v45 }
  0x75   :  { %v195_v51 = vld [vmem:[#allocation5 + $0x260] sm:$0xff]  ;;  %3218 = vmatpush2.bf16.msra.mxu0 %v7919_v54 }
  0x76   :  { %v319_v52 = vld [vmem:[#allocation5 + $0x640] sm:$0xff]  ;;  %v7912_v56 = vcombine.high %v191_v50, %v195_v51  ;;  %3258 = vmatprep.subr.bf16.mxu1 %v8048_v49  ;;  %v7911_v0 = vcombine.low %v191_v50, %v195_v51 }
  0x77   :  { %v323_v53 = vld [vmem:[#allocation5 + $0x660] sm:$0xff]  ;;  %3259 = vmatpush2.bf16.msra.mxu1 %v8047_v55 }
  0x78   :  { %v8040_v57 = vcombine.high %v319_v52, %v323_v53  ;;  %v183_v60 = vld [vmem:[#allocation5 + $0x200] sm:$0xff]  ;;  %3219 = vmatprep.subr.bf16.mxu0 %v7912_v56  ;;  %v8039_v1 = vcombine.low %v319_v52, %v323_v53 }
  0x79   :  { %v187_v61 = vld [vmem:[#allocation5 + $0x220] sm:$0xff]  ;;  %3220 = vmatpush2.bf16.msra.mxu0 %v7911_v0 }
  0x7a   :  { %v311_v62 = vld [vmem:[#allocation5 + $0x600] sm:$0xff]  ;;  %v7904_v2 = vcombine.high %v183_v60, %v187_v61  ;;  %3260 = vmatprep.subr.bf16.mxu1 %v8040_v57  ;;  %v7903_v8 = vcombine.low %v183_v60, %v187_v61 }
  0x7b   :  { %v315_v63 = vld [vmem:[#allocation5 + $0x620] sm:$0xff]  ;;  %3261 = vmatpush2.bf16.msra.mxu1 %v8039_v1 }
  0x7c   :  { %v8032_v3 = vcombine.high %v311_v62, %v315_v63  ;;  %v431_v4 = vld [vmem:[#allocation5 + $0x9c0] sm:$0xff]  ;;  %3221 = vmatprep.subr.bf16.mxu0 %v7904_v2  ;;  %v8031_v10 = vcombine.low %v311_v62, %v315_v63 }
  0x7d   :  { %v435_v5 = vld [vmem:[#allocation5 + $0x9e0] sm:$0xff]  ;;  %3222 = vmatpush2.bf16.msra.mxu0 %v7903_v8 }
  0x7e   :  { %v559_v6 = vld [vmem:[#allocation5 + $0xdc0] sm:$0xff]  ;;  %v8152_v12 = vcombine.high %v431_v4, %v435_v5  ;;  %3262 = vmatprep.subr.bf16.mxu1 %v8032_v3  ;;  %v8151_v21 = vcombine.low %v431_v4, %v435_v5 }
  0x7f   :  { %v563_v7 = vld [vmem:[#allocation5 + $0xde0] sm:$0xff]  ;;  %3263 = vmatpush2.bf16.msra.mxu1 %v8031_v10 }
  0x80   :  { %v103_v9 = vld [vmem:[#allocation2] sm:$0xff]  ;;  %v8280_v13 = vcombine.high %v559_v6, %v563_v7  ;;  %3273 = vmatprep.subr.bf16.mxu0 %v8152_v12  ;;  %v8279_v23 = vcombine.low %v559_v6, %v563_v7 }
  0x81   :  { %v423_v14 = vld [vmem:[#allocation5 + $0x980] sm:$0xff]  ;;  %v9141_v16 = vpack.c.bf16 %v103_v9, %v103_v9 }
  0x82   :  { %v427_v15 = vld [vmem:[#allocation5 + $0x9a0] sm:$0xff]  ;;  %3314 = vmatprep.subr.bf16.mxu1 %v8280_v13  ;;  %3265 = vmatmul.mubr.bf16.vlgmr.msra.gmra.mxu1 %v9143_v20 }
  0x83   :  { %v551_v17 = vld [vmem:[#allocation5 + $0xd80] sm:$0xff]  ;;  %v8144_v24 = vcombine.high %v423_v14, %v427_v15  ;;  %3224 = vmatmul.mubr.bf16.vlgmr.msra.gmra.mxu0 %v9141_v16  ;;  %v8143_v32 = vcombine.low %v423_v14, %v427_v15  ;;  %3315 = vmatpush1.bf16.msra.mxu1 %v8279_v23 }
  0x84   :  { %v555_v18 = vld [vmem:[#allocation5 + $0xda0] sm:$0xff]  ;;  %3274 = vmatpush1.bf16.msra.mxu0 %v8151_v21  ;;  %3305 = vmatprep.mubr.bf16.mxu0 %v9145_v28 }
  0x85   :  { %v8272_v25 = vcombine.high %v551_v17, %v555_v18  ;;  %v415_v26 = vld [vmem:[#allocation5 + $0x940] sm:$0xff]  ;;  %3275 = vmatprep.subr.bf16.mxu0 %v8144_v24  ;;  %v8271_v33 = vcombine.low %v551_v17, %v555_v18  ;;  %3346 = vmatprep.mubr.bf16.mxu1 %v9148_v31 }
  0x86   :  { %v419_v27 = vld [vmem:[#allocation5 + $0x960] sm:$0xff] }
  0x87   :  { %v543_v29 = vld [vmem:[#allocation5 + $0xd40] sm:$0xff]  ;;  %v8136_v34 = vcombine.high %v415_v26, %v419_v27  ;;  %3316 = vmatprep.subr.bf16.mxu1 %v8272_v25  ;;  %v8135_v40 = vcombine.low %v415_v26, %v419_v27 }
  0x88   :  { %v547_v30 = vld [vmem:[#allocation5 + $0xd60] sm:$0xff]  ;;  %3276 = vmatpush1.bf16.msra.mxu0 %v8143_v32  ;;  %3317 = vmatpush1.bf16.msra.mxu1 %v8271_v33 }
  0x89   :  { %v8264_v35 = vcombine.high %v543_v29, %v547_v30  ;;  %v407_v36 = vld [vmem:[#allocation5 + $0x900] sm:$0xff]  ;;  %3277 = vmatprep.subr.bf16.mxu0 %v8136_v34  ;;  %v8263_v41 = vcombine.low %v543_v29, %v547_v30 }
  0x8a   :  { %v411_v37 = vld [vmem:[#allocation5 + $0x920] sm:$0xff] }
  0x8b   :  { %v535_v38 = vld [vmem:[#allocation5 + $0xd00] sm:$0xff]  ;;  %v8128_v42 = vcombine.high %v407_v36, %v411_v37  ;;  %3318 = vmatprep.subr.bf16.mxu1 %v8264_v35  ;;  %v8127_v48 = vcombine.low %v407_v36, %v411_v37 }
  0x8c   :  { %v539_v39 = vld [vmem:[#allocation5 + $0xd20] sm:$0xff]  ;;  %3278 = vmatpush1.bf16.msra.mxu0 %v8135_v40  ;;  %3319 = vmatpush1.bf16.msra.mxu1 %v8263_v41 }
  0x8d   :  { %v8256_v43 = vcombine.high %v535_v38, %v539_v39  ;;  %v399_v44 = vld [vmem:[#allocation5 + $0x8c0] sm:$0xff]  ;;  %3279 = vmatprep.subr.bf16.mxu0 %v8128_v42  ;;  %v8255_v49 = vcombine.low %v535_v38, %v539_v39 }
  0x8e   :  { %v403_v45 = vld [vmem:[#allocation5 + $0x8e0] sm:$0xff] }
  0x8f   :  { %v527_v46 = vld [vmem:[#allocation5 + $0xcc0] sm:$0xff]  ;;  %v8120_v50 = vcombine.high %v399_v44, %v403_v45  ;;  %3320 = vmatprep.subr.bf16.mxu1 %v8256_v43  ;;  %v8119_v56 = vcombine.low %v399_v44, %v403_v45 }
  0x90   :  { %v531_v47 = vld [vmem:[#allocation5 + $0xce0] sm:$0xff]  ;;  %3280 = vmatpush1.bf16.msra.mxu0 %v8127_v48  ;;  %3321 = vmatpush1.bf16.msra.mxu1 %v8255_v49 }
  0x91   :  { %v8248_v51 = vcombine.high %v527_v46, %v531_v47  ;;  %v391_v52 = vld [vmem:[#allocation5 + $0x880] sm:$0xff]  ;;  %3281 = vmatprep.subr.bf16.mxu0 %v8120_v50  ;;  %v8247_v57 = vcombine.low %v527_v46, %v531_v47 }
  0x92   :  { %v395_v53 = vld [vmem:[#allocation5 + $0x8a0] sm:$0xff] }
  0x93   :  { %v519_v54 = vld [vmem:[#allocation5 + $0xc80] sm:$0xff]  ;;  %v8112_v60 = vcombine.high %v391_v52, %v395_v53  ;;  %3322 = vmatprep.subr.bf16.mxu1 %v8248_v51  ;;  %v8111_v2 = vcombine.low %v391_v52, %v395_v53 }
  0x94   :  { %v523_v55 = vld [vmem:[#allocation5 + $0xca0] sm:$0xff]  ;;  %3282 = vmatpush1.bf16.msra.mxu0 %v8119_v56  ;;  %3323 = vmatpush1.bf16.msra.mxu1 %v8247_v57 }
  0x95   :  { %v8240_v61 = vcombine.high %v519_v54, %v523_v55  ;;  %v383_v62 = vld [vmem:[#allocation5 + $0x840] sm:$0xff]  ;;  %3283 = vmatprep.subr.bf16.mxu0 %v8112_v60  ;;  %v8239_v3 = vcombine.low %v519_v54, %v523_v55 }
  0x96   :  { %v387_v63 = vld [vmem:[#allocation5 + $0x860] sm:$0xff] }
  0x97   :  { %v511_v0 = vld [vmem:[#allocation5 + $0xc40] sm:$0xff]  ;;  %v8104_v4 = vcombine.high %v383_v62, %v387_v63  ;;  %3324 = vmatprep.subr.bf16.mxu1 %v8240_v61  ;;  %v8103_v10 = vcombine.low %v383_v62, %v387_v63 }
  0x98   :  { %v515_v1 = vld [vmem:[#allocation5 + $0xc60] sm:$0xff]  ;;  %3284 = vmatpush1.bf16.msra.mxu0 %v8111_v2  ;;  %3325 = vmatpush1.bf16.msra.mxu1 %v8239_v3 }
  0x99   :  { %v8232_v5 = vcombine.high %v511_v0, %v515_v1  ;;  %v375_v6 = vld [vmem:[#allocation5 + $0x800] sm:$0xff]  ;;  %3285 = vmatprep.subr.bf16.mxu0 %v8104_v4  ;;  %v8231_v11 = vcombine.low %v511_v0, %v515_v1 }
  0x9a   :  { %v379_v7 = vld [vmem:[#allocation5 + $0x820] sm:$0xff] }
  0x9b   :  { %v503_v8 = vld [vmem:[#allocation5 + $0xc00] sm:$0xff]  ;;  %v8096_v12 = vcombine.high %v375_v6, %v379_v7  ;;  %3326 = vmatprep.subr.bf16.mxu1 %v8232_v5  ;;  %v8095_v19 = vcombine.low %v375_v6, %v379_v7 }
  0x9c   :  { %v507_v9 = vld [vmem:[#allocation5 + $0xc20] sm:$0xff]  ;;  %3286 = vmatpush1.bf16.msra.mxu0 %v8103_v10  ;;  %3327 = vmatpush1.bf16.msra.mxu1 %v8231_v11 }
  0x9d   :  { %v8224_v13 = vcombine.high %v503_v8, %v507_v9  ;;  %v495_v14 = vld [vmem:[#allocation5 + $0xbc0] sm:$0xff]  ;;  %3287 = vmatprep.subr.bf16.mxu0 %v8096_v12  ;;  %v8223_v21 = vcombine.low %v503_v8, %v507_v9 }
  0x9e   :  { %v499_v15 = vld [vmem:[#allocation5 + $0xbe0] sm:$0xff] }
  0x9f   :  { %v623_v17 = vld [vmem:[#allocation5 + $0xfc0] sm:$0xff]  ;;  %v8216_v22 = vcombine.high %v495_v14, %v499_v15  ;;  %3328 = vmatprep.subr.bf16.mxu1 %v8224_v13  ;;  %v8215_v29 = vcombine.low %v495_v14, %v499_v15 }
  0xa0   :  { %v627_v18 = vld [vmem:[#allocation5 + $0xfe0] sm:$0xff]  ;;  %3288 = vmatpush1.bf16.msra.mxu0 %v8095_v19  ;;  %3329 = vmatpush1.bf16.msra.mxu1 %v8223_v21 }
  0xa1   :  { %v8344_v23 = vcombine.high %v623_v17, %v627_v18  ;;  %v487_v24 = vld [vmem:[#allocation5 + $0xb80] sm:$0xff]  ;;  %3289 = vmatprep.subr.bf16.mxu0 %v8216_v22  ;;  %v8343_v30 = vcombine.low %v623_v17, %v627_v18  ;;  %v176_v22 = vld [vmem:[#allocation5 + $0x1c8] sm:$0xff] }
  0xa2   :  { %v491_v25 = vld [vmem:[#allocation5 + $0xba0] sm:$0xff] }
  0xa3   :  { %v615_v26 = vld [vmem:[#allocation5 + $0xf80] sm:$0xff]  ;;  %v8208_v32 = vcombine.high %v487_v24, %v491_v25  ;;  %3330 = vmatprep.subr.bf16.mxu1 %v8344_v23  ;;  %v8207_v38 = vcombine.low %v487_v24, %v491_v25  ;;  %v180_v23 = vld [vmem:[#allocation5 + $0x1e8] sm:$0xff] }
  0xa4   :  { %v619_v27 = vld [vmem:[#allocation5 + $0xfa0] sm:$0xff]  ;;  %3290 = vmatpush2.bf16.msra.mxu0 %v8215_v29  ;;  %3331 = vmatpush2.bf16.msra.mxu1 %v8343_v30  ;;  %v304_v24 = vld [vmem:[#allocation5 + $0x5c8] sm:$0xff]  ;;  %v109_v30 = vld [vmem:[#allocation2 + $0x30] sm:$0xff] }
  0xa5   :  { %v8336_v33 = vcombine.high %v615_v26, %v619_v27  ;;  %v479_v34 = vld [vmem:[#allocation5 + $0xb40] sm:$0xff]  ;;  %3291 = vmatprep.subr.bf16.mxu0 %v8208_v32  ;;  %v8335_v39 = vcombine.low %v615_v26, %v619_v27  ;;  %v308_v25 = vld [vmem:[#allocation5 + $0x5e8] sm:$0xff]  ;;  %v7898_v32 = vcombine.high %v176_v22, %v180_v23 }
  0xa6   :  { %v483_v35 = vld [vmem:[#allocation5 + $0xb60] sm:$0xff] }
  0xa7   :  { %v607_v36 = vld [vmem:[#allocation5 + $0xf40] sm:$0xff]  ;;  %v8200_v40 = vcombine.high %v479_v34, %v483_v35  ;;  %3332 = vmatprep.subr.bf16.mxu1 %v8336_v33  ;;  %v8199_v46 = vcombine.low %v479_v34, %v483_v35  ;;  %v8026_v33 = vcombine.high %v304_v24, %v308_v25  ;;  %v168_v34 = vld [vmem:[#allocation5 + $0x188] sm:$0xff] }
  0xa8   :  { %v611_v37 = vld [vmem:[#allocation5 + $0xf60] sm:$0xff]  ;;  %3292 = vmatpush2.bf16.msra.mxu0 %v8207_v38  ;;  %3333 = vmatpush2.bf16.msra.mxu1 %v8335_v39  ;;  %v172_v35 = vld [vmem:[#allocation5 + $0x1a8] sm:$0xff]  ;;  %v9155_v39 = vpack.c.bf16 %v109_v30, %v109_v30 }
  0xa9   :  { %v8328_v41 = vcombine.high %v607_v36, %v611_v37  ;;  %v471_v42 = vld [vmem:[#allocation5 + $0xb00] sm:$0xff]  ;;  %3293 = vmatprep.subr.bf16.mxu0 %v8200_v40  ;;  %v8327_v47 = vcombine.low %v607_v36, %v611_v37  ;;  %v296_v37 = vld [vmem:[#allocation5 + $0x588] sm:$0xff]  ;;  %v7897_v40 = vcombine.low %v176_v22, %v180_v23 }
  0xaa   :  { %v475_v43 = vld [vmem:[#allocation5 + $0xb20] sm:$0xff]  ;;  %v300_v38 = vld [vmem:[#allocation5 + $0x5a8] sm:$0xff] }
  0xab   :  { %v599_v44 = vld [vmem:[#allocation5 + $0xf00] sm:$0xff]  ;;  %v8192_v48 = vcombine.high %v471_v42, %v475_v43  ;;  %3334 = vmatprep.subr.bf16.mxu1 %v8328_v41  ;;  %v8191_v54 = vcombine.low %v471_v42, %v475_v43  ;;  %v8025_v41 = vcombine.low %v304_v24, %v308_v25  ;;  %v7890_v42 = vcombine.high %v168_v34, %v172_v35  ;;  %v120_v24 = vld [vmem:[#allocation5 + $0x8] sm:$0xff] }
  0xac   :  { %v603_v45 = vld [vmem:[#allocation5 + $0xf20] sm:$0xff]  ;;  %3294 = vmatpush2.bf16.msra.mxu0 %v8199_v46  ;;  %3335 = vmatpush2.bf16.msra.mxu1 %v8327_v47  ;;  %v8018_v43 = vcombine.high %v296_v37, %v300_v38  ;;  %v288_v46 = vld [vmem:[#allocation5 + $0x548] sm:$0xff] }
  0xad   :  { %v8320_v49 = vcombine.high %v599_v44, %v603_v45  ;;  %v463_v50 = vld [vmem:[#allocation5 + $0xac0] sm:$0xff]  ;;  %3295 = vmatprep.subr.bf16.mxu0 %v8192_v48  ;;  %v8319_v55 = vcombine.low %v599_v44, %v603_v45  ;;  %v160_v44 = vld [vmem:[#allocation5 + $0x148] sm:$0xff]  ;;  %v7889_v48 = vcombine.low %v168_v34, %v172_v35 }
  0xae   :  { %v467_v51 = vld [vmem:[#allocation5 + $0xae0] sm:$0xff]  ;;  %v164_v45 = vld [vmem:[#allocation5 + $0x168] sm:$0xff] }
  0xaf   :  { %v591_v52 = vld [vmem:[#allocation5 + $0xec0] sm:$0xff]  ;;  %v8184_v56 = vcombine.high %v463_v50, %v467_v51  ;;  %3336 = vmatprep.subr.bf16.mxu1 %v8320_v49  ;;  %v8183_v0 = vcombine.low %v463_v50, %v467_v51  ;;  %v292_v47 = vld [vmem:[#allocation5 + $0x568] sm:$0xff]  ;;  %v8017_v49 = vcombine.low %v296_v37, %v300_v38  ;;  %v7882_v50 = vcombine.high %v160_v44, %v164_v45 }
  0xb0   :  { %v595_v53 = vld [vmem:[#allocation5 + $0xee0] sm:$0xff]  ;;  %3296 = vmatpush2.bf16.msra.mxu0 %v8191_v54  ;;  %3337 = vmatpush2.bf16.msra.mxu1 %v8319_v55  ;;  %v8010_v51 = vcombine.high %v288_v46, %v292_v47  ;;  %v280_v54 = vld [vmem:[#allocation5 + $0x508] sm:$0xff] }
  0xb1   :  { %v8312_v57 = vcombine.high %v591_v52, %v595_v53  ;;  %v455_v60 = vld [vmem:[#allocation5 + $0xa80] sm:$0xff]  ;;  %3297 = vmatprep.subr.bf16.mxu0 %v8184_v56  ;;  %v8311_v1 = vcombine.low %v591_v52, %v595_v53  ;;  %v152_v52 = vld [vmem:[#allocation5 + $0x108] sm:$0xff]  ;;  %v7881_v56 = vcombine.low %v160_v44, %v164_v45 }
  0xb2   :  { %v459_v61 = vld [vmem:[#allocation5 + $0xaa0] sm:$0xff]  ;;  %v156_v53 = vld [vmem:[#allocation5 + $0x128] sm:$0xff] }
  0xb3   :  { %v583_v62 = vld [vmem:[#allocation5 + $0xe80] sm:$0xff]  ;;  %v8176_v2 = vcombine.high %v455_v60, %v459_v61  ;;  %3338 = vmatprep.subr.bf16.mxu1 %v8312_v57  ;;  %v8175_v8 = vcombine.low %v455_v60, %v459_v61  ;;  %v284_v55 = vld [vmem:[#allocation5 + $0x528] sm:$0xff]  ;;  %v8009_v57 = vcombine.low %v288_v46, %v292_v47  ;;  %v7874_v60 = vcombine.high %v152_v52, %v156_v53 }
  0xb4   :  { %v587_v63 = vld [vmem:[#allocation5 + $0xea0] sm:$0xff]  ;;  %3298 = vmatpush2.bf16.msra.mxu0 %v8183_v0  ;;  %3339 = vmatpush2.bf16.msra.mxu1 %v8311_v1  ;;  %v8002_v61 = vcombine.high %v280_v54, %v284_v55  ;;  %v272_v0 = vld [vmem:[#allocation5 + $0x4c8] sm:$0xff] }
  0xb5   :  { %v8304_v3 = vcombine.high %v583_v62, %v587_v63  ;;  %v447_v4 = vld [vmem:[#allocation5 + $0xa40] sm:$0xff]  ;;  %3299 = vmatprep.subr.bf16.mxu0 %v8176_v2  ;;  %v8303_v9 = vcombine.low %v583_v62, %v587_v63  ;;  %v144_v62 = vld [vmem:[#allocation5 + $0xc8] sm:$0xff]  ;;  %v7873_v2 = vcombine.low %v152_v52, %v156_v53 }
  0xb6   :  { %v451_v5 = vld [vmem:[#allocation5 + $0xa60] sm:$0xff]  ;;  %v148_v63 = vld [vmem:[#allocation5 + $0xe8] sm:$0xff] }
  0xb7   :  { %v575_v6 = vld [vmem:[#allocation5 + $0xe40] sm:$0xff]  ;;  %v8168_v10 = vcombine.high %v447_v4, %v451_v5  ;;  %3340 = vmatprep.subr.bf16.mxu1 %v8304_v3  ;;  %v8167_v17 = vcombine.low %v447_v4, %v451_v5  ;;  %v276_v1 = vld [vmem:[#allocation5 + $0x4e8] sm:$0xff]  ;;  %v8001_v3 = vcombine.low %v280_v54, %v284_v55  ;;  %v7866_v4 = vcombine.high %v144_v62, %v148_v63 }
  0xb8   :  { %v579_v7 = vld [vmem:[#allocation5 + $0xe60] sm:$0xff]  ;;  %3300 = vmatpush2.bf16.msra.mxu0 %v8175_v8  ;;  %3341 = vmatpush2.bf16.msra.mxu1 %v8303_v9  ;;  %v7994_v5 = vcombine.high %v272_v0, %v276_v1  ;;  %v264_v8 = vld [vmem:[#allocation5 + $0x488] sm:$0xff] }
  0xb9   :  { %v8296_v11 = vcombine.high %v575_v6, %v579_v7  ;;  %v439_v12 = vld [vmem:[#allocation5 + $0xa00] sm:$0xff]  ;;  %3301 = vmatprep.subr.bf16.mxu0 %v8168_v10  ;;  %v8295_v18 = vcombine.low %v575_v6, %v579_v7  ;;  %v136_v6 = vld [vmem:[#allocation5 + $0x88] sm:$0xff]  ;;  %v7865_v10 = vcombine.low %v144_v62, %v148_v63 }
  0xba   :  { %v443_v13 = vld [vmem:[#allocation5 + $0xa20] sm:$0xff]  ;;  %v140_v7 = vld [vmem:[#allocation5 + $0xa8] sm:$0xff] }
  0xbb   :  { %v567_v14 = vld [vmem:[#allocation5 + $0xe00] sm:$0xff]  ;;  %v8160_v19 = vcombine.high %v439_v12, %v443_v13  ;;  %3342 = vmatprep.subr.bf16.mxu1 %v8296_v11  ;;  %v8159_v26 = vcombine.low %v439_v12, %v443_v13  ;;  %v268_v9 = vld [vmem:[#allocation5 + $0x4a8] sm:$0xff]  ;;  %v7993_v11 = vcombine.low %v272_v0, %v276_v1  ;;  %v7858_v12 = vcombine.high %v136_v6, %v140_v7 }
  0xbc   :  { %v571_v15 = vld [vmem:[#allocation5 + $0xe20] sm:$0xff]  ;;  %3302 = vmatpush2.bf16.msra.mxu0 %v8167_v17  ;;  %3343 = vmatpush2.bf16.msra.mxu1 %v8295_v18  ;;  %v7986_v13 = vcombine.high %v264_v8, %v268_v9  ;;  %v256_v17 = vld [vmem:[#allocation5 + $0x448] sm:$0xff] }
  0xbd   :  { %v8288_v21 = vcombine.high %v567_v14, %v571_v15  ;;  %v107_v27 = vld [vmem:[#allocation2 + $0x20] sm:$0xff]  ;;  %3303 = vmatprep.subr.bf16.mxu0 %v8160_v19  ;;  %v8287_v29 = vcombine.low %v567_v14, %v571_v15  ;;  %v128_v14 = vld [vmem:[#allocation5 + $0x48] sm:$0xff]  ;;  %v7857_v19 = vcombine.low %v136_v6, %v140_v7 }
  0xbe   :  { %v9153_v36 = vpack.c.bf16 %v107_v27, %v107_v27  ;;  %v132_v15 = vld [vmem:[#allocation5 + $0x68] sm:$0xff] }
  0xbf   :  { %3344 = vmatprep.subr.bf16.mxu1 %v8288_v21  ;;  %v260_v18 = vld [vmem:[#allocation5 + $0x468] sm:$0xff]  ;;  %v7985_v21 = vcombine.low %v264_v8, %v268_v9  ;;  %v7850_v22 = vcombine.high %v128_v14, %v132_v15 }
  0xc0   :  { %3304 = vmatpush2.bf16.msra.mxu0 %v8159_v26  ;;  %3345 = vmatpush2.bf16.msra.mxu1 %v8287_v29  ;;  %v7978_v23 = vcombine.high %v256_v17, %v260_v18  ;;  %v124_v25 = vld [vmem:[#allocation5 + $0x28] sm:$0xff]  ;;  %v7849_v29 = vcombine.low %v128_v14, %v132_v15  ;;  %v7977_v30 = vcombine.low %v256_v17, %v260_v18 }
  0xc1   :  { %3355 = vmatprep.subr.bf16.mxu0 %v7898_v32  ;;  %3396 = vmatprep.subr.bf16.mxu1 %v8026_v33  ;;  %v248_v26 = vld [vmem:[#allocation5 + $0x408] sm:$0xff]  ;;  %v7842_v32 = vcombine.high %v120_v24, %v124_v25 }
  0xc2   :  { %v252_v27 = vld [vmem:[#allocation5 + $0x428] sm:$0xff] }
  0xc3   :  { %3306 = vmatmul.mubr.bf16.vlgmr.msra.gmra.mxu0 %v9153_v36  ;;  %3347 = vmatmul.mubr.bf16.vlgmr.msra.gmra.mxu1 %v9155_v39  ;;  %v7970_v33 = vcombine.high %v248_v26, %v252_v27  ;;  %v240_v34 = vld [vmem:[#allocation5 + $0x3c8] sm:$0xff] }
  0xc4   :  { %3356 = vmatpush1.bf16.msra.mxu0 %v7897_v40  ;;  %3397 = vmatpush1.bf16.msra.mxu1 %v8025_v41  ;;  %v244_v35 = vld [vmem:[#allocation5 + $0x3e8] sm:$0xff]  ;;  %v7841_v40 = vcombine.low %v120_v24, %v124_v25  ;;  %v7969_v41 = vcombine.low %v248_v26, %v252_v27 }
  0xc5   :  { %3357 = vmatprep.subr.bf16.mxu0 %v7890_v42  ;;  %3398 = vmatprep.subr.bf16.mxu1 %v8018_v43  ;;  %v368_v37 = vld [vmem:[#allocation5 + $0x7c8] sm:$0xff]  ;;  %v7962_v42 = vcombine.high %v240_v34, %v244_v35 }
  0xc6   :  { %3387 = vmatprep.mubr.bf16.mxu0 %v9135_v58  ;;  %3428 = vmatprep.mubr.bf16.mxu1 %v9137_v59  ;;  %v372_v38 = vld [vmem:[#allocation5 + $0x7e8] sm:$0xff] }
  0xc7   :  { %v8090_v43 = vcombine.high %v368_v37, %v372_v38  ;;  %v232_v44 = vld [vmem:[#allocation5 + $0x388] sm:$0xff] }
  0xc8   :  { %3358 = vmatpush1.bf16.msra.mxu0 %v7889_v48  ;;  %3399 = vmatpush1.bf16.msra.mxu1 %v8017_v49  ;;  %v236_v45 = vld [vmem:[#allocation5 + $0x3a8] sm:$0xff]  ;;  %v7961_v48 = vcombine.low %v240_v34, %v244_v35  ;;  %v8089_v49 = vcombine.low %v368_v37, %v372_v38 }
  0xc9   :  { %3359 = vmatprep.subr.bf16.mxu0 %v7882_v50  ;;  %3400 = vmatprep.subr.bf16.mxu1 %v8010_v51  ;;  %v360_v46 = vld [vmem:[#allocation5 + $0x788] sm:$0xff]  ;;  %v7954_v50 = vcombine.high %v232_v44, %v236_v45 }
  0xca   :  { %v364_v47 = vld [vmem:[#allocation5 + $0x7a8] sm:$0xff] }
  0xcb   :  { %v8082_v51 = vcombine.high %v360_v46, %v364_v47  ;;  %v224_v52 = vld [vmem:[#allocation5 + $0x348] sm:$0xff] }
  0xcc   :  { %3360 = vmatpush1.bf16.msra.mxu0 %v7881_v56  ;;  %3401 = vmatpush1.bf16.msra.mxu1 %v8009_v57  ;;  %v228_v53 = vld [vmem:[#allocation5 + $0x368] sm:$0xff]  ;;  %v7953_v56 = vcombine.low %v232_v44, %v236_v45  ;;  %v8081_v57 = vcombine.low %v360_v46, %v364_v47 }
  0xcd   :  { %3361 = vmatprep.subr.bf16.mxu0 %v7874_v60  ;;  %3402 = vmatprep.subr.bf16.mxu1 %v8002_v61  ;;  %v352_v54 = vld [vmem:[#allocation5 + $0x748] sm:$0xff]  ;;  %v7946_v60 = vcombine.high %v224_v52, %v228_v53 }
  0xce   :  { %v356_v55 = vld [vmem:[#allocation5 + $0x768] sm:$0xff] }
  0xcf   :  { %v8074_v61 = vcombine.high %v352_v54, %v356_v55  ;;  %v216_v62 = vld [vmem:[#allocation5 + $0x308] sm:$0xff] }
  0xd0   :  { %3362 = vmatpush1.bf16.msra.mxu0 %v7873_v2  ;;  %3403 = vmatpush1.bf16.msra.mxu1 %v8001_v3  ;;  %v220_v63 = vld [vmem:[#allocation5 + $0x328] sm:$0xff]  ;;  %v7945_v2 = vcombine.low %v224_v52, %v228_v53  ;;  %v8073_v3 = vcombine.low %v352_v54, %v356_v55 }
  0xd1   :  { %3363 = vmatprep.subr.bf16.mxu0 %v7866_v4  ;;  %3404 = vmatprep.subr.bf16.mxu1 %v7994_v5  ;;  %v344_v0 = vld [vmem:[#allocation5 + $0x708] sm:$0xff]  ;;  %v7938_v4 = vcombine.high %v216_v62, %v220_v63 }
  0xd2   :  { %v348_v1 = vld [vmem:[#allocation5 + $0x728] sm:$0xff] }
  0xd3   :  { %v8066_v5 = vcombine.high %v344_v0, %v348_v1  ;;  %v208_v6 = vld [vmem:[#allocation5 + $0x2c8] sm:$0xff] }
  0xd4   :  { %3364 = vmatpush1.bf16.msra.mxu0 %v7865_v10  ;;  %3405 = vmatpush1.bf16.msra.mxu1 %v7993_v11  ;;  %v212_v7 = vld [vmem:[#allocation5 + $0x2e8] sm:$0xff]  ;;  %v7937_v10 = vcombine.low %v216_v62, %v220_v63  ;;  %v8065_v11 = vcombine.low %v344_v0, %v348_v1 }
  0xd5   :  { %3365 = vmatprep.subr.bf16.mxu0 %v7858_v12  ;;  %3406 = vmatprep.subr.bf16.mxu1 %v7986_v13  ;;  %v336_v8 = vld [vmem:[#allocation5 + $0x6c8] sm:$0xff]  ;;  %v7930_v12 = vcombine.high %v208_v6, %v212_v7 }
  0xd6   :  { %v340_v9 = vld [vmem:[#allocation5 + $0x6e8] sm:$0xff] }
  0xd7   :  { %v8058_v13 = vcombine.high %v336_v8, %v340_v9  ;;  %v200_v14 = vld [vmem:[#allocation5 + $0x288] sm:$0xff] }
  0xd8   :  { %3366 = vmatpush1.bf16.msra.mxu0 %v7857_v19  ;;  %3407 = vmatpush1.bf16.msra.mxu1 %v7985_v21  ;;  %v204_v15 = vld [vmem:[#allocation5 + $0x2a8] sm:$0xff]  ;;  %v7929_v19 = vcombine.low %v208_v6, %v212_v7  ;;  %v8057_v21 = vcombine.low %v336_v8, %v340_v9 }
  0xd9   :  { %3367 = vmatprep.subr.bf16.mxu0 %v7850_v22  ;;  %3408 = vmatprep.subr.bf16.mxu1 %v7978_v23  ;;  %v328_v17 = vld [vmem:[#allocation5 + $0x688] sm:$0xff]  ;;  %v7922_v22 = vcombine.high %v200_v14, %v204_v15 }
  0xda   :  { %v332_v18 = vld [vmem:[#allocation5 + $0x6a8] sm:$0xff] }
  0xdb   :  { %v8050_v23 = vcombine.high %v328_v17, %v332_v18  ;;  %v192_v24 = vld [vmem:[#allocation5 + $0x248] sm:$0xff] }
  0xdc   :  { %3368 = vmatpush1.bf16.msra.mxu0 %v7849_v29  ;;  %3409 = vmatpush1.bf16.msra.mxu1 %v7977_v30  ;;  %v196_v25 = vld [vmem:[#allocation5 + $0x268] sm:$0xff]  ;;  %v7921_v29 = vcombine.low %v200_v14, %v204_v15  ;;  %v8049_v30 = vcombine.low %v328_v17, %v332_v18 }
  0xdd   :  { %3369 = vmatprep.subr.bf16.mxu0 %v7842_v32  ;;  %3410 = vmatprep.subr.bf16.mxu1 %v7970_v33  ;;  %v320_v26 = vld [vmem:[#allocation5 + $0x648] sm:$0xff]  ;;  %v7914_v32 = vcombine.high %v192_v24, %v196_v25 }
  0xde   :  { %v324_v27 = vld [vmem:[#allocation5 + $0x668] sm:$0xff] }
  0xdf   :  { %v8042_v33 = vcombine.high %v320_v26, %v324_v27  ;;  %v184_v34 = vld [vmem:[#allocation5 + $0x208] sm:$0xff] }
  0xe0   :  { %3370 = vmatpush1.bf16.msra.mxu0 %v7841_v40  ;;  %3411 = vmatpush1.bf16.msra.mxu1 %v7969_v41  ;;  %v188_v35 = vld [vmem:[#allocation5 + $0x228] sm:$0xff]  ;;  %v7913_v40 = vcombine.low %v192_v24, %v196_v25  ;;  %v8041_v41 = vcombine.low %v320_v26, %v324_v27 }
  0xe1   :  { %3371 = vmatprep.subr.bf16.mxu0 %v7962_v42  ;;  %3412 = vmatprep.subr.bf16.mxu1 %v8090_v43  ;;  %v312_v37 = vld [vmem:[#allocation5 + $0x608] sm:$0xff]  ;;  %v7906_v42 = vcombine.high %v184_v34, %v188_v35 }
  0xe2   :  { %v316_v38 = vld [vmem:[#allocation5 + $0x628] sm:$0xff] }
  0xe3   :  { %v8034_v43 = vcombine.high %v312_v37, %v316_v38  ;;  %v432_v44 = vld [vmem:[#allocation5 + $0x9c8] sm:$0xff] }
  0xe4   :  { %3372 = vmatpush2.bf16.msra.mxu0 %v7961_v48  ;;  %3413 = vmatpush2.bf16.msra.mxu1 %v8089_v49  ;;  %v436_v45 = vld [vmem:[#allocation5 + $0x9e8] sm:$0xff]  ;;  %v7905_v48 = vcombine.low %v184_v34, %v188_v35  ;;  %v8033_v49 = vcombine.low %v312_v37, %v316_v38 }
  0xe5   :  { %3373 = vmatprep.subr.bf16.mxu0 %v7954_v50  ;;  %3414 = vmatprep.subr.bf16.mxu1 %v8082_v51  ;;  %v560_v46 = vld [vmem:[#allocation5 + $0xdc8] sm:$0xff]  ;;  %v8154_v50 = vcombine.high %v432_v44, %v436_v45 }
  0xe6   :  { %v564_v47 = vld [vmem:[#allocation5 + $0xde8] sm:$0xff] }
  0xe7   :  { %v8282_v51 = vcombine.high %v560_v46, %v564_v47  ;;  %v424_v52 = vld [vmem:[#allocation5 + $0x988] sm:$0xff] }
  0xe8   :  { %3374 = vmatpush2.bf16.msra.mxu0 %v7953_v56  ;;  %3415 = vmatpush2.bf16.msra.mxu1 %v8081_v57  ;;  %v428_v53 = vld [vmem:[#allocation5 + $0x9a8] sm:$0xff]  ;;  %v8153_v56 = vcombine.low %v432_v44, %v436_v45  ;;  %v8281_v57 = vcombine.low %v560_v46, %v564_v47 }
  0xe9   :  { %3375 = vmatprep.subr.bf16.mxu0 %v7946_v60  ;;  %3416 = vmatprep.subr.bf16.mxu1 %v8074_v61  ;;  %v552_v54 = vld [vmem:[#allocation5 + $0xd88] sm:$0xff]  ;;  %v8146_v60 = vcombine.high %v424_v52, %v428_v53 }
  0xea   :  { %v556_v55 = vld [vmem:[#allocation5 + $0xda8] sm:$0xff] }
  0xeb   :  { %v8274_v61 = vcombine.high %v552_v54, %v556_v55  ;;  %v416_v62 = vld [vmem:[#allocation5 + $0x948] sm:$0xff] }
  0xec   :  { %3376 = vmatpush2.bf16.msra.mxu0 %v7945_v2  ;;  %3417 = vmatpush2.bf16.msra.mxu1 %v8073_v3  ;;  %v420_v63 = vld [vmem:[#allocation5 + $0x968] sm:$0xff]  ;;  %v8145_v2 = vcombine.low %v424_v52, %v428_v53  ;;  %v8273_v3 = vcombine.low %v552_v54, %v556_v55 }
  0xed   :  { %3377 = vmatprep.subr.bf16.mxu0 %v7938_v4  ;;  %3418 = vmatprep.subr.bf16.mxu1 %v8066_v5  ;;  %v544_v0 = vld [vmem:[#allocation5 + $0xd48] sm:$0xff]  ;;  %v8138_v4 = vcombine.high %v416_v62, %v420_v63 }
  0xee   :  { %v548_v1 = vld [vmem:[#allocation5 + $0xd68] sm:$0xff] }
  0xef   :  { %v8266_v5 = vcombine.high %v544_v0, %v548_v1  ;;  %v408_v6 = vld [vmem:[#allocation5 + $0x908] sm:$0xff] }
  0xf0   :  { %3378 = vmatpush2.bf16.msra.mxu0 %v7937_v10  ;;  %3419 = vmatpush2.bf16.msra.mxu1 %v8065_v11  ;;  %v412_v7 = vld [vmem:[#allocation5 + $0x928] sm:$0xff]  ;;  %v8137_v10 = vcombine.low %v416_v62, %v420_v63  ;;  %v8265_v11 = vcombine.low %v544_v0, %v548_v1 }
  0xf1   :  { %3379 = vmatprep.subr.bf16.mxu0 %v7930_v12  ;;  %3420 = vmatprep.subr.bf16.mxu1 %v8058_v13  ;;  %v536_v8 = vld [vmem:[#allocation5 + $0xd08] sm:$0xff]  ;;  %v8130_v12 = vcombine.high %v408_v6, %v412_v7 }
  0xf2   :  { %v540_v9 = vld [vmem:[#allocation5 + $0xd28] sm:$0xff] }
  0xf3   :  { %v8258_v13 = vcombine.high %v536_v8, %v540_v9  ;;  %v400_v14 = vld [vmem:[#allocation5 + $0x8c8] sm:$0xff] }
  0xf4   :  { %3380 = vmatpush2.bf16.msra.mxu0 %v7929_v19  ;;  %3421 = vmatpush2.bf16.msra.mxu1 %v8057_v21  ;;  %v404_v15 = vld [vmem:[#allocation5 + $0x8e8] sm:$0xff]  ;;  %v8129_v19 = vcombine.low %v408_v6, %v412_v7  ;;  %v8257_v21 = vcombine.low %v536_v8, %v540_v9 }
  0xf5   :  { %3381 = vmatprep.subr.bf16.mxu0 %v7922_v22  ;;  %3422 = vmatprep.subr.bf16.mxu1 %v8050_v23  ;;  %v528_v17 = vld [vmem:[#allocation5 + $0xcc8] sm:$0xff]  ;;  %v8122_v22 = vcombine.high %v400_v14, %v404_v15 }
  0xf6   :  { %v532_v18 = vld [vmem:[#allocation5 + $0xce8] sm:$0xff] }
  0xf7   :  { %v8250_v23 = vcombine.high %v528_v17, %v532_v18  ;;  %v392_v24 = vld [vmem:[#allocation5 + $0x888] sm:$0xff] }
  0xf8   :  { %3382 = vmatpush2.bf16.msra.mxu0 %v7921_v29  ;;  %3423 = vmatpush2.bf16.msra.mxu1 %v8049_v30  ;;  %v396_v25 = vld [vmem:[#allocation5 + $0x8a8] sm:$0xff]  ;;  %v8121_v29 = vcombine.low %v400_v14, %v404_v15  ;;  %v8249_v30 = vcombine.low %v528_v17, %v532_v18 }
  0xf9   :  { %3383 = vmatprep.subr.bf16.mxu0 %v7914_v32  ;;  %3424 = vmatprep.subr.bf16.mxu1 %v8042_v33  ;;  %v520_v26 = vld [vmem:[#allocation5 + $0xc88] sm:$0xff]  ;;  %v8114_v32 = vcombine.high %v392_v24, %v396_v25 }
  0xfa   :  { %v524_v27 = vld [vmem:[#allocation5 + $0xca8] sm:$0xff] }
  0xfb   :  { %v8242_v33 = vcombine.high %v520_v26, %v524_v27  ;;  %v384_v34 = vld [vmem:[#allocation5 + $0x848] sm:$0xff] }
  0xfc   :  { %3384 = vmatpush2.bf16.msra.mxu0 %v7913_v40  ;;  %3425 = vmatpush2.bf16.msra.mxu1 %v8041_v41  ;;  %v388_v35 = vld [vmem:[#allocation5 + $0x868] sm:$0xff]  ;;  %v8113_v40 = vcombine.low %v392_v24, %v396_v25  ;;  %v8241_v41 = vcombine.low %v520_v26, %v524_v27 }
  0xfd   :  { %3385 = vmatprep.subr.bf16.mxu0 %v7906_v42  ;;  %3426 = vmatprep.subr.bf16.mxu1 %v8034_v43  ;;  %v512_v37 = vld [vmem:[#allocation5 + $0xc48] sm:$0xff]  ;;  %v8106_v42 = vcombine.high %v384_v34, %v388_v35 }
  0xfe   :  { %v516_v38 = vld [vmem:[#allocation5 + $0xc68] sm:$0xff] }
  0xff   :  { %v8234_v43 = vcombine.high %v512_v37, %v516_v38  ;;  %v376_v44 = vld [vmem:[#allocation5 + $0x808] sm:$0xff] }
 0x100   :  { %3386 = vmatpush2.bf16.msra.mxu0 %v7905_v48  ;;  %3427 = vmatpush2.bf16.msra.mxu1 %v8033_v49  ;;  %v380_v45 = vld [vmem:[#allocation5 + $0x828] sm:$0xff]  ;;  %v8105_v48 = vcombine.low %v384_v34, %v388_v35  ;;  %v8233_v49 = vcombine.low %v512_v37, %v516_v38 }
 0x101   :  { %3437 = vmatprep.subr.bf16.mxu0 %v8154_v50  ;;  %3478 = vmatprep.subr.bf16.mxu1 %v8282_v51  ;;  %v504_v46 = vld [vmem:[#allocation5 + $0xc08] sm:$0xff]  ;;  %v8098_v50 = vcombine.high %v376_v44, %v380_v45 }
 0x102   :  { %v508_v47 = vld [vmem:[#allocation5 + $0xc28] sm:$0xff] }
 0x103   :  { %3388 = vmatmul.mubr.bf16.vlgmr.msra.gmra.mxu0 %v9141_v16  ;;  %3429 = vmatmul.mubr.bf16.vlgmr.msra.gmra.mxu1 %v9143_v20  ;;  %v8226_v51 = vcombine.high %v504_v46, %v508_v47  ;;  %v496_v52 = vld [vmem:[#allocation5 + $0xbc8] sm:$0xff] }
 0x104   :  { %3438 = vmatpush1.bf16.msra.mxu0 %v8153_v56  ;;  %3479 = vmatpush1.bf16.msra.mxu1 %v8281_v57  ;;  %v500_v53 = vld [vmem:[#allocation5 + $0xbe8] sm:$0xff]  ;;  %v8097_v56 = vcombine.low %v376_v44, %v380_v45  ;;  %v8225_v57 = vcombine.low %v504_v46, %v508_v47 }
 0x105   :  { %3439 = vmatprep.subr.bf16.mxu0 %v8146_v60  ;;  %3480 = vmatprep.subr.bf16.mxu1 %v8274_v61  ;;  %v624_v54 = vld [vmem:[#allocation5 + $0xfc8] sm:$0xff]  ;;  %v8218_v60 = vcombine.high %v496_v52, %v500_v53 }
 0x106   :  { %3469 = vmatprep.mubr.bf16.mxu0 %v9145_v28  ;;  %3510 = vmatprep.mubr.bf16.mxu1 %v9148_v31  ;;  %v628_v55 = vld [vmem:[#allocation5 + $0xfe8] sm:$0xff] }
 0x107   :  { %v8346_v61 = vcombine.high %v624_v54, %v628_v55  ;;  %v488_v62 = vld [vmem:[#allocation5 + $0xb88] sm:$0xff] }
 0x108   :  { %3440 = vmatpush1.bf16.msra.mxu0 %v8145_v2  ;;  %3481 = vmatpush1.bf16.msra.mxu1 %v8273_v3  ;;  %v492_v63 = vld [vmem:[#allocation5 + $0xba8] sm:$0xff]  ;;  %v8217_v2 = vcombine.low %v496_v52, %v500_v53  ;;  %v8345_v3 = vcombine.low %v624_v54, %v628_v55 }
 0x109   :  { %3441 = vmatprep.subr.bf16.mxu0 %v8138_v4  ;;  %3482 = vmatprep.subr.bf16.mxu1 %v8266_v5  ;;  %v616_v0 = vld [vmem:[#allocation5 + $0xf88] sm:$0xff]  ;;  %v8210_v4 = vcombine.high %v488_v62, %v492_v63 }
 0x10a   :  { %v620_v1 = vld [vmem:[#allocation5 + $0xfa8] sm:$0xff] }
 0x10b   :  { %v8338_v5 = vcombine.high %v616_v0, %v620_v1  ;;  %v480_v6 = vld [vmem:[#allocation5 + $0xb48] sm:$0xff] }
 0x10c   :  { %3442 = vmatpush1.bf16.msra.mxu0 %v8137_v10  ;;  %3483 = vmatpush1.bf16.msra.mxu1 %v8265_v11  ;;  %v484_v7 = vld [vmem:[#allocation5 + $0xb68] sm:$0xff]  ;;  %v8209_v10 = vcombine.low %v488_v62, %v492_v63  ;;  %v8337_v11 = vcombine.low %v616_v0, %v620_v1  ;;  %v177_v62 = vld [vmem:[#allocation5 + $0x1d0] sm:$0xff] }
 0x10d   :  { %3443 = vmatprep.subr.bf16.mxu0 %v8130_v12  ;;  %3484 = vmatprep.subr.bf16.mxu1 %v8258_v13  ;;  %v608_v8 = vld [vmem:[#allocation5 + $0xf48] sm:$0xff]  ;;  %v8202_v12 = vcombine.high %v480_v6, %v484_v7  ;;  %v181_v63 = vld [vmem:[#allocation5 + $0x1f0] sm:$0xff] }
 0x10e   :  { %v612_v9 = vld [vmem:[#allocation5 + $0xf68] sm:$0xff]  ;;  %v305_v0 = vld [vmem:[#allocation5 + $0x5d0] sm:$0xff] }
 0x10f   :  { %v8330_v13 = vcombine.high %v608_v8, %v612_v9  ;;  %v472_v14 = vld [vmem:[#allocation5 + $0xb08] sm:$0xff]  ;;  %v309_v1 = vld [vmem:[#allocation5 + $0x5f0] sm:$0xff] }
 0x110   :  { %3444 = vmatpush1.bf16.msra.mxu0 %v8129_v19  ;;  %3485 = vmatpush1.bf16.msra.mxu1 %v8257_v21  ;;  %v476_v15 = vld [vmem:[#allocation5 + $0xb28] sm:$0xff]  ;;  %v8201_v19 = vcombine.low %v480_v6, %v484_v7  ;;  %v8329_v21 = vcombine.low %v608_v8, %v612_v9  ;;  %v169_v6 = vld [vmem:[#allocation5 + $0x190] sm:$0xff] }
 0x111   :  { %3445 = vmatprep.subr.bf16.mxu0 %v8122_v22  ;;  %3486 = vmatprep.subr.bf16.mxu1 %v8250_v23  ;;  %v600_v17 = vld [vmem:[#allocation5 + $0xf08] sm:$0xff]  ;;  %v8194_v22 = vcombine.high %v472_v14, %v476_v15  ;;  %v173_v7 = vld [vmem:[#allocation5 + $0x1b0] sm:$0xff] }
 0x112   :  { %v604_v18 = vld [vmem:[#allocation5 + $0xf28] sm:$0xff]  ;;  %v297_v8 = vld [vmem:[#allocation5 + $0x590] sm:$0xff] }
 0x113   :  { %v8322_v23 = vcombine.high %v600_v17, %v604_v18  ;;  %v464_v24 = vld [vmem:[#allocation5 + $0xac8] sm:$0xff]  ;;  %v301_v9 = vld [vmem:[#allocation5 + $0x5b0] sm:$0xff] }
 0x114   :  { %3446 = vmatpush1.bf16.msra.mxu0 %v8121_v29  ;;  %3487 = vmatpush1.bf16.msra.mxu1 %v8249_v30  ;;  %v468_v25 = vld [vmem:[#allocation5 + $0xae8] sm:$0xff]  ;;  %v8193_v29 = vcombine.low %v472_v14, %v476_v15  ;;  %v8321_v30 = vcombine.low %v600_v17, %v604_v18  ;;  %v161_v14 = vld [vmem:[#allocation5 + $0x150] sm:$0xff] }
 0x115   :  { %3447 = vmatprep.subr.bf16.mxu0 %v8114_v32  ;;  %3488 = vmatprep.subr.bf16.mxu1 %v8242_v33  ;;  %v592_v26 = vld [vmem:[#allocation5 + $0xec8] sm:$0xff]  ;;  %v8186_v32 = vcombine.high %v464_v24, %v468_v25  ;;  %v165_v15 = vld [vmem:[#allocation5 + $0x170] sm:$0xff] }
 0x116   :  { %v596_v27 = vld [vmem:[#allocation5 + $0xee8] sm:$0xff]  ;;  %v289_v18 = vld [vmem:[#allocation5 + $0x550] sm:$0xff] }
 0x117   :  { %v8314_v33 = vcombine.high %v592_v26, %v596_v27  ;;  %v456_v34 = vld [vmem:[#allocation5 + $0xa88] sm:$0xff] }
 0x118   :  { %3448 = vmatpush1.bf16.msra.mxu0 %v8113_v40  ;;  %3489 = vmatpush1.bf16.msra.mxu1 %v8241_v41  ;;  %v460_v35 = vld [vmem:[#allocation5 + $0xaa8] sm:$0xff]  ;;  %v8185_v40 = vcombine.low %v464_v24, %v468_v25  ;;  %v8313_v41 = vcombine.low %v592_v26, %v596_v27  ;;  %v8019_v24 = vcombine.low %v297_v8, %v301_v9 }
 0x119   :  { %3449 = vmatprep.subr.bf16.mxu0 %v8106_v42  ;;  %3490 = vmatprep.subr.bf16.mxu1 %v8234_v43  ;;  %v584_v37 = vld [vmem:[#allocation5 + $0xe88] sm:$0xff]  ;;  %v8178_v42 = vcombine.high %v456_v34, %v460_v35  ;;  %v7884_v25 = vcombine.high %v161_v14, %v165_v15 }
 0x11a   :  { %v588_v38 = vld [vmem:[#allocation5 + $0xea8] sm:$0xff] }
 0x11b   :  { %v8306_v43 = vcombine.high %v584_v37, %v588_v38  ;;  %v448_v44 = vld [vmem:[#allocation5 + $0xa48] sm:$0xff] }
 0x11c   :  { %3450 = vmatpush1.bf16.msra.mxu0 %v8105_v48  ;;  %3491 = vmatpush1.bf16.msra.mxu1 %v8233_v49  ;;  %v452_v45 = vld [vmem:[#allocation5 + $0xa68] sm:$0xff]  ;;  %v8177_v48 = vcombine.low %v456_v34, %v460_v35  ;;  %v8305_v49 = vcombine.low %v584_v37, %v588_v38  ;;  %v285_v34 = vld [vmem:[#allocation5 + $0x530] sm:$0xff]  ;;  %v7883_v37 = vcombine.low %v161_v14, %v165_v15 }
 0x11d   :  { %3451 = vmatprep.subr.bf16.mxu0 %v8098_v50  ;;  %3492 = vmatprep.subr.bf16.mxu1 %v8226_v51  ;;  %v576_v46 = vld [vmem:[#allocation5 + $0xe48] sm:$0xff]  ;;  %v8170_v50 = vcombine.high %v448_v44, %v452_v45  ;;  %v241_v14 = vld [vmem:[#allocation5 + $0x3d0] sm:$0xff] }
 0x11e   :  { %v580_v47 = vld [vmem:[#allocation5 + $0xe68] sm:$0xff]  ;;  %v245_v15 = vld [vmem:[#allocation5 + $0x3f0] sm:$0xff] }
 0x11f   :  { %v8298_v51 = vcombine.high %v576_v46, %v580_v47  ;;  %v440_v52 = vld [vmem:[#allocation5 + $0xa08] sm:$0xff] }
 0x120   :  { %3452 = vmatpush1.bf16.msra.mxu0 %v8097_v56  ;;  %3493 = vmatpush1.bf16.msra.mxu1 %v8225_v57  ;;  %v444_v53 = vld [vmem:[#allocation5 + $0xa28] sm:$0xff]  ;;  %v8169_v56 = vcombine.low %v448_v44, %v452_v45  ;;  %v8297_v57 = vcombine.low %v576_v46, %v580_v47  ;;  %v145_v44 = vld [vmem:[#allocation5 + $0xd0] sm:$0xff] }
 0x121   :  { %3453 = vmatprep.subr.bf16.mxu0 %v8218_v60  ;;  %3494 = vmatprep.subr.bf16.mxu1 %v8346_v61  ;;  %v568_v54 = vld [vmem:[#allocation5 + $0xe08] sm:$0xff]  ;;  %v8162_v60 = vcombine.high %v440_v52, %v444_v53  ;;  %v149_v45 = vld [vmem:[#allocation5 + $0xf0] sm:$0xff] }
 0x122   :  { %v572_v55 = vld [vmem:[#allocation5 + $0xe28] sm:$0xff]  ;;  %v273_v46 = vld [vmem:[#allocation5 + $0x4d0] sm:$0xff] }
 0x123   :  { %v8290_v61 = vcombine.high %v568_v54, %v572_v55  ;;  %v277_v47 = vld [vmem:[#allocation5 + $0x4f0] sm:$0xff] }
 0x124   :  { %3454 = vmatpush2.bf16.msra.mxu0 %v8217_v2  ;;  %3495 = vmatpush2.bf16.msra.mxu1 %v8345_v3  ;;  %v8161_v2 = vcombine.low %v440_v52, %v444_v53  ;;  %v8289_v3 = vcombine.low %v568_v54, %v572_v55  ;;  %v137_v52 = vld [vmem:[#allocation5 + $0x90] sm:$0xff] }
 0x125   :  { %3455 = vmatprep.subr.bf16.mxu0 %v8210_v4  ;;  %3496 = vmatprep.subr.bf16.mxu1 %v8338_v5  ;;  %v7900_v4 = vcombine.high %v177_v62, %v181_v63  ;;  %v8028_v5 = vcombine.high %v305_v0, %v309_v1  ;;  %v141_v53 = vld [vmem:[#allocation5 + $0xb0] sm:$0xff] }
 0x126   :  { %v265_v54 = vld [vmem:[#allocation5 + $0x490] sm:$0xff] }
 0x127   :  { %v269_v55 = vld [vmem:[#allocation5 + $0x4b0] sm:$0xff] }
 0x128   :  { %3456 = vmatpush2.bf16.msra.mxu0 %v8209_v10  ;;  %3497 = vmatpush2.bf16.msra.mxu1 %v8337_v11  ;;  %v7899_v10 = vcombine.low %v177_v62, %v181_v63  ;;  %v8027_v11 = vcombine.low %v305_v0, %v309_v1  ;;  %v129_v62 = vld [vmem:[#allocation5 + $0x50] sm:$0xff] }
 0x129   :  { %3457 = vmatprep.subr.bf16.mxu0 %v8202_v12  ;;  %3498 = vmatprep.subr.bf16.mxu1 %v8330_v13  ;;  %v7892_v12 = vcombine.high %v169_v6, %v173_v7  ;;  %v8020_v13 = vcombine.high %v297_v8, %v301_v9  ;;  %v133_v63 = vld [vmem:[#allocation5 + $0x70] sm:$0xff] }
 0x12a   :  { %v257_v0 = vld [vmem:[#allocation5 + $0x450] sm:$0xff] }
 0x12b   :  { %v261_v1 = vld [vmem:[#allocation5 + $0x470] sm:$0xff] }
 0x12c   :  { %3458 = vmatpush2.bf16.msra.mxu0 %v8201_v19  ;;  %3499 = vmatpush2.bf16.msra.mxu1 %v8329_v21  ;;  %v293_v19 = vld [vmem:[#allocation5 + $0x570] sm:$0xff] }
 0x12d   :  { %3459 = vmatprep.subr.bf16.mxu0 %v8194_v22  ;;  %3500 = vmatprep.subr.bf16.mxu1 %v8322_v23  ;;  %v7891_v22 = vcombine.low %v169_v6, %v173_v7  ;;  %v8012_v27 = vcombine.high %v289_v18, %v293_v19  ;;  %v121_v6 = vld [vmem:[#allocation5 + $0x10] sm:$0xff] }
 0x12e   :  { %v125_v7 = vld [vmem:[#allocation5 + $0x30] sm:$0xff] }
 0x12f   :  { %v249_v8 = vld [vmem:[#allocation5 + $0x410] sm:$0xff] }
 0x130   :  { %3460 = vmatpush2.bf16.msra.mxu0 %v8193_v29  ;;  %3501 = vmatpush2.bf16.msra.mxu1 %v8321_v30  ;;  %v153_v29 = vld [vmem:[#allocation5 + $0x110] sm:$0xff] }
 0x131   :  { %3461 = vmatprep.subr.bf16.mxu0 %v8186_v32  ;;  %3502 = vmatprep.subr.bf16.mxu1 %v8314_v33  ;;  %v157_v30 = vld [vmem:[#allocation5 + $0x130] sm:$0xff] }
 0x132   :  { %v281_v33 = vld [vmem:[#allocation5 + $0x510] sm:$0xff] }
 0x133   :  { %v253_v9 = vld [vmem:[#allocation5 + $0x430] sm:$0xff] }
 0x134   :  { %3462 = vmatpush2.bf16.msra.mxu0 %v8185_v40  ;;  %3503 = vmatpush2.bf16.msra.mxu1 %v8313_v41  ;;  %v8011_v40 = vcombine.low %v289_v18, %v293_v19  ;;  %v7876_v41 = vcombine.high %v153_v29, %v157_v30  ;;  %v369_v18 = vld [vmem:[#allocation5 + $0x7d0] sm:$0xff] }
 0x135   :  { %3463 = vmatprep.subr.bf16.mxu0 %v8178_v42  ;;  %3504 = vmatprep.subr.bf16.mxu1 %v8306_v43  ;;  %v8004_v43 = vcombine.high %v281_v33, %v285_v34  ;;  %v373_v19 = vld [vmem:[#allocation5 + $0x7f0] sm:$0xff] }
 0x138   :  { %3464 = vmatpush2.bf16.msra.mxu0 %v8177_v48  ;;  %3505 = vmatpush2.bf16.msra.mxu1 %v8305_v49  ;;  %v7875_v48 = vcombine.low %v153_v29, %v157_v30  ;;  %v8003_v49 = vcombine.low %v281_v33, %v285_v34  ;;  %v233_v29 = vld [vmem:[#allocation5 + $0x390] sm:$0xff]  ;;  %v7963_v34 = vcombine.low %v241_v14, %v245_v15 }
 0x139   :  { %3465 = vmatprep.subr.bf16.mxu0 %v8170_v50  ;;  %3506 = vmatprep.subr.bf16.mxu1 %v8298_v51  ;;  %v7868_v50 = vcombine.high %v145_v44, %v149_v45  ;;  %v7996_v51 = vcombine.high %v273_v46, %v277_v47  ;;  %v237_v30 = vld [vmem:[#allocation5 + $0x3b0] sm:$0xff] }
 0x13a   :  { %v365_v33 = vld [vmem:[#allocation5 + $0x7b0] sm:$0xff] }
 0x13c   :  { %3466 = vmatpush2.bf16.msra.mxu0 %v8169_v56  ;;  %3507 = vmatpush2.bf16.msra.mxu1 %v8297_v57  ;;  %v7867_v56 = vcombine.low %v145_v44, %v149_v45  ;;  %v7995_v57 = vcombine.low %v273_v46, %v277_v47  ;;  %v7955_v44 = vcombine.low %v233_v29, %v237_v30 }
 0x13d   :  { %3467 = vmatprep.subr.bf16.mxu0 %v8162_v60  ;;  %3508 = vmatprep.subr.bf16.mxu1 %v8290_v61  ;;  %v7860_v60 = vcombine.high %v137_v52, %v141_v53  ;;  %v7988_v61 = vcombine.high %v265_v54, %v269_v55 }
 0x140   :  { %3468 = vmatpush2.bf16.msra.mxu0 %v8161_v2  ;;  %3509 = vmatpush2.bf16.msra.mxu1 %v8289_v3  ;;  %v7859_v2 = vcombine.low %v137_v52, %v141_v53  ;;  %v7987_v3 = vcombine.low %v265_v54, %v269_v55 }
 0x141   :  { %3519 = vmatprep.subr.bf16.mxu0 %v7900_v4  ;;  %3560 = vmatprep.subr.bf16.mxu1 %v8028_v5  ;;  %v7852_v4 = vcombine.high %v129_v62, %v133_v63  ;;  %v7980_v5 = vcombine.high %v257_v0, %v261_v1 }
 0x142   :  { %v9168_v21 = vpop.f32.mrf.mxu1 }
 0x143   :  { %v9165_v17 = vpop.f32.mrf.mxu0  ;;  %3470 = vmatmul.mubr.bf16.vlgmr.msra.gmra.mxu0 %v9153_v36  ;;  %3511 = vmatmul.mubr.bf16.vlgmr.msra.gmra.mxu1 %v9155_v39 }
 0x144   :  { %3520 = vmatpush1.bf16.msra.mxu0 %v7899_v10  ;;  %3561 = vmatpush1.bf16.msra.mxu1 %v8027_v11  ;;  %v9173_v26 = vpop.f32.mrf.mxu1  ;;  %v7851_v10 = vcombine.low %v129_v62, %v133_v63  ;;  %v7979_v11 = vcombine.low %v257_v0, %v261_v1 }
 0x145   :  { %v9171_v23 = vpop.f32.mrf.mxu0  ;;  %3521 = vmatprep.subr.bf16.mxu0 %v7892_v12  ;;  %3562 = vmatprep.subr.bf16.mxu1 %v8020_v13  ;;  %v7844_v12 = vcombine.high %v121_v6, %v125_v7  ;;  %v7972_v13 = vcombine.high %v249_v8, %v253_v9 }
 0x146   :  { %3551 = vmatprep.mubr.bf16.mxu0 %v9135_v58  ;;  %3592 = vmatprep.mubr.bf16.mxu1 %v9137_v59  ;;  %v3270_v35 = vpop.f32.mrf.mxu1 }
 0x147   :  { %v3229_v32 = vpop.f32.mrf.mxu0  ;;  %v8091_v35 = vcombine.low %v369_v18, %v373_v19 }
 0x148   :  { %3522 = vmatpush1.bf16.msra.mxu0 %v7891_v22  ;;  %3563 = vmatpush1.bf16.msra.mxu1 %v8019_v24  ;;  %v3271_v42 = vpop.f32.mrf.mxu1  ;;  %v7843_v22 = vcombine.low %v121_v6, %v125_v7  ;;  %v7971_v24 = vcombine.low %v249_v8, %v253_v9  ;;  %v361_v32 = vld [vmem:[#allocation5 + $0x790] sm:$0xff] }
 0x149   :  { %v3230_v38 = vpop.f32.mrf.mxu0  ;;  %3523 = vmatprep.subr.bf16.mxu0 %v7884_v25  ;;  %3564 = vmatprep.subr.bf16.mxu1 %v8012_v27  ;;  %v7964_v25 = vcombine.high %v241_v14, %v245_v15  ;;  %v8092_v27 = vcombine.high %v369_v18, %v373_v19  ;;  %v353_v42 = vld [vmem:[#allocation5 + $0x750] sm:$0xff]  ;;  %v8083_v45 = vcombine.low %v361_v32, %v365_v33 }
 0x14a   :  { %v8084_v38 = vcombine.high %v361_v32, %v365_v33 }
 0x14c   :  { %3524 = vmatpush1.bf16.msra.mxu0 %v7883_v37  ;;  %3565 = vmatpush1.bf16.msra.mxu1 %v8011_v40  ;;  %v7956_v37 = vcombine.high %v233_v29, %v237_v30  ;;  %v225_v40 = vld [vmem:[#allocation5 + $0x350] sm:$0xff] }
 0x14d   :  { %3525 = vmatprep.subr.bf16.mxu0 %v7876_v41  ;;  %3566 = vmatprep.subr.bf16.mxu1 %v8004_v43  ;;  %v229_v41 = vld [vmem:[#allocation5 + $0x370] sm:$0xff] }
 0x14e   :  { %v357_v43 = vld [vmem:[#allocation5 + $0x770] sm:$0xff]  ;;  %v7948_v46 = vcombine.high %v225_v40, %v229_v41  ;;  %v7947_v52 = vcombine.low %v225_v40, %v229_v41 }
 0x14f   :  { %v8076_v47 = vcombine.high %v353_v42, %v357_v43  ;;  %v8075_v53 = vcombine.low %v353_v42, %v357_v43 }
 0x150   :  { %3526 = vmatpush1.bf16.msra.mxu0 %v7875_v48  ;;  %3567 = vmatpush1.bf16.msra.mxu1 %v8003_v49  ;;  %v217_v48 = vld [vmem:[#allocation5 + $0x310] sm:$0xff] }
 0x151   :  { %3527 = vmatprep.subr.bf16.mxu0 %v7868_v50  ;;  %3568 = vmatprep.subr.bf16.mxu1 %v7996_v51  ;;  %v221_v49 = vld [vmem:[#allocation5 + $0x330] sm:$0xff] }
 0x152   :  { %v345_v50 = vld [vmem:[#allocation5 + $0x710] sm:$0xff]  ;;  %v7940_v54 = vcombine.high %v217_v48, %v221_v49  ;;  %v7939_v62 = vcombine.low %v217_v48, %v221_v49 }
 0x153   :  { %v349_v51 = vld [vmem:[#allocation5 + $0x730] sm:$0xff] }
 0x154   :  { %3528 = vmatpush1.bf16.msra.mxu0 %v7867_v56  ;;  %3569 = vmatpush1.bf16.msra.mxu1 %v7995_v57  ;;  %v8068_v55 = vcombine.high %v345_v50, %v349_v51  ;;  %v209_v56 = vld [vmem:[#allocation5 + $0x2d0] sm:$0xff]  ;;  %v8067_v63 = vcombine.low %v345_v50, %v349_v51  ;;  %v3267_v51 = vadd.f32 %v9168_v21, %v9165_v17 }
 0x155   :  { %3529 = vmatprep.subr.bf16.mxu0 %v7860_v60  ;;  %3570 = vmatprep.subr.bf16.mxu1 %v7988_v61  ;;  %v213_v57 = vld [vmem:[#allocation5 + $0x2f0] sm:$0xff] }
 0x156   :  { %v337_v60 = vld [vmem:[#allocation5 + $0x6d0] sm:$0xff]  ;;  %v7932_v0 = vcombine.high %v209_v56, %v213_v57  ;;  %v7931_v6 = vcombine.low %v209_v56, %v213_v57 }
 0x157   :  { %v341_v61 = vld [vmem:[#allocation5 + $0x6f0] sm:$0xff] }
 0x158   :  { %3530 = vmatpush1.bf16.msra.mxu0 %v7859_v2  ;;  %3571 = vmatpush1.bf16.msra.mxu1 %v7987_v3  ;;  %v8060_v1 = vcombine.high %v337_v60, %v341_v61  ;;  %v201_v2 = vld [vmem:[#allocation5 + $0x290] sm:$0xff]  ;;  %v8059_v7 = vcombine.low %v337_v60, %v341_v61  ;;  %v3269_v60 = vadd.f32 %v9173_v26, %v9171_v23 }
 0x159   :  { %3531 = vmatprep.subr.bf16.mxu0 %v7852_v4  ;;  %3572 = vmatprep.subr.bf16.mxu1 %v7980_v5  ;;  %v205_v3 = vld [vmem:[#allocation5 + $0x2b0] sm:$0xff] }
 0x15a   :  { %v329_v4 = vld [vmem:[#allocation5 + $0x690] sm:$0xff]  ;;  %v7924_v8 = vcombine.high %v201_v2, %v205_v3  ;;  %v7923_v14 = vcombine.low %v201_v2, %v205_v3 }
 0x15b   :  { %v333_v5 = vld [vmem:[#allocation5 + $0x6b0] sm:$0xff] }
 0x15c   :  { %3532 = vmatpush1.bf16.msra.mxu0 %v7851_v10  ;;  %3573 = vmatpush1.bf16.msra.mxu1 %v7979_v11  ;;  %v8052_v9 = vcombine.high %v329_v4, %v333_v5  ;;  %v193_v10 = vld [vmem:[#allocation5 + $0x250] sm:$0xff]  ;;  %v8051_v15 = vcombine.low %v329_v4, %v333_v5 }
 0x15d   :  { %3533 = vmatprep.subr.bf16.mxu0 %v7844_v12  ;;  %3574 = vmatprep.subr.bf16.mxu1 %v7972_v13  ;;  %v197_v11 = vld [vmem:[#allocation5 + $0x270] sm:$0xff] }
 0x15e   :  { %v321_v12 = vld [vmem:[#allocation5 + $0x650] sm:$0xff]  ;;  %v7916_v18 = vcombine.high %v193_v10, %v197_v11  ;;  %v7915_v29 = vcombine.low %v193_v10, %v197_v11 }
 0x15f   :  { %v325_v13 = vld [vmem:[#allocation5 + $0x670] sm:$0xff] }
 0x160   :  { %3534 = vmatpush1.bf16.msra.mxu0 %v7843_v22  ;;  %3575 = vmatpush1.bf16.msra.mxu1 %v7971_v24  ;;  %v8044_v19 = vcombine.high %v321_v12, %v325_v13  ;;  %v185_v22 = vld [vmem:[#allocation5 + $0x210] sm:$0xff]  ;;  %v8043_v30 = vcombine.low %v321_v12, %v325_v13 }
 0x161   :  { %3535 = vmatprep.subr.bf16.mxu0 %v7964_v25  ;;  %3576 = vmatprep.subr.bf16.mxu1 %v8092_v27  ;;  %v189_v24 = vld [vmem:[#allocation5 + $0x230] sm:$0xff] }
 0x162   :  { %v313_v25 = vld [vmem:[#allocation5 + $0x610] sm:$0xff]  ;;  %v7908_v32 = vcombine.high %v185_v22, %v189_v24  ;;  %v7907_v40 = vcombine.low %v185_v22, %v189_v24 }
 0x163   :  { %v317_v27 = vld [vmem:[#allocation5 + $0x630] sm:$0xff] }
 0x164   :  { %3536 = vmatpush2.bf16.msra.mxu0 %v7963_v34  ;;  %3577 = vmatpush2.bf16.msra.mxu1 %v8091_v35  ;;  %v8036_v33 = vcombine.high %v313_v25, %v317_v27  ;;  %v433_v34 = vld [vmem:[#allocation5 + $0x9d0] sm:$0xff]  ;;  %v8035_v41 = vcombine.low %v313_v25, %v317_v27 }
 0x165   :  { %3537 = vmatprep.subr.bf16.mxu0 %v7956_v37  ;;  %3578 = vmatprep.subr.bf16.mxu1 %v8084_v38  ;;  %v437_v35 = vld [vmem:[#allocation5 + $0x9f0] sm:$0xff] }
 0x166   :  { %v561_v37 = vld [vmem:[#allocation5 + $0xdd0] sm:$0xff]  ;;  %v8156_v42 = vcombine.high %v433_v34, %v437_v35  ;;  %v8155_v48 = vcombine.low %v433_v34, %v437_v35 }
 0x167   :  { %v565_v38 = vld [vmem:[#allocation5 + $0xdf0] sm:$0xff] }
 0x168   :  { %3538 = vmatpush2.bf16.msra.mxu0 %v7955_v44  ;;  %3579 = vmatpush2.bf16.msra.mxu1 %v8083_v45  ;;  %v8284_v43 = vcombine.high %v561_v37, %v565_v38  ;;  %v425_v44 = vld [vmem:[#allocation5 + $0x990] sm:$0xff]  ;;  %v8283_v49 = vcombine.low %v561_v37, %v565_v38 }
 0x169   :  { %3539 = vmatprep.subr.bf16.mxu0 %v7948_v46  ;;  %3580 = vmatprep.subr.bf16.mxu1 %v8076_v47  ;;  %v429_v45 = vld [vmem:[#allocation5 + $0x9b0] sm:$0xff] }
 0x16a   :  { %v553_v46 = vld [vmem:[#allocation5 + $0xd90] sm:$0xff]  ;;  %v8148_v50 = vcombine.high %v425_v44, %v429_v45 }
 0x16b   :  { %v557_v47 = vld [vmem:[#allocation5 + $0xdb0] sm:$0xff] }
 0x16c   :  { %3540 = vmatpush2.bf16.msra.mxu0 %v7947_v52  ;;  %3581 = vmatpush2.bf16.msra.mxu1 %v8075_v53  ;;  %v8276_v52 = vcombine.high %v553_v46, %v557_v47  ;;  %v417_v53 = vld [vmem:[#allocation5 + $0x950] sm:$0xff]  ;;  %v8275_v21 = vcombine.low %v553_v46, %v557_v47 }
 0x16d   :  { %3541 = vmatprep.subr.bf16.mxu0 %v7940_v54  ;;  %3582 = vmatprep.subr.bf16.mxu1 %v8068_v55  ;;  %v421_v54 = vld [vmem:[#allocation5 + $0x970] sm:$0xff] }
 0x16e   :  { %v545_v56 = vld [vmem:[#allocation5 + $0xd50] sm:$0xff]  ;;  %v8139_v10 = vcombine.low %v417_v53, %v421_v54 }
 0x16f   :  { %v549_v57 = vld [vmem:[#allocation5 + $0xd70] sm:$0xff] }
 0x170   :  { %3542 = vmatpush2.bf16.msra.mxu0 %v7939_v62  ;;  %3583 = vmatpush2.bf16.msra.mxu1 %v8067_v63  ;;  %v8147_v63 = vcombine.low %v425_v44, %v429_v45  ;;  %v8268_v4 = vcombine.high %v545_v56, %v549_v57  ;;  %v409_v5 = vld [vmem:[#allocation5 + $0x910] sm:$0xff]  ;;  %v8267_v12 = vcombine.low %v545_v56, %v549_v57 }
 0x171   :  { %3543 = vmatprep.subr.bf16.mxu0 %v7932_v0  ;;  %3584 = vmatprep.subr.bf16.mxu1 %v8060_v1  ;;  %v8140_v0 = vcombine.high %v417_v53, %v421_v54  ;;  %v537_v26 = vld [vmem:[#allocation5 + $0xd10] sm:$0xff] }
 0x172   :  { %v529_v22 = vld [vmem:[#allocation5 + $0xcd0] sm:$0xff] }
 0x173   :  { %v533_v24 = vld [vmem:[#allocation5 + $0xcf0] sm:$0xff] }
 0x174   :  { %3544 = vmatpush2.bf16.msra.mxu0 %v7931_v6  ;;  %3585 = vmatpush2.bf16.msra.mxu1 %v8059_v7  ;;  %v413_v6 = vld [vmem:[#allocation5 + $0x930] sm:$0xff]  ;;  %v8251_v38 = vcombine.low %v529_v22, %v533_v24 }
 0x175   :  { %3545 = vmatprep.subr.bf16.mxu0 %v7924_v8  ;;  %3586 = vmatprep.subr.bf16.mxu1 %v8052_v9  ;;  %v541_v7 = vld [vmem:[#allocation5 + $0xd30] sm:$0xff]  ;;  %v8132_v13 = vcombine.high %v409_v5, %v413_v6  ;;  %v8131_v25 = vcombine.low %v409_v5, %v413_v6 }
 0x176   :  { %v8259_v27 = vcombine.low %v537_v26, %v541_v7  ;;  %v521_v34 = vld [vmem:[#allocation5 + $0xc90] sm:$0xff] }
 0x177   :  { %v525_v35 = vld [vmem:[#allocation5 + $0xcb0] sm:$0xff] }
 0x178   :  { %3546 = vmatpush2.bf16.msra.mxu0 %v7923_v14  ;;  %3587 = vmatpush2.bf16.msra.mxu1 %v8051_v15  ;;  %v8260_v15 = vcombine.high %v537_v26, %v541_v7  ;;  %v513_v44 = vld [vmem:[#allocation5 + $0xc50] sm:$0xff]  ;;  %v8243_v47 = vcombine.low %v521_v34, %v525_v35 }
 0x179   :  { %3547 = vmatprep.subr.bf16.mxu0 %v7916_v18  ;;  %3588 = vmatprep.subr.bf16.mxu1 %v8044_v19  ;;  %v401_v18 = vld [vmem:[#allocation5 + $0x8d0] sm:$0xff] }
 0x17a   :  { %v405_v19 = vld [vmem:[#allocation5 + $0x8f0] sm:$0xff] }
 0x17b   :  { %v8123_v37 = vcombine.low %v401_v18, %v405_v19  ;;  %v517_v45 = vld [vmem:[#allocation5 + $0xc70] sm:$0xff] }
 0x17c   :  { %3548 = vmatpush2.bf16.msra.mxu0 %v7915_v29  ;;  %3589 = vmatpush2.bf16.msra.mxu1 %v8043_v30  ;;  %v8124_v29 = vcombine.high %v401_v18, %v405_v19  ;;  %v8252_v30 = vcombine.high %v529_v22, %v533_v24  ;;  %v509_v53 = vld [vmem:[#allocation5 + $0xc30] sm:$0xff] }
 0x17d   :  { %3549 = vmatprep.subr.bf16.mxu0 %v7908_v32  ;;  %3590 = vmatprep.subr.bf16.mxu1 %v8036_v33  ;;  %v393_v32 = vld [vmem:[#allocation5 + $0x890] sm:$0xff] }
 0x17e   :  { %v397_v33 = vld [vmem:[#allocation5 + $0x8b0] sm:$0xff] }
 0x17f   :  { %v8115_v46 = vcombine.low %v393_v32, %v397_v33  ;;  %v621_v5 = vld [vmem:[#allocation5 + $0xfb0] sm:$0xff] }
 0x180   :  { %3550 = vmatpush2.bf16.msra.mxu0 %v7907_v40  ;;  %3591 = vmatpush2.bf16.msra.mxu1 %v8035_v41  ;;  %v8116_v40 = vcombine.high %v393_v32, %v397_v33  ;;  %v8244_v41 = vcombine.high %v521_v34, %v525_v35  ;;  %v473_v18 = vld [vmem:[#allocation5 + $0xb10] sm:$0xff] }
 0x181   :  { %3601 = vmatprep.subr.bf16.mxu0 %v8156_v42  ;;  %3642 = vmatprep.subr.bf16.mxu1 %v8284_v43  ;;  %v385_v42 = vld [vmem:[#allocation5 + $0x850] sm:$0xff] }
 0x182   :  { %v389_v43 = vld [vmem:[#allocation5 + $0x870] sm:$0xff] }
 0x183   :  { %v3307_v55 = vpop.f32.mrf.mxu0  ;;  %3552 = vmatmul.mubr.bf16.vlgmr.msra.gmra.mxu0 %v9141_v16  ;;  %v3348_v62 = vpop.f32.mrf.mxu1  ;;  %3593 = vmatmul.mubr.bf16.vlgmr.msra.gmra.mxu1 %v9143_v20  ;;  %v8107_v54 = vcombine.low %v385_v42, %v389_v43  ;;  %v477_v19 = vld [vmem:[#allocation5 + $0xb30] sm:$0xff] }
 0x184   :  { %v3308_v61 = vadd.f32 %v3307_v55, %v3267_v51  ;;  %3602 = vmatpush1.bf16.msra.mxu0 %v8155_v48  ;;  %3643 = vmatpush1.bf16.msra.mxu1 %v8283_v49  ;;  %v8108_v48 = vcombine.high %v385_v42, %v389_v43  ;;  %v8236_v49 = vcombine.high %v513_v44, %v517_v45  ;;  %v381_v51 = vld [vmem:[#allocation5 + $0x830] sm:$0xff] }
 0x185   :  { %v3309_v17 = vpop.f32.mrf.mxu0  ;;  %3603 = vmatprep.subr.bf16.mxu0 %v8148_v50  ;;  %v3350_v3 = vpop.f32.mrf.mxu1  ;;  %3644 = vmatprep.subr.bf16.mxu1 %v8276_v52  ;;  %v377_v50 = vld [vmem:[#allocation5 + $0x810] sm:$0xff]  ;;  %v8235_v55 = vcombine.low %v513_v44, %v517_v45 }
 0x186   :  { %v3349_v1 = vadd.f32 %v3348_v62, %v3308_v61  ;;  %v3310_v2 = vadd.f32 %v3309_v17, %v3269_v60  ;;  %3633 = vmatprep.mubr.bf16.mxu0 %v9145_v28  ;;  %3674 = vmatprep.mubr.bf16.mxu1 %v9148_v31  ;;  %v505_v52 = vld [vmem:[#allocation5 + $0xc10] sm:$0xff]  ;;  %v8100_v56 = vcombine.high %v377_v50, %v381_v51 }
 0x187   :  { %v3311_v23 = vpop.f32.mrf.mxu0  ;;  %v3352_v9 = vpop.f32.mrf.mxu1  ;;  %v8228_v57 = vcombine.high %v505_v52, %v509_v53  ;;  %v497_v60 = vld [vmem:[#allocation5 + $0xbd0] sm:$0xff]  ;;  %v8099_v17 = vcombine.low %v377_v50, %v381_v51 }
 0x188   :  { %v3351_v8 = vadd.f32 %v3350_v3, %v3310_v2  ;;  %3604 = vmatpush1.bf16.msra.mxu0 %v8147_v63  ;;  %3645 = vmatpush1.bf16.msra.mxu1 %v8275_v21  ;;  %3855 = vst [vmem:[#allocation11] sm:$0xff] %v3349_v1  ;;  %v501_v61 = vld [vmem:[#allocation5 + $0xbf0] sm:$0xff]  ;;  %v8227_v21 = vcombine.low %v505_v52, %v509_v53 }
 0x189   :  { %v3312_v11 = vpop.f32.mrf.mxu0  ;;  %3605 = vmatprep.subr.bf16.mxu0 %v8140_v0  ;;  %v3353_v14 = vpop.f32.mrf.mxu1  ;;  %3646 = vmatprep.subr.bf16.mxu1 %v8268_v4  ;;  %v625_v62 = vld [vmem:[#allocation5 + $0xfd0] sm:$0xff]  ;;  %v8220_v0 = vcombine.high %v497_v60, %v501_v61  ;;  %v8219_v6 = vcombine.low %v497_v60, %v501_v61 }
 0x18a   :  { %3856 = vst [vmem:[#allocation11 + $0x8] sm:$0xff] %v3351_v8  ;;  %v629_v63 = vld [vmem:[#allocation5 + $0xff0] sm:$0xff] }
 0x18b   :  { %v8348_v1 = vcombine.high %v625_v62, %v629_v63  ;;  %v489_v2 = vld [vmem:[#allocation5 + $0xb90] sm:$0xff]  ;;  %v8347_v23 = vcombine.low %v625_v62, %v629_v63 }
 0x18c   :  { %3606 = vmatpush1.bf16.msra.mxu0 %v8139_v10  ;;  %3647 = vmatpush1.bf16.msra.mxu1 %v8267_v12  ;;  %v493_v3 = vld [vmem:[#allocation5 + $0xbb0] sm:$0xff] }
 0x18d   :  { %3607 = vmatprep.subr.bf16.mxu0 %v8132_v13  ;;  %3648 = vmatprep.subr.bf16.mxu1 %v8260_v15  ;;  %v617_v4 = vld [vmem:[#allocation5 + $0xf90] sm:$0xff]  ;;  %v8212_v26 = vcombine.high %v489_v2, %v493_v3  ;;  %v8211_v12 = vcombine.low %v489_v2, %v493_v3  ;;  %v178_v2 = vld [vmem:[#allocation5 + $0x1d8] sm:$0xff] }
 0x18e   :  { %v8340_v7 = vcombine.high %v617_v4, %v621_v5  ;;  %v481_v8 = vld [vmem:[#allocation5 + $0xb50] sm:$0xff]  ;;  %v8339_v13 = vcombine.low %v617_v4, %v621_v5  ;;  %v182_v3 = vld [vmem:[#allocation5 + $0x1f8] sm:$0xff] }
 0x18f   :  { %v485_v9 = vld [vmem:[#allocation5 + $0xb70] sm:$0xff]  ;;  %v306_v4 = vld [vmem:[#allocation5 + $0x5d8] sm:$0xff] }
 0x190   :  { %3608 = vmatpush1.bf16.msra.mxu0 %v8131_v25  ;;  %3649 = vmatpush1.bf16.msra.mxu1 %v8259_v27  ;;  %v609_v10 = vld [vmem:[#allocation5 + $0xf50] sm:$0xff]  ;;  %v8204_v14 = vcombine.high %v481_v8, %v485_v9  ;;  %v8203_v25 = vcombine.low %v481_v8, %v485_v9  ;;  %v310_v5 = vld [vmem:[#allocation5 + $0x5f8] sm:$0xff] }
 0x191   :  { %3609 = vmatprep.subr.bf16.mxu0 %v8124_v29  ;;  %3650 = vmatprep.subr.bf16.mxu1 %v8252_v30  ;;  %v613_v11 = vld [vmem:[#allocation5 + $0xf70] sm:$0xff]  ;;  %v8196_v29 = vcombine.high %v473_v18, %v477_v19  ;;  %v170_v8 = vld [vmem:[#allocation5 + $0x198] sm:$0xff] }
 0x192   :  { %v8332_v15 = vcombine.high %v609_v10, %v613_v11  ;;  %v601_v22 = vld [vmem:[#allocation5 + $0xf10] sm:$0xff]  ;;  %v8331_v27 = vcombine.low %v609_v10, %v613_v11  ;;  %v174_v9 = vld [vmem:[#allocation5 + $0x1b8] sm:$0xff] }
 0x193   :  { %v605_v24 = vld [vmem:[#allocation5 + $0xf30] sm:$0xff]  ;;  %v298_v10 = vld [vmem:[#allocation5 + $0x598] sm:$0xff] }
 0x194   :  { %3610 = vmatpush1.bf16.msra.mxu0 %v8123_v37  ;;  %3651 = vmatpush1.bf16.msra.mxu1 %v8251_v38  ;;  %v8324_v30 = vcombine.high %v601_v22, %v605_v24  ;;  %v465_v32 = vld [vmem:[#allocation5 + $0xad0] sm:$0xff]  ;;  %v8195_v37 = vcombine.low %v473_v18, %v477_v19  ;;  %v8323_v38 = vcombine.low %v601_v22, %v605_v24  ;;  %v302_v11 = vld [vmem:[#allocation5 + $0x5b8] sm:$0xff] }
 0x195   :  { %3611 = vmatprep.subr.bf16.mxu0 %v8116_v40  ;;  %3652 = vmatprep.subr.bf16.mxu1 %v8244_v41  ;;  %v469_v33 = vld [vmem:[#allocation5 + $0xaf0] sm:$0xff]  ;;  %v162_v18 = vld [vmem:[#allocation5 + $0x158] sm:$0xff] }
 0x196   :  { %v593_v34 = vld [vmem:[#allocation5 + $0xed0] sm:$0xff]  ;;  %v8188_v40 = vcombine.high %v465_v32, %v469_v33  ;;  %v166_v19 = vld [vmem:[#allocation5 + $0x178] sm:$0xff] }
 0x197   :  { %v597_v35 = vld [vmem:[#allocation5 + $0xef0] sm:$0xff]  ;;  %v290_v24 = vld [vmem:[#allocation5 + $0x558] sm:$0xff] }
 0x198   :  { %3612 = vmatpush1.bf16.msra.mxu0 %v8115_v46  ;;  %3653 = vmatpush1.bf16.msra.mxu1 %v8243_v47  ;;  %v8316_v41 = vcombine.high %v593_v34, %v597_v35  ;;  %v457_v42 = vld [vmem:[#allocation5 + $0xa90] sm:$0xff]  ;;  %v8187_v46 = vcombine.low %v465_v32, %v469_v33  ;;  %v8315_v47 = vcombine.low %v593_v34, %v597_v35 }
 0x199   :  { %3613 = vmatprep.subr.bf16.mxu0 %v8108_v48  ;;  %3654 = vmatprep.subr.bf16.mxu1 %v8236_v49  ;;  %v461_v43 = vld [vmem:[#allocation5 + $0xab0] sm:$0xff]  ;;  %v8021_v33 = vcombine.low %v298_v10, %v302_v11  ;;  %v7886_v34 = vcombine.high %v162_v18, %v166_v19 }
 0x19a   :  { %v585_v44 = vld [vmem:[#allocation5 + $0xe90] sm:$0xff]  ;;  %v8180_v48 = vcombine.high %v457_v42, %v461_v43 }
 0x19b   :  { %v589_v45 = vld [vmem:[#allocation5 + $0xeb0] sm:$0xff] }
 0x19c   :  { %3614 = vmatpush1.bf16.msra.mxu0 %v8107_v54  ;;  %3655 = vmatpush1.bf16.msra.mxu1 %v8235_v55  ;;  %v8308_v49 = vcombine.high %v585_v44, %v589_v45  ;;  %v449_v50 = vld [vmem:[#allocation5 + $0xa50] sm:$0xff]  ;;  %v8179_v54 = vcombine.low %v457_v42, %v461_v43  ;;  %v8307_v55 = vcombine.low %v585_v44, %v589_v45  ;;  %v282_v43 = vld [vmem:[#allocation5 + $0x518] sm:$0xff] }
 0x19d   :  { %3615 = vmatprep.subr.bf16.mxu0 %v8100_v56  ;;  %3656 = vmatprep.subr.bf16.mxu1 %v8228_v57  ;;  %v453_v51 = vld [vmem:[#allocation5 + $0xa70] sm:$0xff]  ;;  %v286_v44 = vld [vmem:[#allocation5 + $0x538] sm:$0xff] }
 0x19e   :  { %v577_v52 = vld [vmem:[#allocation5 + $0xe50] sm:$0xff]  ;;  %v8172_v56 = vcombine.high %v449_v50, %v453_v51 }
 0x19f   :  { %v581_v53 = vld [vmem:[#allocation5 + $0xe70] sm:$0xff] }
 0x1a0   :  { %3616 = vmatpush1.bf16.msra.mxu0 %v8099_v17  ;;  %3657 = vmatpush1.bf16.msra.mxu1 %v8227_v21  ;;  %v8300_v57 = vcombine.high %v577_v52, %v581_v53  ;;  %v441_v60 = vld [vmem:[#allocation5 + $0xa10] sm:$0xff]  ;;  %v8171_v17 = vcombine.low %v449_v50, %v453_v51  ;;  %v8299_v21 = vcombine.low %v577_v52, %v581_v53  ;;  %v146_v52 = vld [vmem:[#allocation5 + $0xd8] sm:$0xff] }
 0x1a1   :  { %3617 = vmatprep.subr.bf16.mxu0 %v8220_v0  ;;  %3658 = vmatprep.subr.bf16.mxu1 %v8348_v1  ;;  %v445_v61 = vld [vmem:[#allocation5 + $0xa30] sm:$0xff]  ;;  %v8006_v51 = vcombine.high %v282_v43, %v286_v44  ;;  %v274_v53 = vld [vmem:[#allocation5 + $0x4d8] sm:$0xff] }
 0x1a2   :  { %v569_v62 = vld [vmem:[#allocation5 + $0xe10] sm:$0xff]  ;;  %v8164_v0 = vcombine.high %v441_v60, %v445_v61 }
 0x1a3   :  { %v573_v63 = vld [vmem:[#allocation5 + $0xe30] sm:$0xff] }
 0x1a4   :  { %3618 = vmatpush2.bf16.msra.mxu0 %v8219_v6  ;;  %3659 = vmatpush2.bf16.msra.mxu1 %v8347_v23  ;;  %v8292_v1 = vcombine.high %v569_v62, %v573_v63  ;;  %v8163_v6 = vcombine.low %v441_v60, %v445_v61  ;;  %v8291_v23 = vcombine.low %v569_v62, %v573_v63  ;;  %v138_v60 = vld [vmem:[#allocation5 + $0x98] sm:$0xff] }
 0x1a5   :  { %3619 = vmatprep.subr.bf16.mxu0 %v8212_v26  ;;  %3660 = vmatprep.subr.bf16.mxu1 %v8340_v7  ;;  %v7902_v26 = vcombine.high %v178_v2, %v182_v3  ;;  %v8030_v7 = vcombine.high %v306_v4, %v310_v5  ;;  %v142_v61 = vld [vmem:[#allocation5 + $0xb8] sm:$0xff] }
 0x1a6   :  { %v266_v62 = vld [vmem:[#allocation5 + $0x498] sm:$0xff] }
 0x1a7   :  { %v270_v63 = vld [vmem:[#allocation5 + $0x4b8] sm:$0xff] }
 0x1a8   :  { %3620 = vmatpush2.bf16.msra.mxu0 %v8211_v12  ;;  %3661 = vmatpush2.bf16.msra.mxu1 %v8339_v13  ;;  %v7901_v12 = vcombine.low %v178_v2, %v182_v3  ;;  %v8029_v13 = vcombine.low %v306_v4, %v310_v5  ;;  %v130_v2 = vld [vmem:[#allocation5 + $0x58] sm:$0xff] }
 0x1a9   :  { %3621 = vmatprep.subr.bf16.mxu0 %v8204_v14  ;;  %3662 = vmatprep.subr.bf16.mxu1 %v8332_v15  ;;  %v7894_v14 = vcombine.high %v170_v8, %v174_v9  ;;  %v8022_v15 = vcombine.high %v298_v10, %v302_v11  ;;  %v134_v3 = vld [vmem:[#allocation5 + $0x78] sm:$0xff] }
 0x1aa   :  { %v258_v4 = vld [vmem:[#allocation5 + $0x458] sm:$0xff] }
 0x1ab   :  { %v262_v5 = vld [vmem:[#allocation5 + $0x478] sm:$0xff] }
 0x1ac   :  { %3622 = vmatpush2.bf16.msra.mxu0 %v8203_v25  ;;  %3663 = vmatpush2.bf16.msra.mxu1 %v8331_v27  ;;  %v294_v25 = vld [vmem:[#allocation5 + $0x578] sm:$0xff] }
 0x1ad   :  { %3623 = vmatprep.subr.bf16.mxu0 %v8196_v29  ;;  %3664 = vmatprep.subr.bf16.mxu1 %v8324_v30  ;;  %v7893_v29 = vcombine.low %v170_v8, %v174_v9  ;;  %v122_v8 = vld [vmem:[#allocation5 + $0x18] sm:$0xff] }
 0x1ae   :  { %v126_v9 = vld [vmem:[#allocation5 + $0x38] sm:$0xff] }
 0x1af   :  { %v250_v10 = vld [vmem:[#allocation5 + $0x418] sm:$0xff] }
 0x1b0   :  { %3624 = vmatpush2.bf16.msra.mxu0 %v8195_v37  ;;  %3665 = vmatpush2.bf16.msra.mxu1 %v8323_v38  ;;  %v8014_v37 = vcombine.high %v290_v24, %v294_v25  ;;  %v154_v38 = vld [vmem:[#allocation5 + $0x118] sm:$0xff] }
 0x1b1   :  { %3625 = vmatprep.subr.bf16.mxu0 %v8188_v40  ;;  %3666 = vmatprep.subr.bf16.mxu1 %v8316_v41  ;;  %v158_v40 = vld [vmem:[#allocation5 + $0x138] sm:$0xff] }
 0x1b2   :  { %v254_v11 = vld [vmem:[#allocation5 + $0x438] sm:$0xff] }
 0x1b4   :  { %3626 = vmatpush2.bf16.msra.mxu0 %v8187_v46  ;;  %3667 = vmatpush2.bf16.msra.mxu1 %v8315_v47  ;;  %v7885_v46 = vcombine.low %v162_v18, %v166_v19  ;;  %v242_v18 = vld [vmem:[#allocation5 + $0x3d8] sm:$0xff] }
 0x1b5   :  { %3627 = vmatprep.subr.bf16.mxu0 %v8180_v48  ;;  %3668 = vmatprep.subr.bf16.mxu1 %v8308_v49  ;;  %v8013_v48 = vcombine.low %v290_v24, %v294_v25  ;;  %v7878_v49 = vcombine.high %v154_v38, %v158_v40  ;;  %v246_v19 = vld [vmem:[#allocation5 + $0x3f8] sm:$0xff]  ;;  %v7845_v25 = vcombine.low %v122_v8, %v126_v9 }
 0x1b6   :  { %v374_v24 = vld [vmem:[#allocation5 + $0x7f8] sm:$0xff] }
 0x1b8   :  { %3628 = vmatpush2.bf16.msra.mxu0 %v8179_v54  ;;  %3669 = vmatpush2.bf16.msra.mxu1 %v8307_v55  ;;  %v278_v54 = vld [vmem:[#allocation5 + $0x4f8] sm:$0xff]  ;;  %v7877_v55 = vcombine.low %v154_v38, %v158_v40  ;;  %v7965_v38 = vcombine.low %v242_v18, %v246_v19 }
 0x1b9   :  { %3629 = vmatprep.subr.bf16.mxu0 %v8172_v56  ;;  %3670 = vmatprep.subr.bf16.mxu1 %v8300_v57  ;;  %v7998_v57 = vcombine.high %v274_v53, %v278_v54 }
 0x1bc   :  { %3630 = vmatpush2.bf16.msra.mxu0 %v8171_v17  ;;  %3671 = vmatpush2.bf16.msra.mxu1 %v8299_v21  ;;  %v7997_v21 = vcombine.low %v274_v53, %v278_v54  ;;  %v346_v53 = vld [vmem:[#allocation5 + $0x718] sm:$0xff] }
 0x1bd   :  { %3631 = vmatprep.subr.bf16.mxu0 %v8164_v0  ;;  %3672 = vmatprep.subr.bf16.mxu1 %v8292_v1  ;;  %v7862_v0 = vcombine.high %v138_v60, %v142_v61  ;;  %v7990_v1 = vcombine.high %v266_v62, %v270_v63  ;;  %v350_v54 = vld [vmem:[#allocation5 + $0x738] sm:$0xff] }
 0x1c0   :  { %3632 = vmatpush2.bf16.msra.mxu0 %v8163_v6  ;;  %3673 = vmatpush2.bf16.msra.mxu1 %v8291_v23  ;;  %v7861_v6 = vcombine.low %v138_v60, %v142_v61  ;;  %v7989_v23 = vcombine.low %v266_v62, %v270_v63  ;;  %v210_v60 = vld [vmem:[#allocation5 + $0x2d8] sm:$0xff] }
 0x1c1   :  { %3683 = vmatprep.subr.bf16.mxu0 %v7902_v26  ;;  %3724 = vmatprep.subr.bf16.mxu1 %v8030_v7  ;;  %v7854_v26 = vcombine.high %v130_v2, %v134_v3  ;;  %v7982_v7 = vcombine.high %v258_v4, %v262_v5  ;;  %v214_v61 = vld [vmem:[#allocation5 + $0x2f8] sm:$0xff] }
 0x1c2   :  { %v338_v62 = vld [vmem:[#allocation5 + $0x6d8] sm:$0xff] }
 0x1c3   :  { %v3389_v22 = vpop.f32.mrf.mxu0  ;;  %3634 = vmatmul.mubr.bf16.vlgmr.msra.gmra.mxu0 %v9153_v36  ;;  %v3430_v27 = vpop.f32.mrf.mxu1  ;;  %3675 = vmatmul.mubr.bf16.vlgmr.msra.gmra.mxu1 %v9155_v39  ;;  %v342_v63 = vld [vmem:[#allocation5 + $0x6f8] sm:$0xff] }
 0x1c4   :  { %3684 = vmatpush1.bf16.msra.mxu0 %v7901_v12  ;;  %v9187_v30 = vadd.f32 %v3430_v27, %v3389_v22  ;;  %3725 = vmatpush1.bf16.msra.mxu1 %v8029_v13  ;;  %v7853_v12 = vcombine.low %v130_v2, %v134_v3  ;;  %v7981_v13 = vcombine.low %v258_v4, %v262_v5  ;;  %v370_v22 = vld [vmem:[#allocation5 + $0x7d8] sm:$0xff] }
 0x1c5   :  { %v3391_v32 = vpop.f32.mrf.mxu0  ;;  %3685 = vmatprep.subr.bf16.mxu0 %v7894_v14  ;;  %v3432_v35 = vpop.f32.mrf.mxu1  ;;  %3726 = vmatprep.subr.bf16.mxu1 %v8022_v15  ;;  %v7846_v14 = vcombine.high %v122_v8, %v126_v9  ;;  %v7974_v15 = vcombine.high %v250_v10, %v254_v11  ;;  %v7973_v27 = vcombine.low %v250_v10, %v254_v11  ;;  %v202_v2 = vld [vmem:[#allocation5 + $0x298] sm:$0xff] }
 0x1c6   :  { %3715 = vmatprep.mubr.bf16.mxu0 %v9135_v58  ;;  %v9190_v41 = vadd.f32 %v3432_v35, %v3391_v32  ;;  %3756 = vmatprep.mubr.bf16.mxu1 %v9137_v59  ;;  %v150_v58 = vld [vmem:[#allocation5 + $0xf8] sm:$0xff]  ;;  %v8005_v59 = vcombine.low %v282_v43, %v286_v44  ;;  %v8094_v32 = vcombine.high %v370_v22, %v374_v24 }
 0x1c7   :  { %v3393_v42 = vpop.f32.mrf.mxu0  ;;  %v3434_v45 = vpop.f32.mrf.mxu1  ;;  %v7870_v56 = vcombine.high %v146_v52, %v150_v58  ;;  %v7869_v17 = vcombine.low %v146_v52, %v150_v58  ;;  %v362_v35 = vld [vmem:[#allocation5 + $0x798] sm:$0xff]  ;;  %v8093_v40 = vcombine.low %v370_v22, %v374_v24 }
 0x1c8   :  { %3686 = vmatpush1.bf16.msra.mxu0 %v7893_v29  ;;  %3727 = vmatpush1.bf16.msra.mxu1 %v8021_v33  ;;  %v7966_v29 = vcombine.high %v242_v18, %v246_v19  ;;  %v234_v33 = vld [vmem:[#allocation5 + $0x398] sm:$0xff] }
 0x1c9   :  { %v3394_v47 = vpop.f32.mrf.mxu0  ;;  %3687 = vmatprep.subr.bf16.mxu0 %v7886_v34  ;;  %v3435_v50 = vpop.f32.mrf.mxu1  ;;  %3728 = vmatprep.subr.bf16.mxu1 %v8014_v37  ;;  %v238_v34 = vld [vmem:[#allocation5 + $0x3b8] sm:$0xff] }
 0x1ca   :  { %v366_v37 = vld [vmem:[#allocation5 + $0x7b8] sm:$0xff]  ;;  %v7958_v42 = vcombine.high %v234_v33, %v238_v34 }
 0x1cb   :  { %v8086_v43 = vcombine.high %v362_v35, %v366_v37  ;;  %v226_v44 = vld [vmem:[#allocation5 + $0x358] sm:$0xff] }
 0x1cc   :  { %3688 = vmatpush1.bf16.msra.mxu0 %v7885_v46  ;;  %3729 = vmatpush1.bf16.msra.mxu1 %v8013_v48  ;;  %v230_v45 = vld [vmem:[#allocation5 + $0x378] sm:$0xff]  ;;  %v7957_v48 = vcombine.low %v234_v33, %v238_v34 }
 0x1cd   :  { %3689 = vmatprep.subr.bf16.mxu0 %v7878_v49  ;;  %3730 = vmatprep.subr.bf16.mxu1 %v8006_v51  ;;  %v354_v46 = vld [vmem:[#allocation5 + $0x758] sm:$0xff]  ;;  %v8085_v49 = vcombine.low %v362_v35, %v366_v37  ;;  %v7950_v50 = vcombine.high %v226_v44, %v230_v45 }
 0x1ce   :  { %v358_v47 = vld [vmem:[#allocation5 + $0x778] sm:$0xff] }
 0x1cf   :  { %v8078_v51 = vcombine.high %v354_v46, %v358_v47  ;;  %v218_v52 = vld [vmem:[#allocation5 + $0x318] sm:$0xff] }
 0x1d0   :  { %3690 = vmatpush1.bf16.msra.mxu0 %v7877_v55  ;;  %3731 = vmatpush1.bf16.msra.mxu1 %v8005_v59  ;;  %v222_v58 = vld [vmem:[#allocation5 + $0x338] sm:$0xff]  ;;  %v7949_v55 = vcombine.low %v226_v44, %v230_v45  ;;  %v8077_v59 = vcombine.low %v354_v46, %v358_v47 }
 0x1d1   :  { %3691 = vmatprep.subr.bf16.mxu0 %v7870_v56  ;;  %3732 = vmatprep.subr.bf16.mxu1 %v7998_v57  ;;  %v7942_v56 = vcombine.high %v218_v52, %v222_v58  ;;  %v8070_v57 = vcombine.high %v346_v53, %v350_v54  ;;  %v206_v3 = vld [vmem:[#allocation5 + $0x2b8] sm:$0xff] }
 0x1d2   :  { %v330_v4 = vld [vmem:[#allocation5 + $0x698] sm:$0xff] }
 0x1d3   :  { %v334_v5 = vld [vmem:[#allocation5 + $0x6b8] sm:$0xff] }
 0x1d4   :  { %3692 = vmatpush1.bf16.msra.mxu0 %v7869_v17  ;;  %3733 = vmatpush1.bf16.msra.mxu1 %v7997_v21  ;;  %v7941_v17 = vcombine.low %v218_v52, %v222_v58  ;;  %v8069_v21 = vcombine.low %v346_v53, %v350_v54  ;;  %v194_v8 = vld [vmem:[#allocation5 + $0x258] sm:$0xff] }
 0x1d5   :  { %3693 = vmatprep.subr.bf16.mxu0 %v7862_v0  ;;  %3734 = vmatprep.subr.bf16.mxu1 %v7990_v1  ;;  %v7934_v0 = vcombine.high %v210_v60, %v214_v61  ;;  %v8062_v1 = vcombine.high %v338_v62, %v342_v63  ;;  %v198_v9 = vld [vmem:[#allocation5 + $0x278] sm:$0xff] }
 0x1d6   :  { %v322_v10 = vld [vmem:[#allocation5 + $0x658] sm:$0xff] }
 0x1d7   :  { %v326_v11 = vld [vmem:[#allocation5 + $0x678] sm:$0xff] }
 0x1d8   :  { %3694 = vmatpush1.bf16.msra.mxu0 %v7861_v6  ;;  %3735 = vmatpush1.bf16.msra.mxu1 %v7989_v23  ;;  %v7933_v6 = vcombine.low %v210_v60, %v214_v61  ;;  %v8061_v23 = vcombine.low %v338_v62, %v342_v63  ;;  %v186_v18 = vld [vmem:[#allocation5 + $0x218] sm:$0xff]  ;;  %v3876_v63 = vlaneseq }
 0x1d9   :  { %3695 = vmatprep.subr.bf16.mxu0 %v7854_v26  ;;  %3736 = vmatprep.subr.bf16.mxu1 %v7982_v7  ;;  %v7926_v26 = vcombine.high %v202_v2, %v206_v3  ;;  %v8054_v7 = vcombine.high %v330_v4, %v334_v5  ;;  %v190_v19 = vld [vmem:[#allocation5 + $0x238] sm:$0xff] }
 0x1da   :  { %v314_v22 = vld [vmem:[#allocation5 + $0x618] sm:$0xff] }
 0x1db   :  { %v318_v24 = vld [vmem:[#allocation5 + $0x638] sm:$0xff] }
 0x1dc   :  { %3696 = vmatpush1.bf16.msra.mxu0 %v7853_v12  ;;  %3737 = vmatpush1.bf16.msra.mxu1 %v7981_v13  ;;  %v7925_v12 = vcombine.low %v202_v2, %v206_v3  ;;  %v8053_v13 = vcombine.low %v330_v4, %v334_v5  ;;  %v434_v33 = vld [vmem:[#allocation5 + $0x9d8] sm:$0xff] }
 0x1dd   :  { %3697 = vmatprep.subr.bf16.mxu0 %v7846_v14  ;;  %3738 = vmatprep.subr.bf16.mxu1 %v7974_v15  ;;  %v7918_v14 = vcombine.high %v194_v8, %v198_v9  ;;  %v8046_v15 = vcombine.high %v322_v10, %v326_v11  ;;  %v438_v34 = vld [vmem:[#allocation5 + $0x9f8] sm:$0xff] }
 0x1de   :  { %v562_v35 = vld [vmem:[#allocation5 + $0xdd8] sm:$0xff] }
 0x1df   :  { %v566_v37 = vld [vmem:[#allocation5 + $0xdf8] sm:$0xff] }
 0x1e0   :  { %3698 = vmatpush1.bf16.msra.mxu0 %v7845_v25  ;;  %3739 = vmatpush1.bf16.msra.mxu1 %v7973_v27  ;;  %v7917_v25 = vcombine.low %v194_v8, %v198_v9  ;;  %v8045_v27 = vcombine.low %v322_v10, %v326_v11  ;;  %v426_v44 = vld [vmem:[#allocation5 + $0x998] sm:$0xff] }
 0x1e1   :  { %3699 = vmatprep.subr.bf16.mxu0 %v7966_v29  ;;  %3740 = vmatprep.subr.bf16.mxu1 %v8094_v32  ;;  %v7910_v29 = vcombine.high %v186_v18, %v190_v19  ;;  %v8038_v32 = vcombine.high %v314_v22, %v318_v24  ;;  %v430_v45 = vld [vmem:[#allocation5 + $0x9b8] sm:$0xff] }
 0x1e2   :  { %v554_v46 = vld [vmem:[#allocation5 + $0xd98] sm:$0xff] }
 0x1e3   :  { %v558_v47 = vld [vmem:[#allocation5 + $0xdb8] sm:$0xff] }
 0x1e4   :  { %3700 = vmatpush2.bf16.msra.mxu0 %v7965_v38  ;;  %3741 = vmatpush2.bf16.msra.mxu1 %v8093_v40  ;;  %v7909_v38 = vcombine.low %v186_v18, %v190_v19  ;;  %v8037_v40 = vcombine.low %v314_v22, %v318_v24  ;;  %v418_v52 = vld [vmem:[#allocation5 + $0x958] sm:$0xff]  ;;  %v8277_v61 = vcombine.low %v554_v46, %v558_v47 }
 0x1e5   :  { %3701 = vmatprep.subr.bf16.mxu0 %v7958_v42  ;;  %3742 = vmatprep.subr.bf16.mxu1 %v8086_v43  ;;  %v8158_v42 = vcombine.high %v434_v33, %v438_v34  ;;  %v8286_v43 = vcombine.high %v562_v35, %v566_v37  ;;  %v422_v58 = vld [vmem:[#allocation5 + $0x978] sm:$0xff] }
 0x1e6   :  { %v546_v54 = vld [vmem:[#allocation5 + $0xd58] sm:$0xff]  ;;  %v8142_v62 = vcombine.high %v418_v52, %v422_v58  ;;  %v8141_v5 = vcombine.low %v418_v52, %v422_v58 }
 0x1e7   :  { %v538_v2 = vld [vmem:[#allocation5 + $0xd18] sm:$0xff] }
 0x1e8   :  { %3702 = vmatpush2.bf16.msra.mxu0 %v7957_v48  ;;  %3743 = vmatpush2.bf16.msra.mxu1 %v8085_v49  ;;  %v8157_v48 = vcombine.low %v434_v33, %v438_v34  ;;  %v8285_v49 = vcombine.low %v562_v35, %v566_v37  ;;  %v402_v9 = vld [vmem:[#allocation5 + $0x8d8] sm:$0xff] }
 0x1e9   :  { %3703 = vmatprep.subr.bf16.mxu0 %v7950_v50  ;;  %3744 = vmatprep.subr.bf16.mxu1 %v8078_v51  ;;  %v8150_v50 = vcombine.high %v426_v44, %v430_v45  ;;  %v8278_v51 = vcombine.high %v554_v46, %v558_v47  ;;  %v406_v10 = vld [vmem:[#allocation5 + $0x8f8] sm:$0xff] }
 0x1ea   :  { %v530_v11 = vld [vmem:[#allocation5 + $0xcd8] sm:$0xff]  ;;  %v8126_v18 = vcombine.high %v402_v9, %v406_v10  ;;  %v8125_v33 = vcombine.low %v402_v9, %v406_v10 }
 0x1eb   :  { %v394_v22 = vld [vmem:[#allocation5 + $0x898] sm:$0xff] }
 0x1ec   :  { %3704 = vmatpush2.bf16.msra.mxu0 %v7949_v55  ;;  %3745 = vmatpush2.bf16.msra.mxu1 %v8077_v59  ;;  %v550_v55 = vld [vmem:[#allocation5 + $0xd78] sm:$0xff] }
 0x1ed   :  { %3705 = vmatprep.subr.bf16.mxu0 %v7942_v56  ;;  %3746 = vmatprep.subr.bf16.mxu1 %v8070_v57  ;;  %v8149_v57 = vcombine.low %v426_v44, %v430_v45  ;;  %v398_v24 = vld [vmem:[#allocation5 + $0x8b8] sm:$0xff] }
 0x1ee   :  { %v3867_v34 = vld [vmem:[#allocation11 + $0x8] sm:$0xff]  ;;  %v8117_v47 = vcombine.low %v394_v22, %v398_v24 }
 0x1ef   :  { %v514_v44 = vld [vmem:[#allocation5 + $0xc58] sm:$0xff] }
 0x1f0   :  { %3706 = vmatpush2.bf16.msra.mxu0 %v7941_v17  ;;  %3747 = vmatpush2.bf16.msra.mxu1 %v8069_v21  ;;  %v518_v45 = vld [vmem:[#allocation5 + $0xc78] sm:$0xff] }
 0x1f1   :  { %3707 = vmatprep.subr.bf16.mxu0 %v7934_v0  ;;  %3748 = vmatprep.subr.bf16.mxu1 %v8062_v1  ;;  %v410_v0 = vld [vmem:[#allocation5 + $0x918] sm:$0xff] }
 0x1f2   :  { %v414_v1 = vld [vmem:[#allocation5 + $0x938] sm:$0xff] }
 0x1f3   :  { %v378_v52 = vld [vmem:[#allocation5 + $0x818] sm:$0xff] }
 0x1f4   :  { %3708 = vmatpush2.bf16.msra.mxu0 %v7933_v6  ;;  %3749 = vmatpush2.bf16.msra.mxu1 %v8061_v23  ;;  %v8269_v23 = vcombine.low %v546_v54, %v550_v55  ;;  %v382_v58 = vld [vmem:[#allocation5 + $0x838] sm:$0xff] }
 0x1f5   :  { %3709 = vmatprep.subr.bf16.mxu0 %v7926_v26  ;;  %3750 = vmatprep.subr.bf16.mxu1 %v8054_v7  ;;  %v8134_v26 = vcombine.high %v410_v0, %v414_v1  ;;  %v9201_v7 = vshrl.u32 %v3876_v63, 7  ;;  %v502_v63 = vld [vmem:[#allocation5 + $0xbf8] sm:$0xff] }
 0x1f6   :  { %v486_v9 = vld [vmem:[#allocation5 + $0xb78] sm:$0xff] }
 0x1f7   :  { %v610_v10 = vld [vmem:[#allocation5 + $0xf58] sm:$0xff] }
 0x1f8   :  { %3710 = vmatpush2.bf16.msra.mxu0 %v7925_v12  ;;  %3751 = vmatpush2.bf16.msra.mxu1 %v8053_v13  ;;  %v534_v12 = vld [vmem:[#allocation5 + $0xcf8] sm:$0xff]  ;;  %v8133_v13 = vcombine.low %v410_v0, %v414_v1  ;;  %v8101_v0 = vcombine.low %v378_v52, %v382_v58 }
 0x1f9   :  { %3711 = vmatprep.subr.bf16.mxu0 %v7918_v14  ;;  %3752 = vmatprep.subr.bf16.mxu1 %v8046_v15  ;;  %v3890_v14 = vsub.s32 3, %v9201_v7  ;;  %v8254_v19 = vcombine.high %v530_v11, %v534_v12  ;;  %v8253_v37 = vcombine.low %v530_v11, %v534_v12  ;;  %v614_v11 = vld [vmem:[#allocation5 + $0xf78] sm:$0xff] }
 0x1fc   :  { %3712 = vmatpush2.bf16.msra.mxu0 %v7917_v25  ;;  %3753 = vmatpush2.bf16.msra.mxu1 %v8045_v27  ;;  %v9205_v25 = vld [vmem:[#allocation7] sm:$0xff]  ;;  %v522_v27 = vld [vmem:[#allocation5 + $0xc98] sm:$0xff] }
 0x1fd   :  { %3713 = vmatprep.subr.bf16.mxu0 %v7910_v29  ;;  %3754 = vmatprep.subr.bf16.mxu1 %v8038_v32  ;;  %v526_v29 = vld [vmem:[#allocation5 + $0xcb8] sm:$0xff]  ;;  %v3891_v35 = vrot.slane %v9205_v25, %v3890_v14 }
 0x200   :  { %3714 = vmatpush2.bf16.msra.mxu0 %v7909_v38  ;;  %3755 = vmatpush2.bf16.msra.mxu1 %v8037_v40  ;;  %v8118_v38 = vcombine.high %v394_v22, %v398_v24  ;;  %v8246_v40 = vcombine.high %v522_v27, %v526_v29  ;;  %v602_v22 = vld [vmem:[#allocation5 + $0xf18] sm:$0xff] }
 0x201   :  { %3765 = vmatprep.subr.bf16.mxu0 %v8158_v42  ;;  %3806 = vmatprep.subr.bf16.mxu1 %v8286_v43  ;;  %v386_v42 = vld [vmem:[#allocation5 + $0x858] sm:$0xff] }
 0x202   :  { %v390_v43 = vld [vmem:[#allocation5 + $0x878] sm:$0xff] }
 0x203   :  { %v3471_v53 = vpop.f32.mrf.mxu0  ;;  %3716 = vmatmul.mubr.bf16.vlgmr.msra.gmra.mxu0 %v9141_v16  ;;  %v3512_v56 = vpop.f32.mrf.mxu1  ;;  %3757 = vmatmul.mubr.bf16.vlgmr.msra.gmra.mxu1 %v9143_v20  ;;  %v8270_v16 = vcombine.high %v546_v54, %v550_v55  ;;  %v542_v20 = vld [vmem:[#allocation5 + $0xd38] sm:$0xff] }
 0x204   :  { %v3472_v59 = vadd.f32 %v3471_v53, %v9187_v30  ;;  %3766 = vmatpush1.bf16.msra.mxu0 %v8157_v48  ;;  %3807 = vmatpush1.bf16.msra.mxu1 %v8285_v49  ;;  %v8261_v15 = vcombine.low %v538_v2, %v542_v20  ;;  %v8245_v49 = vcombine.low %v522_v27, %v526_v29  ;;  %v506_v53 = vld [vmem:[#allocation5 + $0xc18] sm:$0xff] }
 0x205   :  { %v3473_v60 = vpop.f32.mrf.mxu0  ;;  %3767 = vmatprep.subr.bf16.mxu0 %v8150_v50  ;;  %v3514_v21 = vpop.f32.mrf.mxu1  ;;  %3808 = vmatprep.subr.bf16.mxu1 %v8278_v51  ;;  %v8110_v50 = vcombine.high %v386_v42, %v390_v43  ;;  %v8238_v51 = vcombine.high %v514_v44, %v518_v45  ;;  %v510_v54 = vld [vmem:[#allocation5 + $0xc38] sm:$0xff] }
 0x206   :  { %v9196_v17 = vadd.f32 %v3512_v56, %v3472_v59  ;;  %3797 = vmatprep.mubr.bf16.mxu0 %v9145_v28  ;;  %3838 = vmatprep.mubr.bf16.mxu1 %v9148_v31  ;;  %v3474_v3 = vadd.f32 %v3473_v60, %v9190_v41  ;;  %v8262_v28 = vcombine.high %v538_v2, %v542_v20  ;;  %v3882_v31 = vsub.s32 1, %v9201_v7  ;;  %v490_v20 = vld [vmem:[#allocation5 + $0xb98] sm:$0xff] }
 0x207   :  { %v3475_v30 = vpop.f32.mrf.mxu0  ;;  %v3516_v4 = vpop.f32.mrf.mxu1  ;;  %v8109_v59 = vcombine.low %v386_v42, %v390_v43  ;;  %v8102_v60 = vcombine.high %v378_v52, %v382_v58  ;;  %v8229_v1 = vcombine.low %v506_v53, %v510_v54  ;;  %v606_v24 = vld [vmem:[#allocation5 + $0xf38] sm:$0xff] }
 0x208   :  { %3768 = vmatpush1.bf16.msra.mxu0 %v8149_v57  ;;  %3809 = vmatpush1.bf16.msra.mxu1 %v8277_v61  ;;  %v3515_v41 = vadd.f32 %v3514_v21, %v3474_v3  ;;  %v3883_v32 = vrot.slane %v9205_v25, %v3882_v31  ;;  %v8237_v57 = vcombine.low %v514_v44, %v518_v45  ;;  %v626_v21 = vld [vmem:[#allocation5 + $0xfd8] sm:$0xff] }
 0x209   :  { %v3476_v6 = vpop.f32.mrf.mxu0  ;;  %3769 = vmatprep.subr.bf16.mxu0 %v8142_v62  ;;  %v3517_v8 = vpop.f32.mrf.mxu1  ;;  %3810 = vmatprep.subr.bf16.mxu1 %v8270_v16  ;;  %v8230_v61 = vcombine.high %v506_v53, %v510_v54  ;;  %v498_v62 = vld [vmem:[#allocation5 + $0xbd8] sm:$0xff] }
 0x20a   :  { %v9213_v46 = vadd.f32 %v3883_v32, %v3867_v34  ;;  %v9215_v48 = vadd.f32 %v3891_v35, %v3515_v41  ;;  %v630_v16 = vld [vmem:[#allocation5 + $0xff8] sm:$0xff]  ;;  %v8222_v30 = vcombine.high %v498_v62, %v502_v63  ;;  %v8221_v6 = vcombine.low %v498_v62, %v502_v63 }
 0x20b   :  { %v8350_v2 = vcombine.high %v626_v21, %v630_v16  ;;  %v494_v3 = vld [vmem:[#allocation5 + $0xbb8] sm:$0xff]  ;;  %v8326_v35 = vcombine.high %v602_v22, %v606_v24 }
 0x20c   :  { %3770 = vmatpush1.bf16.msra.mxu0 %v8141_v5  ;;  %3811 = vmatpush1.bf16.msra.mxu1 %v8269_v23  ;;  %v8352_v55 = vmul.f32 -1.442695, %v9213_v46  ;;  %v8354_v56 = vmul.f32 -1.442695, %v9215_v48  ;;  %v618_v4 = vld [vmem:[#allocation5 + $0xf98] sm:$0xff]  ;;  %v8349_v23 = vcombine.low %v626_v21, %v630_v16  ;;  %v8213_v12 = vcombine.low %v490_v20, %v494_v3 }
 0x20d   :  { %3771 = vmatprep.subr.bf16.mxu0 %v8134_v26  ;;  %3812 = vmatprep.subr.bf16.mxu1 %v8262_v28  ;;  %v622_v5 = vld [vmem:[#allocation5 + $0xfb8] sm:$0xff]  ;;  %v8214_v26 = vcombine.high %v490_v20, %v494_v3 }
 0x20e   :  { %8888 = vpow2.f32 %v8352_v55  ;;  %v8342_v8 = vcombine.high %v618_v4, %v622_v5  ;;  %v482_v28 = vld [vmem:[#allocation5 + $0xb58] sm:$0xff]  ;;  %v8341_v41 = vcombine.low %v618_v4, %v622_v5 }
 0x20f   :  { %8890 = vpow2.f32 %v8354_v56  ;;  %v8205_v29 = vcombine.low %v482_v28, %v486_v9  ;;  %v598_v42 = vld [vmem:[#allocation5 + $0xef8] sm:$0xff] }
 0x210   :  { %3772 = vmatpush1.bf16.msra.mxu0 %v8133_v13  ;;  %3813 = vmatpush1.bf16.msra.mxu1 %v8261_v15  ;;  %v8206_v13 = vcombine.high %v482_v28, %v486_v9  ;;  %v8334_v15 = vcombine.high %v610_v10, %v614_v11  ;;  %v462_v52 = vld [vmem:[#allocation5 + $0xab8] sm:$0xff]  ;;  %v4176_v28 = vld [vmem:[#allocation8 + $0x5e0] sm:$0xff] }
 0x211   :  { %3773 = vmatprep.subr.bf16.mxu0 %v8126_v18  ;;  %3814 = vmatprep.subr.bf16.mxu1 %v8254_v19  ;;  %v474_v18 = vld [vmem:[#allocation5 + $0xb18] sm:$0xff] }
 0x212   :  { %v478_v19 = vld [vmem:[#allocation5 + $0xb38] sm:$0xff] }
 0x213   :  { %v8198_v34 = vcombine.high %v474_v18, %v478_v19  ;;  %v8197_v44 = vcombine.low %v474_v18, %v478_v19  ;;  %v586_v58 = vld [vmem:[#allocation5 + $0xe98] sm:$0xff]  ;;  %v4036_v18 = vld [vmem:[#allocation8 + $0x180] sm:$0xff] }
 0x214   :  { %3774 = vmatpush1.bf16.msra.mxu0 %v8125_v33  ;;  %3815 = vmatpush1.bf16.msra.mxu1 %v8253_v37  ;;  %v8333_v33 = vcombine.low %v610_v10, %v614_v11  ;;  %v466_v37 = vld [vmem:[#allocation5 + $0xad8] sm:$0xff]  ;;  %v4040_v19 = vld [vmem:[#allocation8 + $0x1a0] sm:$0xff] }
 0x215   :  { %3775 = vmatprep.subr.bf16.mxu0 %v8118_v38  ;;  %3816 = vmatprep.subr.bf16.mxu1 %v8246_v40  ;;  %v470_v38 = vld [vmem:[#allocation5 + $0xaf8] sm:$0xff] }
 0x216   :  { %v594_v40 = vld [vmem:[#allocation5 + $0xed8] sm:$0xff]  ;;  %v8189_v54 = vcombine.low %v466_v37, %v470_v38 }
 0x217   :  { %v590_v53 = vld [vmem:[#allocation5 + $0xeb8] sm:$0xff]  ;;  %v8317_v55 = vcombine.low %v594_v40, %v598_v42 }
 0x218   :  { %3776 = vmatpush1.bf16.msra.mxu0 %v8117_v47  ;;  %3817 = vmatpush1.bf16.msra.mxu1 %v8245_v49  ;;  %v8325_v47 = vcombine.low %v602_v22, %v606_v24  ;;  %v8190_v49 = vcombine.high %v466_v37, %v470_v38  ;;  %v8310_v56 = vcombine.high %v586_v58, %v590_v53  ;;  %v582_v62 = vld [vmem:[#allocation5 + $0xe78] sm:$0xff] }
 0x219   :  { %3777 = vmatprep.subr.bf16.mxu0 %v8110_v50  ;;  %3818 = vmatprep.subr.bf16.mxu1 %v8238_v51  ;;  %v8318_v50 = vcombine.high %v594_v40, %v598_v42  ;;  %v458_v51 = vld [vmem:[#allocation5 + $0xa98] sm:$0xff]  ;;  %v8309_v21 = vcombine.low %v586_v58, %v590_v53  ;;  %v4156_v40 = vld [vmem:[#allocation8 + $0x540] sm:$0xff] }
 0x21a   :  { %v8181_v63 = vcombine.low %v458_v51, %v462_v52  ;;  %v574_v20 = vld [vmem:[#allocation5 + $0xe38] sm:$0xff]  ;;  %v4160_v42 = vld [vmem:[#allocation8 + $0x560] sm:$0xff] }
 0x21b   :  { %v8889_v27 = vpop.eup %8888  ;;  %v4148_v53 = vld [vmem:[#allocation8 + $0x500] sm:$0xff] }
 0x21c   :  { %3778 = vmatpush1.bf16.msra.mxu0 %v8109_v59  ;;  %3819 = vmatpush1.bf16.msra.mxu1 %v8237_v57  ;;  %v8891_v32 = vpop.eup %8890  ;;  %v3949_v43 = vadd.f32 1.0, %v8889_v27  ;;  %v8182_v59 = vcombine.high %v458_v51, %v462_v52  ;;  %v450_v57 = vld [vmem:[#allocation5 + $0xa58] sm:$0xff]  ;;  %v4164_v27 = vld [vmem:[#allocation8 + $0x580] sm:$0xff]  ;;  %v8528_v51 = vcombine.high %v4156_v40, %v4160_v42 }
 0x21d   :  { %3779 = vmatprep.subr.bf16.mxu0 %v8102_v60  ;;  %3820 = vmatprep.subr.bf16.mxu1 %v8230_v61  ;;  %v3951_v45 = vadd.f32 1.0, %v8891_v32  ;;  %v454_v60 = vld [vmem:[#allocation5 + $0xa78] sm:$0xff]  ;;  %v4024_v52 = vld [vmem:[#allocation8 + $0x120] sm:$0xff] }
 0x21e   :  { %8892 = vrcp.f32 %v3949_v43  ;;  %v578_v61 = vld [vmem:[#allocation5 + $0xe58] sm:$0xff]  ;;  %v8174_v16 = vcombine.high %v450_v57, %v454_v60  ;;  %v8173_v3 = vcombine.low %v450_v57, %v454_v60  ;;  %v8527_v57 = vcombine.low %v4156_v40, %v4160_v42  ;;  %v4116_v40 = vld [vmem:[#allocation8 + $0x400] sm:$0xff] }
 0x21f   :  { %8894 = vrcp.f32 %v3951_v45  ;;  %v8301_v4 = vcombine.low %v578_v61, %v582_v62  ;;  %v4120_v42 = vld [vmem:[#allocation8 + $0x420] sm:$0xff] }
 0x220   :  { %3780 = vmatpush1.bf16.msra.mxu0 %v8101_v0  ;;  %3821 = vmatpush1.bf16.msra.mxu1 %v8229_v1  ;;  %v8302_v0 = vcombine.high %v578_v61, %v582_v62  ;;  %v442_v1 = vld [vmem:[#allocation5 + $0xa18] sm:$0xff]  ;;  %v3878_v61 = vsub.s32 0, %v9201_v7 }
 0x221   :  { %3781 = vmatprep.subr.bf16.mxu0 %v8222_v30  ;;  %3822 = vmatprep.subr.bf16.mxu1 %v8350_v2  ;;  %v446_v30 = vld [vmem:[#allocation5 + $0xa38] sm:$0xff] }
 0x222   :  { %v570_v2 = vld [vmem:[#allocation5 + $0xe18] sm:$0xff]  ;;  %v8166_v5 = vcombine.high %v442_v1, %v446_v30  ;;  %v8165_v10 = vcombine.low %v442_v1, %v446_v30  ;;  %v4140_v1 = vld [vmem:[#allocation8 + $0x4c0] sm:$0xff] }
 0x223   :  { %v4144_v30 = vld [vmem:[#allocation8 + $0x4e0] sm:$0xff] }
 0x224   :  { %3782 = vmatpush2.bf16.msra.mxu0 %v8221_v6  ;;  %3823 = vmatpush2.bf16.msra.mxu1 %v8349_v23  ;;  %v8294_v6 = vcombine.high %v570_v2, %v574_v20  ;;  %v4044_v23 = vld [vmem:[#allocation8 + $0x1c0] sm:$0xff] }
 0x225   :  { %3783 = vmatprep.subr.bf16.mxu0 %v8214_v26  ;;  %3824 = vmatprep.subr.bf16.mxu1 %v8342_v8  ;;  %v4048_v26 = vld [vmem:[#allocation8 + $0x1e0] sm:$0xff] }
 0x226   :  { %v4172_v8 = vld [vmem:[#allocation8 + $0x5c0] sm:$0xff]  ;;  %v8415_v22 = vcombine.low %v4044_v23, %v4048_v26 }
 0x227   :  { %v8543_v32 = vcombine.low %v4172_v8, %v4176_v28 }
 0x228   :  { %3784 = vmatpush2.bf16.msra.mxu0 %v8213_v12  ;;  %3825 = vmatpush2.bf16.msra.mxu1 %v8341_v41  ;;  %v8293_v12 = vcombine.low %v570_v2, %v574_v20  ;;  %v8416_v41 = vcombine.high %v4044_v23, %v4048_v26  ;;  %v4008_v23 = vld [vmem:[#allocation8 + $0xa0] sm:$0xff]  ;;  %v3866_v26 = vld [vmem:[#allocation11] sm:$0xff] }
 0x229   :  { %3785 = vmatprep.subr.bf16.mxu0 %v8206_v13  ;;  %3826 = vmatprep.subr.bf16.mxu1 %v8334_v15  ;;  %v8544_v13 = vcombine.high %v4172_v8, %v4176_v28  ;;  %v4132_v28 = vld [vmem:[#allocation8 + $0x480] sm:$0xff] }
 0x22b   :  { %v8893_v9 = vpop.eup %8892 }
 0x22c   :  { %3786 = vmatpush2.bf16.msra.mxu0 %v8205_v29  ;;  %3827 = vmatpush2.bf16.msra.mxu1 %v8333_v33  ;;  %v8895_v11 = vpop.eup %8894  ;;  %v3973_v15 = vmul.f32 %v8893_v9, %v9213_v46  ;;  %v4168_v29 = vld [vmem:[#allocation8 + $0x5a0] sm:$0xff]  ;;  %v8408_v33 = vcombine.high %v4036_v18, %v4040_v19 }
 0x22d   :  { %3787 = vmatprep.subr.bf16.mxu0 %v8198_v34  ;;  %3828 = vmatprep.subr.bf16.mxu1 %v8326_v35  ;;  %v3975_v24 = vmul.f32 %v8895_v11, %v9215_v48  ;;  %v4028_v34 = vld [vmem:[#allocation8 + $0x140] sm:$0xff]  ;;  %v8536_v46 = vcombine.high %v4164_v27, %v4168_v29  ;;  %v8511_v11 = vcombine.low %v4140_v1, %v4144_v30 }
 0x22e   :  { %v4032_v35 = vld [vmem:[#allocation8 + $0x160] sm:$0xff]  ;;  %v9222_v38 = vpack.c.bf16 %v3973_v15, %v3973_v15 }
 0x22f   :  { %v9225_v48 = vpack.c.bf16 %v3975_v24, %v3975_v24  ;;  %v4136_v9 = vld [vmem:[#allocation8 + $0x4a0] sm:$0xff] }
 0x230   :  { %3788 = vmatpush2.bf16.msra.mxu0 %v8197_v44  ;;  %3829 = vmatpush2.bf16.msra.mxu1 %v8325_v47  ;;  %v8407_v44 = vcombine.low %v4036_v18, %v4040_v19  ;;  %v3996_v15 = vld [vmem:[#allocation8 + $0x40] sm:$0xff] }
 0x231   :  { %3789 = vmatprep.subr.bf16.mxu0 %v8190_v49  ;;  %3830 = vmatprep.subr.bf16.mxu1 %v8318_v50  ;;  %v8400_v49 = vcombine.high %v4028_v34, %v4032_v35  ;;  %v4000_v18 = vld [vmem:[#allocation8 + $0x60] sm:$0xff] }
 0x232   :  { %v4128_v24 = vld [vmem:[#allocation8 + $0x460] sm:$0xff] }
 0x234   :  { %3790 = vmatpush2.bf16.msra.mxu0 %v8189_v54  ;;  %3831 = vmatpush2.bf16.msra.mxu1 %v8317_v55  ;;  %v4152_v54 = vld [vmem:[#allocation8 + $0x520] sm:$0xff] }
 0x235   :  { %3791 = vmatprep.subr.bf16.mxu0 %v8182_v59  ;;  %3832 = vmatprep.subr.bf16.mxu1 %v8310_v56  ;;  %v8399_v59 = vcombine.low %v4028_v34, %v4032_v35  ;;  %v8519_v20 = vcombine.low %v4148_v53, %v4152_v54  ;;  %v3988_v35 = vld [vmem:[#allocation8] sm:$0xff] }
 0x238   :  { %3792 = vmatpush2.bf16.msra.mxu0 %v8181_v63  ;;  %3833 = vmatpush2.bf16.msra.mxu1 %v8309_v21  ;;  %v8520_v63 = vcombine.high %v4148_v53, %v4152_v54  ;;  %v4012_v21 = vld [vmem:[#allocation8 + $0xc0] sm:$0xff]  ;;  %v8487_v53 = vcombine.low %v4116_v40, %v4120_v42 }
 0x239   :  { %3793 = vmatprep.subr.bf16.mxu0 %v8174_v16  ;;  %3834 = vmatprep.subr.bf16.mxu1 %v8302_v0  ;;  %v4016_v16 = vld [vmem:[#allocation8 + $0xe0] sm:$0xff]  ;;  %v3886_v0 = vsub.s32 2, %v9201_v7 }
 0x23b   :  { %v3887_v8 = vrot.slane %v9205_v25, %v3886_v0 }
 0x23c   :  { %3794 = vmatpush2.bf16.msra.mxu0 %v8173_v3  ;;  %3835 = vmatpush2.bf16.msra.mxu1 %v8301_v4  ;;  %v8384_v3 = vcombine.high %v4012_v21, %v4016_v16  ;;  %v3879_v4 = vrot.slane %v9205_v25, %v3878_v61 }
 0x23d   :  { %3795 = vmatprep.subr.bf16.mxu0 %v8166_v5  ;;  %3836 = vmatprep.subr.bf16.mxu1 %v8294_v6  ;;  %v8512_v5 = vcombine.high %v4140_v1, %v4144_v30  ;;  %v4004_v6 = vld [vmem:[#allocation8 + $0x80] sm:$0xff]  ;;  %v9246_v19 = vadd.f32 %v3887_v8, %v9196_v17  ;;  %v8367_v17 = vcombine.low %v3996_v15, %v4000_v18 }
 0x23e   :  { %v4092_v1 = vld [vmem:[#allocation8 + $0x340] sm:$0xff] }
 0x23f   :  { %v4096_v30 = vld [vmem:[#allocation8 + $0x360] sm:$0xff] }
 0x240   :  { %3796 = vmatpush2.bf16.msra.mxu0 %v8165_v10  ;;  %3837 = vmatpush2.bf16.msra.mxu1 %v8293_v12  ;;  %v8383_v10 = vcombine.low %v4012_v21, %v4016_v16  ;;  %v8376_v12 = vcombine.high %v4004_v6, %v4008_v23  ;;  %v4088_v8 = vld [vmem:[#allocation8 + $0x320] sm:$0xff] }
 0x241   :  { %7102 = vmatprep.subr.bf16.mxu0 %v8416_v41  ;;  %7143 = vmatprep.subr.bf16.mxu1 %v8544_v13  ;;  %v9243_v41 = vadd.f32 %v3879_v4, %v3866_v26  ;;  %v8504_v13 = vcombine.high %v4132_v28, %v4136_v9  ;;  %v4084_v26 = vld [vmem:[#allocation8 + $0x300] sm:$0xff] }
 0x243   :  { %v3553_v37 = vpop.f32.mrf.mxu0  ;;  %3798 = vmatmul.mubr.bf16.vlgmr.msra.gmra.mxu0 %v9153_v36  ;;  %v3594_v43 = vpop.f32.mrf.mxu1  ;;  %3839 = vmatmul.mubr.bf16.vlgmr.msra.gmra.mxu1 %v9155_v39  ;;  %v8535_v36 = vcombine.low %v4164_v27, %v4168_v29  ;;  %v4020_v39 = vld [vmem:[#allocation8 + $0x100] sm:$0xff]  ;;  %v8375_v27 = vcombine.low %v4004_v6, %v4008_v23  ;;  %v8503_v29 = vcombine.low %v4132_v28, %v4136_v9 }
 0x244   :  { %7103 = vmatpush1.bf16.msra.mxu0 %v8415_v22  ;;  %v9227_v45 = vadd.f32 %v3594_v43, %v3553_v37  ;;  %7134 = vmatprep.mubr.bf16.mxu0 %v9222_v38  ;;  %v8392_v60 = vcombine.high %v4020_v39, %v4024_v52  ;;  %v8391_v2 = vcombine.low %v4020_v39, %v4024_v52  ;;  %v4124_v22 = vld [vmem:[#allocation8 + $0x440] sm:$0xff] }
 0x245   :  { %7144 = vmatpush1.bf16.msra.mxu1 %v8543_v32  ;;  %v9230_v47 = vpop.f32.mrf.mxu0  ;;  %7175 = vmatprep.mubr.bf16.mxu1 %v9225_v48  ;;  %v9233_v50 = vpop.f32.mrf.mxu1  ;;  %v8368_v32 = vcombine.high %v3996_v15, %v4000_v18  ;;  %v8496_v34 = vcombine.high %v4124_v22, %v4128_v24  ;;  %v3992_v37 = vld [vmem:[#allocation8 + $0x20] sm:$0xff]  ;;  %v8495_v43 = vcombine.low %v4124_v22, %v4128_v24 }
 0x246   :  { %7104 = vmatprep.subr.bf16.mxu0 %v8408_v33  ;;  %7145 = vmatprep.subr.bf16.mxu1 %v8536_v46  ;;  %v8351_v33 = vmul.f32 -1.442695, %v9243_v41  ;;  %v8353_v46 = vmul.f32 -1.442695, %v9246_v19  ;;  %v4236_v39 = vld [vmem:[#allocation8 + $0x7c0] sm:$0xff] }
 0x247   :  { %v3557_v58 = vpop.f32.mrf.mxu0  ;;  %v3598_v55 = vpop.f32.mrf.mxu1  ;;  %v4240_v52 = vld [vmem:[#allocation8 + $0x7e0] sm:$0xff] }
 0x248   :  { %7105 = vmatpush1.bf16.msra.mxu0 %v8407_v44  ;;  %v8360_v44 = vcombine.high %v3988_v35, %v3992_v37  ;;  %8896 = vpow2.f32 %v8351_v33  ;;  %v8359_v58 = vcombine.low %v3988_v35, %v3992_v37  ;;  %v8608_v55 = vcombine.high %v4236_v39, %v4240_v52  ;;  %v4212_v9 = vld [vmem:[#allocation8 + $0x700] sm:$0xff] }
 0x249   :  { %7146 = vmatpush1.bf16.msra.mxu1 %v8535_v36  ;;  %v3558_v56 = vpop.f32.mrf.mxu0  ;;  %7106 = vmatprep.subr.bf16.mxu0 %v8400_v49  ;;  %v3599_v62 = vpop.f32.mrf.mxu1  ;;  %v8488_v36 = vcombine.high %v4116_v40, %v4120_v42  ;;  %v4108_v49 = vld [vmem:[#allocation8 + $0x3c0] sm:$0xff]  ;;  %8898 = vpow2.f32 %v8353_v46  ;;  %v8455_v33 = vcombine.low %v4084_v26, %v4088_v8 }
 0x24a   :  { %7147 = vmatprep.subr.bf16.mxu1 %v8528_v51  ;;  %v4112_v51 = vld [vmem:[#allocation8 + $0x3e0] sm:$0xff] }
 0x24b   :  { %v8480_v54 = vcombine.high %v4108_v49, %v4112_v51  ;;  %v4104_v56 = vld [vmem:[#allocation8 + $0x3a0] sm:$0xff]  ;;  %v8479_v62 = vcombine.low %v4108_v49, %v4112_v51 }
 0x24c   :  { %7107 = vmatpush1.bf16.msra.mxu0 %v8399_v59  ;;  %v4100_v59 = vld [vmem:[#allocation8 + $0x380] sm:$0xff] }
 0x24d   :  { %7148 = vmatpush1.bf16.msra.mxu1 %v8527_v57  ;;  %7108 = vmatprep.subr.bf16.mxu0 %v8392_v60  ;;  %v4228_v57 = vld [vmem:[#allocation8 + $0x780] sm:$0xff]  ;;  %v8472_v21 = vcombine.high %v4100_v59, %v4104_v56 }
 0x24e   :  { %7149 = vmatprep.subr.bf16.mxu1 %v8520_v63  ;;  %v4232_v60 = vld [vmem:[#allocation8 + $0x7a0] sm:$0xff]  ;;  %v8607_v63 = vcombine.low %v4236_v39, %v4240_v52 }
 0x24f   :  { %v8600_v16 = vcombine.high %v4228_v57, %v4232_v60  ;;  %v8599_v4 = vcombine.low %v4228_v57, %v4232_v60  ;;  %v4076_v22 = vld [vmem:[#allocation8 + $0x2c0] sm:$0xff] }
 0x250   :  { %7109 = vmatpush1.bf16.msra.mxu0 %v8391_v2  ;;  %v4220_v2 = vld [vmem:[#allocation8 + $0x740] sm:$0xff] }
 0x251   :  { %7150 = vmatpush1.bf16.msra.mxu1 %v8519_v20  ;;  %7110 = vmatprep.subr.bf16.mxu0 %v8384_v3  ;;  %v4224_v20 = vld [vmem:[#allocation8 + $0x760] sm:$0xff]  ;;  %v8471_v3 = vcombine.low %v4100_v59, %v4104_v56 }
 0x252   :  { %7151 = vmatprep.subr.bf16.mxu1 %v8512_v5  ;;  %v8464_v5 = vcombine.high %v4092_v1, %v4096_v30  ;;  %v8592_v23 = vcombine.high %v4220_v2, %v4224_v20  ;;  %v4080_v24 = vld [vmem:[#allocation8 + $0x2e0] sm:$0xff] }
 0x253   :  { %v8448_v35 = vcombine.high %v4076_v22, %v4080_v24  ;;  %v4068_v46 = vld [vmem:[#allocation8 + $0x280] sm:$0xff] }
 0x254   :  { %7111 = vmatpush1.bf16.msra.mxu0 %v8383_v10  ;;  %v4216_v10 = vld [vmem:[#allocation8 + $0x720] sm:$0xff] }
 0x255   :  { %7152 = vmatpush1.bf16.msra.mxu1 %v8511_v11  ;;  %7112 = vmatprep.subr.bf16.mxu0 %v8376_v12  ;;  %v8897_v6 = vpop.eup %8896  ;;  %v8463_v11 = vcombine.low %v4092_v1, %v4096_v30  ;;  %v8591_v12 = vcombine.low %v4220_v2, %v4224_v20  ;;  %v8584_v18 = vcombine.high %v4212_v9, %v4216_v10  ;;  %v4072_v40 = vld [vmem:[#allocation8 + $0x2a0] sm:$0xff] }
 0x256   :  { %7153 = vmatprep.subr.bf16.mxu1 %v8504_v13  ;;  %v8899_v28 = vpop.eup %8898  ;;  %v8456_v13 = vcombine.high %v4084_v26, %v4088_v8  ;;  %v3948_v15 = vadd.f32 1.0, %v8897_v6  ;;  %v4196_v42 = vld [vmem:[#allocation8 + $0x680] sm:$0xff] }
 0x257   :  { %v4060_v51 = vld [vmem:[#allocation8 + $0x240] sm:$0xff] }
 0x258   :  { %7113 = vmatpush1.bf16.msra.mxu0 %v8375_v27  ;;  %v3950_v27 = vadd.f32 1.0, %v8899_v28  ;;  %8900 = vrcp.f32 %v3948_v15  ;;  %v4064_v39 = vld [vmem:[#allocation8 + $0x260] sm:$0xff] }
 0x259   :  { %7154 = vmatpush1.bf16.msra.mxu1 %v8503_v29  ;;  %7114 = vmatprep.subr.bf16.mxu0 %v8368_v32  ;;  %v4204_v29 = vld [vmem:[#allocation8 + $0x6c0] sm:$0xff] }
 0x25a   :  { %7155 = vmatprep.subr.bf16.mxu1 %v8496_v34  ;;  %v4208_v32 = vld [vmem:[#allocation8 + $0x6e0] sm:$0xff]  ;;  %v8583_v34 = vcombine.low %v4212_v9, %v4216_v10  ;;  %8902 = vrcp.f32 %v3950_v27 }
 0x25b   :  { %v8576_v37 = vcombine.high %v4204_v29, %v4208_v32  ;;  %v4188_v52 = vld [vmem:[#allocation8 + $0x640] sm:$0xff] }
 0x25c   :  { %7115 = vmatpush1.bf16.msra.mxu0 %v8367_v17  ;;  %v4200_v17 = vld [vmem:[#allocation8 + $0x6a0] sm:$0xff] }
 0x25d   :  { %7156 = vmatpush1.bf16.msra.mxu1 %v8495_v43  ;;  %7116 = vmatprep.subr.bf16.mxu0 %v8360_v44  ;;  %v8447_v43 = vcombine.low %v4076_v22, %v4080_v24  ;;  %v8575_v44 = vcombine.low %v4204_v29, %v4208_v32  ;;  %v8568_v49 = vcombine.high %v4196_v42, %v4200_v17  ;;  %v4052_v56 = vld [vmem:[#allocation8 + $0x200] sm:$0xff] }
 0x25e   :  { %7157 = vmatprep.subr.bf16.mxu1 %v8488_v36  ;;  %v8440_v36 = vcombine.high %v4068_v46, %v4072_v40  ;;  %v4056_v57 = vld [vmem:[#allocation8 + $0x220] sm:$0xff] }
 0x25f   :  { %v4180_v60 = vld [vmem:[#allocation8 + $0x600] sm:$0xff]  ;;  %v8423_v6 = vcombine.low %v4052_v56, %v4056_v57 }
 0x260   :  { %7117 = vmatpush1.bf16.msra.mxu0 %v8359_v58  ;;  %v4192_v58 = vld [vmem:[#allocation8 + $0x660] sm:$0xff] }
 0x261   :  { %7158 = vmatpush1.bf16.msra.mxu1 %v8487_v53  ;;  %7118 = vmatprep.subr.bf16.mxu0 %v8480_v54  ;;  %v8439_v53 = vcombine.low %v4068_v46, %v4072_v40  ;;  %v8567_v54 = vcombine.low %v4196_v42, %v4200_v17  ;;  %v8560_v59 = vcombine.high %v4188_v52, %v4192_v58  ;;  %v4300_v2 = vld [vmem:[#allocation8 + $0x9c0] sm:$0xff]  ;;  %v3898_v40 = vsub.s32 5, %v9201_v7 }
 0x262   :  { %7159 = vmatprep.subr.bf16.mxu1 %v8608_v55  ;;  %v8432_v55 = vcombine.high %v4060_v51, %v4064_v39  ;;  %v4304_v20 = vld [vmem:[#allocation8 + $0x9e0] sm:$0xff] }
 0x263   :  { %v8672_v8 = vcombine.high %v4300_v2, %v4304_v20  ;;  %v4292_v9 = vld [vmem:[#allocation8 + $0x980] sm:$0xff]  ;;  %v8671_v15 = vcombine.low %v4300_v2, %v4304_v20 }
 0x264   :  { %7119 = vmatpush2.bf16.msra.mxu0 %v8479_v62  ;;  %v4184_v62 = vld [vmem:[#allocation8 + $0x620] sm:$0xff] }
 0x265   :  { %7160 = vmatpush2.bf16.msra.mxu1 %v8607_v63  ;;  %7120 = vmatprep.subr.bf16.mxu0 %v8472_v21  ;;  %v8431_v63 = vcombine.low %v4060_v51, %v4064_v39  ;;  %v8559_v21 = vcombine.low %v4188_v52, %v4192_v58  ;;  %v8901_v1 = vpop.eup %8900  ;;  %v8552_v30 = vcombine.high %v4180_v60, %v4184_v62  ;;  %v4296_v10 = vld [vmem:[#allocation8 + $0x9a0] sm:$0xff] }
 0x266   :  { %7161 = vmatprep.subr.bf16.mxu1 %v8600_v16  ;;  %v8424_v16 = vcombine.high %v4052_v56, %v4056_v57  ;;  %v3972_v26 = vmul.f32 %v8901_v1, %v9243_v41  ;;  %v8664_v22 = vcombine.high %v4292_v9, %v4296_v10  ;;  %v4284_v41 = vld [vmem:[#allocation8 + $0x940] sm:$0xff]  ;;  %v8663_v46 = vcombine.low %v4292_v9, %v4296_v10 }
 0x267   :  { %v4288_v29 = vld [vmem:[#allocation8 + $0x960] sm:$0xff] }
 0x268   :  { %7121 = vmatpush2.bf16.msra.mxu0 %v8471_v3  ;;  %v8903_v3 = vpop.eup %8902  ;;  %v4276_v51 = vld [vmem:[#allocation8 + $0x900] sm:$0xff] }
 0x269   :  { %7162 = vmatpush2.bf16.msra.mxu1 %v8599_v4  ;;  %7122 = vmatprep.subr.bf16.mxu0 %v8464_v5  ;;  %v4428_v4 = vld [vmem:[#allocation8 + $0xdc0] sm:$0xff]  ;;  %v3974_v28 = vmul.f32 %v8903_v3, %v9246_v19 }
 0x26a   :  { %7163 = vmatprep.subr.bf16.mxu1 %v8592_v23  ;;  %v4432_v5 = vld [vmem:[#allocation8 + $0xde0] sm:$0xff]  ;;  %v8551_v23 = vcombine.low %v4180_v60, %v4184_v62 }
 0x26b   :  { %v8799_v24 = vcombine.low %v4428_v4, %v4432_v5  ;;  %v9254_v27 = vpack.c.bf16 %v3974_v28, %v3974_v28  ;;  %v4280_v39 = vld [vmem:[#allocation8 + $0x920] sm:$0xff] }
 0x26c   :  { %7123 = vmatpush2.bf16.msra.mxu0 %v8463_v11  ;;  %v8800_v11 = vcombine.high %v4428_v4, %v4432_v5  ;;  %v4404_v52 = vld [vmem:[#allocation8 + $0xd00] sm:$0xff]  ;;  %v8648_v60 = vcombine.high %v4276_v51, %v4280_v39  ;;  %v8647_v20 = vcombine.low %v4276_v51, %v4280_v39 }
 0x26d   :  { %7164 = vmatpush2.bf16.msra.mxu1 %v8591_v12  ;;  %7124 = vmatprep.subr.bf16.mxu0 %v8456_v13  ;;  %v4420_v12 = vld [vmem:[#allocation8 + $0xd80] sm:$0xff] }
 0x26e   :  { %7165 = vmatprep.subr.bf16.mxu1 %v8584_v18  ;;  %v4424_v13 = vld [vmem:[#allocation8 + $0xda0] sm:$0xff]  ;;  %v9252_v18 = vpack.c.bf16 %v3972_v26, %v3972_v26 }
 0x26f   :  { %v8792_v32 = vcombine.high %v4420_v12, %v4424_v13  ;;  %v4408_v58 = vld [vmem:[#allocation8 + $0xd20] sm:$0xff] }
 0x270   :  { %7125 = vmatpush2.bf16.msra.mxu0 %v8455_v33  ;;  %v4412_v33 = vld [vmem:[#allocation8 + $0xd40] sm:$0xff]  ;;  %v8776_v1 = vcombine.high %v4404_v52, %v4408_v58 }
 0x271   :  { %7166 = vmatpush2.bf16.msra.mxu1 %v8583_v34  ;;  %7126 = vmatprep.subr.bf16.mxu0 %v8448_v35  ;;  %v4416_v34 = vld [vmem:[#allocation8 + $0xd60] sm:$0xff]  ;;  %v3597_v35 = vadd.f32 %v9233_v50, %v9230_v47 }
 0x272   :  { %7167 = vmatprep.subr.bf16.mxu1 %v8576_v37  ;;  %v8784_v47 = vcombine.high %v4412_v33, %v4416_v34  ;;  %v8783_v62 = vcombine.low %v4412_v33, %v4416_v34  ;;  %v4400_v2 = vld [vmem:[#allocation8 + $0xce0] sm:$0xff] }
 0x273   :  { %v4264_v26 = vld [vmem:[#allocation8 + $0x8a0] sm:$0xff] }
 0x274   :  { %7127 = vmatpush2.bf16.msra.mxu0 %v8447_v43  ;;  %v8656_v43 = vcombine.high %v4284_v41, %v4288_v29  ;;  %v4388_v9 = vld [vmem:[#allocation8 + $0xc80] sm:$0xff] }
 0x275   :  { %7168 = vmatpush2.bf16.msra.mxu1 %v8575_v44  ;;  %7128 = vmatprep.subr.bf16.mxu0 %v8440_v36  ;;  %v8791_v44 = vcombine.low %v4420_v12, %v4424_v13  ;;  %v4392_v10 = vld [vmem:[#allocation8 + $0xca0] sm:$0xff] }
 0x276   :  { %7169 = vmatprep.subr.bf16.mxu1 %v8568_v49  ;;  %v8759_v34 = vcombine.low %v4388_v9, %v4392_v10  ;;  %v4368_v51 = vld [vmem:[#allocation8 + $0xbe0] sm:$0xff] }
 0x278   :  { %7129 = vmatpush2.bf16.msra.mxu0 %v8439_v53 }
 0x279   :  { %7170 = vmatpush2.bf16.msra.mxu1 %v8567_v54  ;;  %7130 = vmatprep.subr.bf16.mxu0 %v8432_v55  ;;  %v8655_v55 = vcombine.low %v4284_v41, %v4288_v29  ;;  %v4380_v41 = vld [vmem:[#allocation8 + $0xc40] sm:$0xff] }
 0x27a   :  { %7171 = vmatprep.subr.bf16.mxu1 %v8560_v59  ;;  %v3894_v59 = vsub.s32 4, %v9201_v7  ;;  %v4384_v29 = vld [vmem:[#allocation8 + $0xc60] sm:$0xff] }
 0x27c   :  { %7131 = vmatpush2.bf16.msra.mxu0 %v8431_v63  ;;  %v3895_v4 = vrot.slane %v9205_v25, %v3894_v59 }
 0x27d   :  { %7172 = vmatpush2.bf16.msra.mxu1 %v8559_v21  ;;  %7132 = vmatprep.subr.bf16.mxu0 %v8424_v16  ;;  %v4268_v21 = vld [vmem:[#allocation8 + $0x8c0] sm:$0xff] }
 0x27e   :  { %7173 = vmatprep.subr.bf16.mxu1 %v8552_v30  ;;  %v4272_v16 = vld [vmem:[#allocation8 + $0x8e0] sm:$0xff] }
 0x27f   :  { %v4396_v30 = vld [vmem:[#allocation8 + $0xcc0] sm:$0xff]  ;;  %v8640_v5 = vcombine.high %v4268_v21, %v4272_v16 }
 0x280   :  { %7133 = vmatpush2.bf16.msra.mxu0 %v8423_v6  ;;  %v8775_v6 = vcombine.low %v4404_v52, %v4408_v58  ;;  %v8768_v28 = vcombine.high %v4396_v30, %v4400_v2 }
 0x281   :  { %7174 = vmatpush2.bf16.msra.mxu1 %v8551_v23  ;;  %7184 = vmatprep.subr.bf16.mxu0 %v8672_v8  ;;  %v4260_v23 = vld [vmem:[#allocation8 + $0x880] sm:$0xff] }
 0x282   :  { %7225 = vmatprep.subr.bf16.mxu1 %v8800_v11  ;;  %v8639_v11 = vcombine.low %v4268_v21, %v4272_v16  ;;  %v8632_v12 = vcombine.high %v4260_v23, %v4264_v26 }
 0x283   :  { %v3635_v19 = vpop.f32.mrf.mxu0  ;;  %7135 = vmatmul.mubr.bf16.vlgmr.msra.gmra.mxu0 %v9252_v18  ;;  %v3676_v37 = vpop.f32.mrf.mxu1 }
 0x284   :  { %7176 = vmatmul.mubr.bf16.vlgmr.msra.gmra.mxu1 %v9254_v27  ;;  %7185 = vmatpush1.bf16.msra.mxu0 %v8671_v15  ;;  %v3636_v42 = vadd.f32 %v3635_v19, %v9227_v45  ;;  %v3899_v45 = vrot.slane %v9205_v25, %v3898_v40  ;;  %v8767_v25 = vcombine.low %v4396_v30, %v4400_v2  ;;  %v4252_v15 = vld [vmem:[#allocation8 + $0x840] sm:$0xff] }
 0x285   :  { %v3637_v17 = vpop.f32.mrf.mxu0  ;;  %7186 = vmatprep.subr.bf16.mxu0 %v8664_v22  ;;  %7226 = vmatpush1.bf16.msra.mxu1 %v8799_v24  ;;  %v3678_v49 = vpop.f32.mrf.mxu1  ;;  %v4256_v22 = vld [vmem:[#allocation8 + $0x860] sm:$0xff]  ;;  %v8760_v24 = vcombine.high %v4388_v9, %v4392_v10 }
 0x286   :  { %v3638_v36 = vadd.f32 %v3637_v17, %v3597_v35  ;;  %7227 = vmatprep.subr.bf16.mxu1 %v8792_v32  ;;  %v3677_v56 = vadd.f32 %v3676_v37, %v3636_v42  ;;  %v8631_v32 = vcombine.low %v4260_v23, %v4264_v26  ;;  %v8624_v19 = vcombine.high %v4252_v15, %v4256_v22  ;;  %v4244_v35 = vld [vmem:[#allocation8 + $0x800] sm:$0xff] }
 0x287   :  { %v3639_v50 = vpop.f32.mrf.mxu0  ;;  %v3680_v54 = vpop.f32.mrf.mxu1  ;;  %v4248_v37 = vld [vmem:[#allocation8 + $0x820] sm:$0xff] }
 0x288   :  { %v3679_v53 = vadd.f32 %v3678_v49, %v3638_v36  ;;  %7187 = vmatpush1.bf16.msra.mxu0 %v8663_v46  ;;  %v9272_v13 = vadd.f32 %v3895_v4, %v3677_v56  ;;  %v8752_v46 = vcombine.high %v4380_v41, %v4384_v29  ;;  %v4372_v42 = vld [vmem:[#allocation8 + $0xc00] sm:$0xff]  ;;  %v8751_v36 = vcombine.low %v4380_v41, %v4384_v29 }
 0x289   :  { %v3640_v57 = vpop.f32.mrf.mxu0  ;;  %7188 = vmatprep.subr.bf16.mxu0 %v8656_v43  ;;  %7228 = vmatpush1.bf16.msra.mxu1 %v8791_v44  ;;  %v3681_v63 = vpop.f32.mrf.mxu1  ;;  %v4376_v17 = vld [vmem:[#allocation8 + $0xc20] sm:$0xff]  ;;  %v8623_v43 = vcombine.low %v4252_v15, %v4256_v22  ;;  %v8616_v44 = vcombine.high %v4244_v35, %v4248_v37  ;;  %v8615_v52 = vcombine.low %v4244_v35, %v4248_v37 }
 0x28a   :  { %7229 = vmatprep.subr.bf16.mxu1 %v8784_v47  ;;  %v9266_v3 = vadd.f32 %v3899_v45, %v3679_v53  ;;  %v8355_v33 = vmul.f32 -1.442695, %v9272_v13  ;;  %v4364_v49 = vld [vmem:[#allocation8 + $0xbc0] sm:$0xff]  ;;  %v8744_v39 = vcombine.high %v4372_v42, %v4376_v17  ;;  %v8743_v54 = vcombine.low %v4372_v42, %v4376_v17 }
 0x28b   :  { %v4492_v47 = vld [vmem:[#allocation8 + $0xfc0] sm:$0xff]  ;;  %v8736_v53 = vcombine.high %v4364_v49, %v4368_v51  ;;  %v8735_v63 = vcombine.low %v4364_v49, %v4368_v51 }
 0x28c   :  { %7189 = vmatpush1.bf16.msra.mxu0 %v8655_v55  ;;  %v8356_v8 = vmul.f32 -1.442695, %v9266_v3  ;;  %v4496_v50 = vld [vmem:[#allocation8 + $0xfe0] sm:$0xff] }
 0x28d   :  { %7190 = vmatprep.subr.bf16.mxu0 %v8648_v60  ;;  %7230 = vmatpush1.bf16.msra.mxu1 %v8783_v62  ;;  %v4356_v55 = vld [vmem:[#allocation8 + $0xb80] sm:$0xff]  ;;  %v8864_v57 = vcombine.high %v4492_v47, %v4496_v50  ;;  %v8863_v16 = vcombine.low %v4492_v47, %v4496_v50  ;;  %v9278_v50 = vld [vmem:[#allocation8 + $0x5c8] sm:$0xff] }
 0x28e   :  { %7231 = vmatprep.subr.bf16.mxu1 %v8776_v1  ;;  %8904 = vpow2.f32 %v8356_v8  ;;  %v4360_v45 = vld [vmem:[#allocation8 + $0xba0] sm:$0xff] }
 0x28f   :  { %8906 = vpow2.f32 %v8355_v33  ;;  %v4484_v60 = vld [vmem:[#allocation8 + $0xf80] sm:$0xff]  ;;  %v8728_v21 = vcombine.high %v4356_v55, %v4360_v45 }
 0x290   :  { %7191 = vmatpush1.bf16.msra.mxu0 %v8647_v20  ;;  %v4488_v62 = vld [vmem:[#allocation8 + $0xfa0] sm:$0xff] }
 0x291   :  { %7192 = vmatprep.subr.bf16.mxu0 %v8640_v5  ;;  %7232 = vmatpush1.bf16.msra.mxu1 %v8775_v6  ;;  %v4348_v1 = vld [vmem:[#allocation8 + $0xb40] sm:$0xff]  ;;  %v8856_v2 = vcombine.high %v4484_v60, %v4488_v62  ;;  %v8727_v5 = vcombine.low %v4356_v55, %v4360_v45  ;;  %v8855_v23 = vcombine.low %v4484_v60, %v4488_v62 }
 0x292   :  { %7233 = vmatprep.subr.bf16.mxu1 %v8768_v28  ;;  %v4352_v30 = vld [vmem:[#allocation8 + $0xb60] sm:$0xff] }
 0x293   :  { %v4476_v20 = vld [vmem:[#allocation8 + $0xf40] sm:$0xff]  ;;  %v8720_v6 = vcombine.high %v4348_v1, %v4352_v30 }
 0x294   :  { %7193 = vmatpush1.bf16.msra.mxu0 %v8639_v11  ;;  %v4480_v4 = vld [vmem:[#allocation8 + $0xf60] sm:$0xff] }
 0x295   :  { %7194 = vmatprep.subr.bf16.mxu0 %v8632_v12  ;;  %7234 = vmatpush1.bf16.msra.mxu1 %v8767_v25  ;;  %v4340_v8 = vld [vmem:[#allocation8 + $0xb00] sm:$0xff]  ;;  %v8848_v9 = vcombine.high %v4476_v20, %v4480_v4  ;;  %v8719_v12 = vcombine.low %v4348_v1, %v4352_v30  ;;  %v8847_v22 = vcombine.low %v4476_v20, %v4480_v4 }
 0x296   :  { %7235 = vmatprep.subr.bf16.mxu1 %v8760_v24  ;;  %v4344_v28 = vld [vmem:[#allocation8 + $0xb20] sm:$0xff] }
 0x297   :  { %v4468_v10 = vld [vmem:[#allocation8 + $0xf00] sm:$0xff]  ;;  %v8712_v25 = vcombine.high %v4340_v8, %v4344_v28  ;;  %v8711_v33 = vcombine.low %v4340_v8, %v4344_v28 }
 0x298   :  { %7195 = vmatpush1.bf16.msra.mxu0 %v8631_v32  ;;  %v4472_v11 = vld [vmem:[#allocation8 + $0xf20] sm:$0xff] }
 0x299   :  { %7196 = vmatprep.subr.bf16.mxu0 %v8624_v19  ;;  %7236 = vmatpush1.bf16.msra.mxu1 %v8759_v34  ;;  %v4332_v24 = vld [vmem:[#allocation8 + $0xac0] sm:$0xff]  ;;  %v8840_v29 = vcombine.high %v4468_v10, %v4472_v11  ;;  %v8839_v37 = vcombine.low %v4468_v10, %v4472_v11  ;;  %v4037_v10 = vld [vmem:[#allocation8 + $0x188] sm:$0xff] }
 0x29a   :  { %7237 = vmatprep.subr.bf16.mxu1 %v8752_v46  ;;  %v4336_v41 = vld [vmem:[#allocation8 + $0xae0] sm:$0xff]  ;;  %v4041_v11 = vld [vmem:[#allocation8 + $0x1a8] sm:$0xff] }
 0x29b   :  { %v8905_v58 = vpop.eup %8904  ;;  %v4460_v32 = vld [vmem:[#allocation8 + $0xec0] sm:$0xff]  ;;  %v8704_v35 = vcombine.high %v4332_v24, %v4336_v41  ;;  %v8703_v49 = vcombine.low %v4332_v24, %v4336_v41  ;;  %v4029_v24 = vld [vmem:[#allocation8 + $0x148] sm:$0xff] }
 0x29c   :  { %7197 = vmatpush1.bf16.msra.mxu0 %v8623_v43  ;;  %v3953_v56 = vadd.f32 1.0, %v8905_v58  ;;  %v8907_v26 = vpop.eup %8906  ;;  %v4464_v19 = vld [vmem:[#allocation8 + $0xee0] sm:$0xff]  ;;  %v4033_v41 = vld [vmem:[#allocation8 + $0x168] sm:$0xff] }
 0x29d   :  { %7198 = vmatprep.subr.bf16.mxu0 %v8616_v44  ;;  %7238 = vmatpush1.bf16.msra.mxu1 %v8751_v36  ;;  %v3952_v15 = vadd.f32 1.0, %v8907_v26  ;;  %v4324_v46 = vld [vmem:[#allocation8 + $0xa80] sm:$0xff]  ;;  %v8832_v43 = vcombine.high %v4460_v32, %v4464_v19  ;;  %v8831_v47 = vcombine.low %v4460_v32, %v4464_v19  ;;  %v8409_v32 = vcombine.low %v4037_v10, %v4041_v11 }
 0x29e   :  { %7239 = vmatprep.subr.bf16.mxu1 %v8744_v39  ;;  %8908 = vrcp.f32 %v3953_v56  ;;  %v4328_v42 = vld [vmem:[#allocation8 + $0xaa0] sm:$0xff] }
 0x29f   :  { %8910 = vrcp.f32 %v3952_v15  ;;  %v4452_v44 = vld [vmem:[#allocation8 + $0xe80] sm:$0xff]  ;;  %v8696_v39 = vcombine.high %v4324_v46, %v4328_v42  ;;  %v8695_v56 = vcombine.low %v4324_v46, %v4328_v42  ;;  %v4025_v46 = vld [vmem:[#allocation8 + $0x128] sm:$0xff] }
 0x2a0   :  { %7199 = vmatpush1.bf16.msra.mxu0 %v8615_v52  ;;  %v4456_v36 = vld [vmem:[#allocation8 + $0xea0] sm:$0xff]  ;;  %v9280_v52 = vld [vmem:[#allocation8 + $0x5e8] sm:$0xff] }
 0x2a1   :  { %7200 = vmatprep.subr.bf16.mxu0 %v8736_v53  ;;  %7240 = vmatpush1.bf16.msra.mxu1 %v8743_v54  ;;  %v4316_v58 = vld [vmem:[#allocation8 + $0xa40] sm:$0xff]  ;;  %v8824_v53 = vcombine.high %v4452_v44, %v4456_v36  ;;  %v8545_v45 = vcombine.low %v9278_v50, %v9280_v52  ;;  %v8823_v60 = vcombine.low %v4452_v44, %v4456_v36 }
 0x2a2   :  { %7241 = vmatprep.subr.bf16.mxu1 %v8864_v57  ;;  %v4444_v54 = vld [vmem:[#allocation8 + $0xe40] sm:$0xff] }
 0x2a3   :  { %v4448_v55 = vld [vmem:[#allocation8 + $0xe60] sm:$0xff] }
 0x2a4   :  { %7201 = vmatpush2.bf16.msra.mxu0 %v8735_v63  ;;  %v4308_v62 = vld [vmem:[#allocation8 + $0xa00] sm:$0xff]  ;;  %v8815_v20 = vcombine.low %v4444_v54, %v4448_v55 }
 0x2a5   :  { %7202 = vmatprep.subr.bf16.mxu0 %v8728_v21  ;;  %7242 = vmatpush2.bf16.msra.mxu1 %v8863_v16  ;;  %v4312_v63 = vld [vmem:[#allocation8 + $0xa20] sm:$0xff]  ;;  %v8816_v21 = vcombine.high %v4444_v54, %v4448_v55  ;;  %v4009_v54 = vld [vmem:[#allocation8 + $0xa8] sm:$0xff] }
 0x2a6   :  { %7243 = vmatprep.subr.bf16.mxu1 %v8856_v2  ;;  %v4436_v16 = vld [vmem:[#allocation8 + $0xe00] sm:$0xff]  ;;  %v8680_v2 = vcombine.high %v4308_v62, %v4312_v63  ;;  %v8679_v26 = vcombine.low %v4308_v62, %v4312_v63 }
 0x2a7   :  { %v4440_v1 = vld [vmem:[#allocation8 + $0xe20] sm:$0xff] }
 0x2a8   :  { %7203 = vmatpush2.bf16.msra.mxu0 %v8727_v5  ;;  %v4045_v5 = vld [vmem:[#allocation8 + $0x1c8] sm:$0xff] }
 0x2a9   :  { %7204 = vmatprep.subr.bf16.mxu0 %v8720_v6  ;;  %7244 = vmatpush2.bf16.msra.mxu1 %v8855_v23  ;;  %v4049_v6 = vld [vmem:[#allocation8 + $0x1e8] sm:$0xff]  ;;  %v8808_v23 = vcombine.high %v4436_v16, %v4440_v1 }
 0x2aa   :  { %7245 = vmatprep.subr.bf16.mxu1 %v8848_v9  ;;  %v8418_v28 = vcombine.high %v4045_v5, %v4049_v6  ;;  %v8807_v9 = vcombine.low %v4436_v16, %v4440_v1  ;;  %v3993_v16 = vld [vmem:[#allocation8 + $0x28] sm:$0xff] }
 0x2ab   :  { %v8909_v34 = vpop.eup %8908 }
 0x2ac   :  { %7205 = vmatpush2.bf16.msra.mxu0 %v8719_v12  ;;  %v3977_v17 = vmul.f32 %v8909_v34, %v9266_v3  ;;  %v4320_v3 = vld [vmem:[#allocation8 + $0xa60] sm:$0xff]  ;;  %v8911_v4 = vpop.eup %8910  ;;  %v8546_v12 = vcombine.high %v9278_v50, %v9280_v52  ;;  %v8402_v34 = vcombine.high %v4029_v24, %v4033_v41  ;;  %v4141_v52 = vld [vmem:[#allocation8 + $0x4c8] sm:$0xff] }
 0x2ad   :  { %7206 = vmatprep.subr.bf16.mxu0 %v8712_v25  ;;  %7246 = vmatpush2.bf16.msra.mxu1 %v8847_v22  ;;  %v8688_v57 = vcombine.high %v4316_v58, %v4320_v3  ;;  %v8687_v30 = vcombine.low %v4316_v58, %v4320_v3  ;;  %v3976_v8 = vmul.f32 %v8911_v4, %v9272_v13 }
 0x2ae   :  { %7247 = vmatprep.subr.bf16.mxu1 %v8840_v29  ;;  %v9276_v51 = vpack.c.bf16 %v3977_v17, %v3977_v17  ;;  %v8417_v25 = vcombine.low %v4045_v5, %v4049_v6  ;;  %v8410_v22 = vcombine.high %v4037_v10, %v4041_v11  ;;  %v4101_v6 = vld [vmem:[#allocation8 + $0x388] sm:$0xff] }
 0x2af   :  { %v9288_v15 = vpack.c.bf16 %v3976_v8, %v3976_v8 }
 0x2b0   :  { %7207 = vmatpush2.bf16.msra.mxu0 %v8711_v33  ;;  %7216 = vmatprep.mubr.bf16.mxu0 %v9276_v51 }
 0x2b1   :  { %7208 = vmatprep.subr.bf16.mxu0 %v8704_v35  ;;  %7248 = vmatpush2.bf16.msra.mxu1 %v8839_v37  ;;  %v4021_v37 = vld [vmem:[#allocation8 + $0x108] sm:$0xff] }
 0x2b2   :  { %7249 = vmatprep.subr.bf16.mxu1 %v8832_v43  ;;  %v8401_v43 = vcombine.low %v4029_v24, %v4033_v41  ;;  %v8394_v36 = vcombine.high %v4021_v37, %v4025_v46  ;;  %v8393_v58 = vcombine.low %v4021_v37, %v4025_v46  ;;  %v4077_v41 = vld [vmem:[#allocation8 + $0x2c8] sm:$0xff] }
 0x2b3   :  { %v4073_v37 = vld [vmem:[#allocation8 + $0x2a8] sm:$0xff] }
 0x2b4   :  { %7209 = vmatpush2.bf16.msra.mxu0 %v8703_v49 }
 0x2b5   :  { %7210 = vmatprep.subr.bf16.mxu0 %v8696_v39  ;;  %7250 = vmatpush2.bf16.msra.mxu1 %v8831_v47  ;;  %v4013_v39 = vld [vmem:[#allocation8 + $0xc8] sm:$0xff] }
 0x2b6   :  { %7251 = vmatprep.subr.bf16.mxu1 %v8824_v53  ;;  %v4017_v47 = vld [vmem:[#allocation8 + $0xe8] sm:$0xff] }
 0x2b7   :  { %v8386_v3 = vcombine.high %v4013_v39, %v4017_v47  ;;  %v4005_v53 = vld [vmem:[#allocation8 + $0x88] sm:$0xff]  ;;  %v8385_v55 = vcombine.low %v4013_v39, %v4017_v47 }
 0x2b8   :  { %7211 = vmatpush2.bf16.msra.mxu0 %v8695_v56  ;;  %v8378_v56 = vcombine.high %v4005_v53, %v4009_v54  ;;  %v8377_v62 = vcombine.low %v4005_v53, %v4009_v54  ;;  %v4057_v39 = vld [vmem:[#allocation8 + $0x228] sm:$0xff] }
 0x2b9   :  { %7212 = vmatprep.subr.bf16.mxu0 %v8688_v57  ;;  %7252 = vmatpush2.bf16.msra.mxu1 %v8823_v60  ;;  %v3997_v57 = vld [vmem:[#allocation8 + $0x48] sm:$0xff] }
 0x2ba   :  { %7253 = vmatprep.subr.bf16.mxu1 %v8816_v21  ;;  %v4001_v60 = vld [vmem:[#allocation8 + $0x68] sm:$0xff] }
 0x2bb   :  { %v8370_v63 = vcombine.high %v3997_v57, %v4001_v60  ;;  %v3989_v21 = vld [vmem:[#allocation8 + $0x8] sm:$0xff]  ;;  %v8369_v1 = vcombine.low %v3997_v57, %v4001_v60 }
 0x2bc   :  { %7213 = vmatpush2.bf16.msra.mxu0 %v8687_v30  ;;  %v8362_v30 = vcombine.high %v3989_v21, %v3993_v16  ;;  %v8361_v4 = vcombine.low %v3989_v21, %v3993_v16  ;;  %v4305_v53 = vld [vmem:[#allocation8 + $0x9e8] sm:$0xff]  ;;  %v3902_v16 = vsub.s32 6, %v9201_v7 }
 0x2bd   :  { %7214 = vmatprep.subr.bf16.mxu0 %v8680_v2  ;;  %7254 = vmatpush2.bf16.msra.mxu1 %v8815_v20  ;;  %v4109_v2 = vld [vmem:[#allocation8 + $0x3c8] sm:$0xff] }
 0x2be   :  { %7255 = vmatprep.subr.bf16.mxu1 %v8808_v23  ;;  %v4113_v20 = vld [vmem:[#allocation8 + $0x3e8] sm:$0xff] }
 0x2bf   :  { %v8482_v5 = vcombine.high %v4109_v2, %v4113_v20  ;;  %v4105_v23 = vld [vmem:[#allocation8 + $0x3a8] sm:$0xff] }
 0x2c0   :  { %7215 = vmatpush2.bf16.msra.mxu0 %v8679_v26  ;;  %v8481_v26 = vcombine.low %v4109_v2, %v4113_v20  ;;  %v8474_v8 = vcombine.high %v4101_v6, %v4105_v23  ;;  %v8473_v10 = vcombine.low %v4101_v6, %v4105_v23  ;;  %v4297_v57 = vld [vmem:[#allocation8 + $0x9a8] sm:$0xff] }
 0x2c1   :  { %7266 = vmatprep.subr.bf16.mxu0 %v8418_v28  ;;  %7256 = vmatpush2.bf16.msra.mxu1 %v8807_v9  ;;  %v4093_v28 = vld [vmem:[#allocation8 + $0x348] sm:$0xff] }
 0x2c2   :  { %7307 = vmatprep.subr.bf16.mxu1 %v8546_v12  ;;  %v4097_v9 = vld [vmem:[#allocation8 + $0x368] sm:$0xff] }
 0x2c3   :  { %v3717_v13 = vpop.f32.mrf.mxu0  ;;  %7217 = vmatmul.mubr.bf16.vlgmr.msra.gmra.mxu0 %v9288_v15  ;;  %v3758_v29 = vpop.f32.mrf.mxu1  ;;  %v8466_v11 = vcombine.high %v4093_v28, %v4097_v9  ;;  %v4085_v12 = vld [vmem:[#allocation8 + $0x308] sm:$0xff] }
 0x2c4   :  { %7267 = vmatpush1.bf16.msra.mxu0 %v8417_v25  ;;  %7298 = vmatprep.mubr.bf16.mxu0 %v9222_v38  ;;  %v9292_v19 = vadd.f32 %v3758_v29, %v3717_v13  ;;  %v4089_v25 = vld [vmem:[#allocation8 + $0x328] sm:$0xff] }
 0x2c5   :  { %v9294_v33 = vpop.f32.mrf.mxu0  ;;  %7268 = vmatprep.subr.bf16.mxu0 %v8410_v22  ;;  %v9296_v35 = vpop.f32.mrf.mxu1  ;;  %v8465_v22 = vcombine.low %v4093_v28, %v4097_v9  ;;  %v8458_v24 = vcombine.high %v4085_v12, %v4089_v25  ;;  %v4081_v13 = vld [vmem:[#allocation8 + $0x2e8] sm:$0xff]  ;;  %v8457_v29 = vcombine.low %v4085_v12, %v4089_v25 }
 0x2c6   :  { %v8449_v46 = vcombine.low %v4077_v41, %v4081_v13  ;;  %v4289_v21 = vld [vmem:[#allocation8 + $0x968] sm:$0xff] }
 0x2c7   :  { %v3721_v42 = vpop.f32.mrf.mxu0  ;;  %v3762_v17 = vpop.f32.mrf.mxu1  ;;  %v4277_v9 = vld [vmem:[#allocation8 + $0x908] sm:$0xff] }
 0x2c8   :  { %7269 = vmatpush1.bf16.msra.mxu0 %v8409_v32  ;;  %v8450_v32 = vcombine.high %v4077_v41, %v4081_v13  ;;  %v4061_v17 = vld [vmem:[#allocation8 + $0x248] sm:$0xff] }
 0x2c9   :  { %v3722_v44 = vpop.f32.mrf.mxu0  ;;  %7270 = vmatprep.subr.bf16.mxu0 %v8402_v34  ;;  %v3763_v49 = vpop.f32.mrf.mxu1  ;;  %v4069_v34 = vld [vmem:[#allocation8 + $0x288] sm:$0xff] }
 0x2ca   :  { %v8442_v42 = vcombine.high %v4069_v34, %v4073_v37  ;;  %v8441_v44 = vcombine.low %v4069_v34, %v4073_v37  ;;  %v4053_v49 = vld [vmem:[#allocation8 + $0x208] sm:$0xff] }
 0x2cb   :  { %v8425_v54 = vcombine.low %v4053_v49, %v4057_v39 }
 0x2cc   :  { %7271 = vmatpush1.bf16.msra.mxu0 %v8401_v43  ;;  %v4065_v43 = vld [vmem:[#allocation8 + $0x268] sm:$0xff] }
 0x2cd   :  { %7272 = vmatprep.subr.bf16.mxu0 %v8394_v36  ;;  %v8434_v36 = vcombine.high %v4061_v17, %v4065_v43  ;;  %v8433_v47 = vcombine.low %v4061_v17, %v4065_v43  ;;  %v4261_v43 = vld [vmem:[#allocation8 + $0x888] sm:$0xff] }
 0x2d0   :  { %7273 = vmatpush1.bf16.msra.mxu0 %v8393_v58  ;;  %v8426_v58 = vcombine.high %v4053_v49, %v4057_v39 }
 0x2d1   :  { %7274 = vmatprep.subr.bf16.mxu0 %v8386_v3  ;;  %v4301_v3 = vld [vmem:[#allocation8 + $0x9c8] sm:$0xff] }
 0x2d2   :  { %v8673_v60 = vcombine.low %v4301_v3, %v4305_v53 }
 0x2d4   :  { %7275 = vmatpush1.bf16.msra.mxu0 %v8385_v55  ;;  %v8674_v55 = vcombine.high %v4301_v3, %v4305_v53 }
 0x2d5   :  { %7276 = vmatprep.subr.bf16.mxu0 %v8378_v56  ;;  %v4293_v56 = vld [vmem:[#allocation8 + $0x988] sm:$0xff] }
 0x2d8   :  { %7277 = vmatpush1.bf16.msra.mxu0 %v8377_v62  ;;  %v8666_v62 = vcombine.high %v4293_v56, %v4297_v57 }
 0x2d9   :  { %7278 = vmatprep.subr.bf16.mxu0 %v8370_v63  ;;  %v4285_v63 = vld [vmem:[#allocation8 + $0x948] sm:$0xff] }
 0x2da   :  { %v8658_v23 = vcombine.high %v4285_v63, %v4289_v21  ;;  %v8657_v25 = vcombine.low %v4285_v63, %v4289_v21 }
 0x2dc   :  { %7279 = vmatpush1.bf16.msra.mxu0 %v8369_v1 }
 0x2dd   :  { %7280 = vmatprep.subr.bf16.mxu0 %v8362_v30  ;;  %v3761_v30 = vadd.f32 %v9296_v35, %v9294_v33 }
 0x2e0   :  { %7281 = vmatpush1.bf16.msra.mxu0 %v8361_v4  ;;  %v8665_v4 = vcombine.low %v4293_v56, %v4297_v57 }
 0x2e1   :  { %7282 = vmatprep.subr.bf16.mxu0 %v8482_v5  ;;  %v3906_v5 = vsub.s32 7, %v9201_v7 }
 0x2e4   :  { %7283 = vmatpush2.bf16.msra.mxu0 %v8481_v26 }
 0x2e5   :  { %7284 = vmatprep.subr.bf16.mxu0 %v8474_v8 }
 0x2e8   :  { %7285 = vmatpush2.bf16.msra.mxu0 %v8473_v10  ;;  %v4281_v10 = vld [vmem:[#allocation8 + $0x928] sm:$0xff] }
 0x2e9   :  { %7286 = vmatprep.subr.bf16.mxu0 %v8466_v11  ;;  %v8952_v11 = vld [vmem:[#allocation7] sm:$0xff]  ;;  %v8650_v41 = vcombine.high %v4277_v9, %v4281_v10  ;;  %v8649_v37 = vcombine.low %v4277_v9, %v4281_v10 }
 0x2ea   :  { %v3903_v33 = vrot.slane %v8952_v11, %v3902_v16 }
 0x2ec   :  { %7287 = vmatpush2.bf16.msra.mxu0 %v8465_v22  ;;  %v3907_v22 = vrot.slane %v8952_v11, %v3906_v5  ;;  %v4341_v11 = vld [vmem:[#allocation8 + $0xb08] sm:$0xff] }
 0x2ed   :  { %7288 = vmatprep.subr.bf16.mxu0 %v8458_v24 }
 0x2f0   :  { %7289 = vmatpush2.bf16.msra.mxu0 %v8457_v29  ;;  %v4269_v29 = vld [vmem:[#allocation8 + $0x8c8] sm:$0xff] }
 0x2f1   :  { %7290 = vmatprep.subr.bf16.mxu0 %v8450_v32  ;;  %v4273_v32 = vld [vmem:[#allocation8 + $0x8e8] sm:$0xff] }
 0x2f2   :  { %v8642_v17 = vcombine.high %v4269_v29, %v4273_v32  ;;  %v8641_v49 = vcombine.low %v4269_v29, %v4273_v32  ;;  %v4325_v32 = vld [vmem:[#allocation8 + $0xa88] sm:$0xff] }
 0x2f4   :  { %7291 = vmatpush2.bf16.msra.mxu0 %v8449_v46 }
 0x2f5   :  { %7292 = vmatprep.subr.bf16.mxu0 %v8442_v42 }
 0x2f8   :  { %7293 = vmatpush2.bf16.msra.mxu0 %v8441_v44  ;;  %v4265_v44 = vld [vmem:[#allocation8 + $0x8a8] sm:$0xff] }
 0x2f9   :  { %7294 = vmatprep.subr.bf16.mxu0 %v8434_v36  ;;  %v8634_v39 = vcombine.high %v4261_v43, %v4265_v44  ;;  %v8633_v3 = vcombine.low %v4261_v43, %v4265_v44  ;;  %v4169_v43 = vld [vmem:[#allocation8 + $0x5a8] sm:$0xff] }
 0x2fc   :  { %7295 = vmatpush2.bf16.msra.mxu0 %v8433_v47  ;;  %v4253_v47 = vld [vmem:[#allocation8 + $0x848] sm:$0xff] }
 0x2fd   :  { %7296 = vmatprep.subr.bf16.mxu0 %v8426_v58  ;;  %v4257_v58 = vld [vmem:[#allocation8 + $0x868] sm:$0xff] }
 0x2fe   :  { %v8626_v53 = vcombine.high %v4253_v47, %v4257_v58  ;;  %v8625_v56 = vcombine.low %v4253_v47, %v4257_v58  ;;  %v4317_v47 = vld [vmem:[#allocation8 + $0xa48] sm:$0xff] }
 0x2ff   :  { %v4321_v58 = vld [vmem:[#allocation8 + $0xa68] sm:$0xff] }
 0x300   :  { %7297 = vmatpush2.bf16.msra.mxu0 %v8425_v54  ;;  %v4245_v54 = vld [vmem:[#allocation8 + $0x808] sm:$0xff] }
 0x301   :  { %7348 = vmatprep.subr.bf16.mxu0 %v8674_v55  ;;  %v4249_v55 = vld [vmem:[#allocation8 + $0x828] sm:$0xff] }
 0x302   :  { %v8618_v57 = vcombine.high %v4245_v54, %v4249_v55  ;;  %v8617_v21 = vcombine.low %v4245_v54, %v4249_v55  ;;  %v8690_v55 = vcombine.high %v4317_v47, %v4321_v58 }
 0x303   :  { %v3799_v1 = vpop.f32.mrf.mxu0  ;;  %7299 = vmatmul.mubr.bf16.vlgmr.msra.gmra.mxu0 %v9252_v18  ;;  %v3840_v20 = vpop.f32.mrf.mxu1 }
 0x304   :  { %v3800_v2 = vadd.f32 %v3799_v1, %v9292_v19  ;;  %7349 = vmatpush1.bf16.msra.mxu0 %v8673_v60  ;;  %7380 = vmatprep.mubr.bf16.mxu0 %v9276_v51  ;;  %v4365_v60 = vld [vmem:[#allocation8 + $0xbc8] sm:$0xff] }
 0x305   :  { %v3801_v6 = vpop.f32.mrf.mxu0  ;;  %7350 = vmatprep.subr.bf16.mxu0 %v8666_v62  ;;  %v3842_v28 = vpop.f32.mrf.mxu1  ;;  %v4369_v62 = vld [vmem:[#allocation8 + $0xbe8] sm:$0xff] }
 0x306   :  { %v3841_v26 = vadd.f32 %v3840_v20, %v3800_v2  ;;  %v3802_v8 = vadd.f32 %v3801_v6, %v3761_v30  ;;  %v8738_v2 = vcombine.high %v4365_v60, %v4369_v62  ;;  %v4357_v20 = vld [vmem:[#allocation8 + $0xb88] sm:$0xff] }
 0x307   :  { %v3803_v19 = vpop.f32.mrf.mxu0  ;;  %v3844_v12 = vpop.f32.mrf.mxu1 }
 0x308   :  { %v3843_v35 = vadd.f32 %v3842_v28, %v3802_v8  ;;  %7351 = vmatpush1.bf16.msra.mxu0 %v8665_v4  ;;  %v9309_v34 = vadd.f32 %v3903_v33, %v3841_v26  ;;  %v4361_v4 = vld [vmem:[#allocation8 + $0xba8] sm:$0xff] }
 0x309   :  { %v3804_v24 = vpop.f32.mrf.mxu0  ;;  %7352 = vmatprep.subr.bf16.mxu0 %v8658_v23  ;;  %v3845_v13 = vpop.f32.mrf.mxu1  ;;  %v8737_v23 = vcombine.low %v4365_v60, %v4369_v62  ;;  %v8730_v26 = vcombine.high %v4357_v20, %v4361_v4  ;;  %v4349_v8 = vld [vmem:[#allocation8 + $0xb48] sm:$0xff]  ;;  %v8729_v9 = vcombine.low %v4357_v20, %v4361_v4 }
 0x30a   :  { %v9311_v46 = vadd.f32 %v3907_v22, %v3843_v35  ;;  %v8357_v42 = vmul.f32 -1.442695, %v9309_v34  ;;  %v4353_v28 = vld [vmem:[#allocation8 + $0xb68] sm:$0xff] }
 0x30b   :  { %v8722_v10 = vcombine.high %v4349_v8, %v4353_v28  ;;  %v4345_v33 = vld [vmem:[#allocation8 + $0xb28] sm:$0xff]  ;;  %v8721_v19 = vcombine.low %v4349_v8, %v4353_v28  ;;  %v4038_v28 = vld [vmem:[#allocation8 + $0x190] sm:$0xff] }
 0x30c   :  { %7353 = vmatpush1.bf16.msra.mxu0 %v8657_v25  ;;  %v8358_v36 = vmul.f32 -1.442695, %v9311_v46  ;;  %8912 = vpow2.f32 %v8357_v42  ;;  %v8714_v35 = vcombine.high %v4341_v11, %v4345_v33  ;;  %v4333_v12 = vld [vmem:[#allocation8 + $0xac8] sm:$0xff]  ;;  %v8713_v24 = vcombine.low %v4341_v11, %v4345_v33 }
 0x30d   :  { %7354 = vmatprep.subr.bf16.mxu0 %v8650_v41  ;;  %v4337_v25 = vld [vmem:[#allocation8 + $0xae8] sm:$0xff] }
 0x30e   :  { %8914 = vpow2.f32 %v8358_v36  ;;  %v8706_v13 = vcombine.high %v4333_v12, %v4337_v25  ;;  %v8705_v44 = vcombine.low %v4333_v12, %v4337_v25  ;;  %v4313_v60 = vld [vmem:[#allocation8 + $0xa28] sm:$0xff] }
 0x30f   :  { %v4149_v62 = vld [vmem:[#allocation8 + $0x508] sm:$0xff] }
 0x310   :  { %7355 = vmatpush1.bf16.msra.mxu0 %v8649_v37  ;;  %v4329_v37 = vld [vmem:[#allocation8 + $0xaa8] sm:$0xff] }
 0x311   :  { %7356 = vmatprep.subr.bf16.mxu0 %v8642_v17  ;;  %v4165_v17 = vld [vmem:[#allocation8 + $0x588] sm:$0xff] }
 0x312   :  { %v8537_v54 = vcombine.low %v4165_v17, %v4169_v43  ;;  %v4145_v20 = vld [vmem:[#allocation8 + $0x4e8] sm:$0xff] }
 0x313   :  { %v8514_v8 = vcombine.high %v4141_v52, %v4145_v20  ;;  %v4137_v11 = vld [vmem:[#allocation8 + $0x4a8] sm:$0xff]  ;;  %v8513_v12 = vcombine.low %v4141_v52, %v4145_v20 }
 0x314   :  { %7357 = vmatpush1.bf16.msra.mxu0 %v8641_v49  ;;  %v8698_v49 = vcombine.high %v4325_v32, %v4329_v37  ;;  %v4237_v52 = vld [vmem:[#allocation8 + $0x7c8] sm:$0xff] }
 0x315   :  { %7358 = vmatprep.subr.bf16.mxu0 %v8634_v39 }
 0x318   :  { %7359 = vmatpush1.bf16.msra.mxu0 %v8633_v3  ;;  %v8538_v3 = vcombine.high %v4165_v17, %v4169_v43 }
 0x319   :  { %7360 = vmatprep.subr.bf16.mxu0 %v8626_v53  ;;  %v8913_v63 = vpop.eup %8912  ;;  %v4161_v53 = vld [vmem:[#allocation8 + $0x568] sm:$0xff] }
 0x31a   :  { %v3954_v1 = vadd.f32 1.0, %v8913_v63  ;;  %v4153_v63 = vld [vmem:[#allocation8 + $0x528] sm:$0xff] }
 0x31b   :  { %v8915_v30 = vpop.eup %8914  ;;  %v8522_v50 = vcombine.high %v4149_v62, %v4153_v63 }
 0x31c   :  { %7361 = vmatpush1.bf16.msra.mxu0 %v8625_v56  ;;  %v3955_v6 = vadd.f32 1.0, %v8915_v30  ;;  %8916 = vrcp.f32 %v3954_v1  ;;  %v4309_v56 = vld [vmem:[#allocation8 + $0xa08] sm:$0xff] }
 0x31d   :  { %7362 = vmatprep.subr.bf16.mxu0 %v8618_v57  ;;  %v8682_v30 = vcombine.high %v4309_v56, %v4313_v60  ;;  %v8681_v4 = vcombine.low %v4309_v56, %v4313_v60 }
 0x31e   :  { %8918 = vrcp.f32 %v3955_v6  ;;  %v8521_v6 = vcombine.low %v4149_v62, %v4153_v63 }
 0x320   :  { %7363 = vmatpush1.bf16.msra.mxu0 %v8617_v21  ;;  %v8689_v21 = vcombine.low %v4317_v47, %v4321_v58  ;;  %v4022_v58 = vld [vmem:[#allocation8 + $0x110] sm:$0xff] }
 0x321   :  { %7364 = vmatprep.subr.bf16.mxu0 %v8738_v2  ;;  %v4050_v2 = vld [vmem:[#allocation8 + $0x1f0] sm:$0xff] }
 0x324   :  { %7365 = vmatpush2.bf16.msra.mxu0 %v8737_v23  ;;  %v4500_v23 = vld [vmem:[#allocation10] sm:$0xff] }
 0x325   :  { %7366 = vmatprep.subr.bf16.mxu0 %v8730_v26  ;;  %v4505_v33 = vrot.slane %v4500_v23, %v3878_v61  ;;  %v4509_v25 = vrot.slane %v4500_v23, %v3882_v31  ;;  %v4010_v23 = vld [vmem:[#allocation8 + $0xb0] sm:$0xff] }
 0x328   :  { %7367 = vmatpush2.bf16.msra.mxu0 %v8729_v9  ;;  %v4042_v9 = vld [vmem:[#allocation8 + $0x1b0] sm:$0xff] }
 0x329   :  { %7368 = vmatprep.subr.bf16.mxu0 %v8722_v10  ;;  %v8917_v22 = vpop.eup %8916  ;;  %v4133_v10 = vld [vmem:[#allocation8 + $0x488] sm:$0xff]  ;;  %v8411_v61 = vcombine.low %v4038_v28, %v4042_v9 }
 0x32a   :  { %v3978_v29 = vmul.f32 %v8917_v22, %v9309_v34  ;;  %v4157_v34 = vld [vmem:[#allocation8 + $0x548] sm:$0xff]  ;;  %v4030_v22 = vld [vmem:[#allocation8 + $0x150] sm:$0xff] }
 0x32b   :  { %v8919_v41 = vpop.eup %8918  ;;  %v8530_v57 = vcombine.high %v4157_v34, %v4161_v53  ;;  %v8529_v1 = vcombine.low %v4157_v34, %v4161_v53 }
 0x32c   :  { %7369 = vmatpush2.bf16.msra.mxu0 %v8721_v19  ;;  %v3979_v42 = vmul.f32 %v8919_v41, %v9311_v46  ;;  %v9319_v39 = vpack.c.bf16 %v3978_v29, %v3978_v29  ;;  %v8697_v46 = vcombine.low %v4325_v32, %v4329_v37  ;;  %v8506_v41 = vcombine.high %v4133_v10, %v4137_v11  ;;  %v4125_v29 = vld [vmem:[#allocation8 + $0x448] sm:$0xff] }
 0x32d   :  { %7370 = vmatprep.subr.bf16.mxu0 %v8714_v35  ;;  %v8412_v35 = vcombine.high %v4038_v28, %v4042_v9  ;;  %v4129_v32 = vld [vmem:[#allocation8 + $0x468] sm:$0xff] }
 0x32e   :  { %v9317_v36 = vpack.c.bf16 %v3979_v42, %v3979_v42  ;;  %v8498_v34 = vcombine.high %v4125_v29, %v4129_v32  ;;  %v8497_v63 = vcombine.low %v4125_v29, %v4129_v32  ;;  %v4233_v28 = vld [vmem:[#allocation8 + $0x7a8] sm:$0xff]  ;;  %v3994_v29 = vld [vmem:[#allocation8 + $0x30] sm:$0xff] }
 0x330   :  { %7371 = vmatpush2.bf16.msra.mxu0 %v8713_v24  ;;  %7257 = vmatprep.mubr.bf16.mxu1 %v9317_v36  ;;  %v4034_v24 = vld [vmem:[#allocation8 + $0x170] sm:$0xff] }
 0x331   :  { %7372 = vmatprep.subr.bf16.mxu0 %v8706_v13  ;;  %7258 = vmatmul.mubr.bf16.vlgmr.msra.gmra.mxu1 %v9319_v39  ;;  %v8404_v43 = vcombine.high %v4030_v22, %v4034_v24 }
 0x332   :  { %7308 = vmatpush1.bf16.msra.mxu1 %v8545_v45  ;;  %7339 = vmatprep.mubr.bf16.mxu1 %v9225_v48  ;;  %v4046_v45 = vld [vmem:[#allocation8 + $0x1d0] sm:$0xff] }
 0x333   :  { %7309 = vmatprep.subr.bf16.mxu1 %v8538_v3  ;;  %v8420_v26 = vcombine.high %v4046_v45, %v4050_v2  ;;  %v8419_v19 = vcombine.low %v4046_v45, %v4050_v2  ;;  %v4026_v3 = vld [vmem:[#allocation8 + $0x130] sm:$0xff]  ;;  %v4241_v45 = vld [vmem:[#allocation8 + $0x7e8] sm:$0xff] }
 0x334   :  { %7373 = vmatpush2.bf16.msra.mxu0 %v8705_v44  ;;  %v8505_v44 = vcombine.low %v4133_v10, %v4137_v11  ;;  %v8396_v62 = vcombine.high %v4022_v58, %v4026_v3  ;;  %v8395_v2 = vcombine.low %v4022_v58, %v4026_v3  ;;  %v8609_v11 = vcombine.low %v4237_v52, %v4241_v45  ;;  %v4205_v58 = vld [vmem:[#allocation8 + $0x6c8] sm:$0xff] }
 0x335   :  { %7374 = vmatprep.subr.bf16.mxu0 %v8698_v49  ;;  %v4209_v3 = vld [vmem:[#allocation8 + $0x6e8] sm:$0xff] }
 0x336   :  { %7310 = vmatpush1.bf16.msra.mxu1 %v8537_v54  ;;  %v4121_v54 = vld [vmem:[#allocation8 + $0x428] sm:$0xff] }
 0x337   :  { %7311 = vmatprep.subr.bf16.mxu1 %v8530_v57  ;;  %v8403_v57 = vcombine.low %v4030_v22, %v4034_v24 }
 0x338   :  { %7375 = vmatpush2.bf16.msra.mxu0 %v8697_v46  ;;  %v4117_v46 = vld [vmem:[#allocation8 + $0x408] sm:$0xff] }
 0x339   :  { %7376 = vmatprep.subr.bf16.mxu0 %v8690_v55 }
 0x33a   :  { %7312 = vmatpush1.bf16.msra.mxu1 %v8529_v1  ;;  %v4014_v1 = vld [vmem:[#allocation8 + $0xd0] sm:$0xff] }
 0x33b   :  { %7313 = vmatprep.subr.bf16.mxu1 %v8522_v50  ;;  %v8490_v50 = vcombine.high %v4117_v46, %v4121_v54 }
 0x33c   :  { %7377 = vmatpush2.bf16.msra.mxu0 %v8689_v21 }
 0x33d   :  { %7378 = vmatprep.subr.bf16.mxu0 %v8682_v30  ;;  %v4018_v30 = vld [vmem:[#allocation8 + $0xf0] sm:$0xff] }
 0x33e   :  { %7314 = vmatpush1.bf16.msra.mxu1 %v8521_v6  ;;  %v8388_v20 = vcombine.high %v4014_v1, %v4018_v30  ;;  %v4006_v6 = vld [vmem:[#allocation8 + $0x90] sm:$0xff]  ;;  %v8387_v9 = vcombine.low %v4014_v1, %v4018_v30  ;;  %v8577_v1 = vcombine.low %v4205_v58, %v4209_v3 }
 0x33f   :  { %7315 = vmatprep.subr.bf16.mxu1 %v8514_v8  ;;  %v4229_v8 = vld [vmem:[#allocation8 + $0x788] sm:$0xff]  ;;  %v8380_v10 = vcombine.high %v4006_v6, %v4010_v23  ;;  %v8379_v22 = vcombine.low %v4006_v6, %v4010_v23  ;;  %v4094_v30 = vld [vmem:[#allocation8 + $0x350] sm:$0xff] }
 0x340   :  { %7379 = vmatpush2.bf16.msra.mxu0 %v8681_v4  ;;  %v8489_v4 = vcombine.low %v4117_v46, %v4121_v54  ;;  %v4102_v54 = vld [vmem:[#allocation8 + $0x390] sm:$0xff] }
 0x341   :  { %7430 = vmatprep.subr.bf16.mxu0 %v8420_v26  ;;  %v8610_v26 = vcombine.high %v4237_v52, %v4241_v45  ;;  %v4189_v45 = vld [vmem:[#allocation8 + $0x648] sm:$0xff]  ;;  %v4086_v23 = vld [vmem:[#allocation8 + $0x310] sm:$0xff] }
 0x342   :  { %7316 = vmatpush1.bf16.msra.mxu1 %v8513_v12  ;;  %v4221_v12 = vld [vmem:[#allocation8 + $0x748] sm:$0xff] }
 0x343   :  { %v7136_v13 = vpop.f32.mrf.mxu0  ;;  %7381 = vmatmul.mubr.bf16.vlgmr.msra.gmra.mxu0 %v9288_v15  ;;  %7317 = vmatprep.subr.bf16.mxu1 %v8506_v41  ;;  %v8601_v41 = vcombine.low %v4229_v8, %v4233_v28 }
 0x344   :  { %v7137_v37 = vadd.f32 %v7136_v13, %v4505_v33  ;;  %v7177_v42 = vpop.f32.mrf.mxu1  ;;  %7431 = vmatpush1.bf16.msra.mxu0 %v8419_v19  ;;  %7462 = vmatprep.mubr.bf16.mxu0 %v9222_v38  ;;  %v3998_v33 = vld [vmem:[#allocation8 + $0x50] sm:$0xff] }
 0x345   :  { %v7138_v17 = vpop.f32.mrf.mxu0  ;;  %7432 = vmatprep.subr.bf16.mxu0 %v8412_v35  ;;  %v4002_v19 = vld [vmem:[#allocation8 + $0x70] sm:$0xff]  ;;  %v8602_v35 = vcombine.high %v4229_v8, %v4233_v28  ;;  %v4181_v28 = vld [vmem:[#allocation8 + $0x608] sm:$0xff] }
 0x346   :  { %v9333_v31 = vadd.f32 %v7177_v42, %v7137_v37  ;;  %v7139_v49 = vadd.f32 %v7138_v17, %v4509_v25  ;;  %v7179_v47 = vpop.f32.mrf.mxu1  ;;  %7318 = vmatpush1.bf16.msra.mxu1 %v8505_v44  ;;  %v4225_v25 = vld [vmem:[#allocation8 + $0x768] sm:$0xff]  ;;  %v8372_v24 = vcombine.high %v3998_v33, %v4002_v19  ;;  %v3990_v13 = vld [vmem:[#allocation8 + $0x10] sm:$0xff] }
 0x347   :  { %v7140_v53 = vpop.f32.mrf.mxu0  ;;  %7319 = vmatprep.subr.bf16.mxu1 %v8498_v34  ;;  %v8594_v32 = vcombine.high %v4221_v12, %v4225_v25  ;;  %v4213_v37 = vld [vmem:[#allocation8 + $0x708] sm:$0xff]  ;;  %v8364_v17 = vcombine.high %v3990_v13, %v3994_v29  ;;  %v4110_v44 = vld [vmem:[#allocation8 + $0x3d0] sm:$0xff]  ;;  %v8363_v34 = vcombine.low %v3990_v13, %v3994_v29 }
 0x348   :  { %v9335_v55 = vadd.f32 %v7179_v47, %v7139_v49  ;;  %v7181_v56 = vpop.f32.mrf.mxu1  ;;  %7433 = vmatpush1.bf16.msra.mxu0 %v8411_v61  ;;  %v4217_v42 = vld [vmem:[#allocation8 + $0x728] sm:$0xff]  ;;  %v8371_v61 = vcombine.low %v3998_v33, %v4002_v19  ;;  %v4114_v49 = vld [vmem:[#allocation8 + $0x3f0] sm:$0xff] }
 0x349   :  { %v7141_v60 = vpop.f32.mrf.mxu0  ;;  %7434 = vmatprep.subr.bf16.mxu0 %v8404_v43  ;;  %v8593_v43 = vcombine.low %v4221_v12, %v4225_v25  ;;  %v8586_v47 = vcombine.high %v4213_v37, %v4217_v42  ;;  %v8484_v53 = vcombine.high %v4110_v44, %v4114_v49  ;;  %v8585_v46 = vcombine.low %v4213_v37, %v4217_v42  ;;  %v4106_v56 = vld [vmem:[#allocation8 + $0x3b0] sm:$0xff]  ;;  %v4429_v25 = vld [vmem:[#allocation8 + $0xdc8] sm:$0xff] }
 0x34a   :  { %v7182_v21 = vpop.f32.mrf.mxu1  ;;  %7320 = vmatpush1.bf16.msra.mxu1 %v8497_v63  ;;  %v4197_v60 = vld [vmem:[#allocation8 + $0x688] sm:$0xff]  ;;  %v8483_v63 = vcombine.low %v4110_v44, %v4114_v49  ;;  %v4078_v19 = vld [vmem:[#allocation8 + $0x2d0] sm:$0xff] }
 0x34b   :  { %7321 = vmatprep.subr.bf16.mxu1 %v8490_v50  ;;  %v8476_v21 = vcombine.high %v4102_v54, %v4106_v56  ;;  %v4098_v50 = vld [vmem:[#allocation8 + $0x370] sm:$0xff]  ;;  %v4421_v42 = vld [vmem:[#allocation8 + $0xd88] sm:$0xff] }
 0x34c   :  { %7435 = vmatpush1.bf16.msra.mxu0 %v8403_v57  ;;  %v8578_v57 = vcombine.high %v4205_v58, %v4209_v3  ;;  %v4070_v29 = vld [vmem:[#allocation8 + $0x290] sm:$0xff]  ;;  %v4413_v3 = vld [vmem:[#allocation8 + $0xd48] sm:$0xff] }
 0x34d   :  { %7436 = vmatprep.subr.bf16.mxu0 %v8396_v62  ;;  %v4201_v62 = vld [vmem:[#allocation8 + $0x6a8] sm:$0xff]  ;;  %v4062_v49 = vld [vmem:[#allocation8 + $0x250] sm:$0xff] }
 0x34e   :  { %7322 = vmatpush1.bf16.msra.mxu1 %v8489_v4  ;;  %v8570_v52 = vcombine.high %v4197_v60, %v4201_v62  ;;  %v8468_v4 = vcombine.high %v4094_v30, %v4098_v50  ;;  %v8569_v6 = vcombine.low %v4197_v60, %v4201_v62  ;;  %v4405_v62 = vld [vmem:[#allocation8 + $0xd08] sm:$0xff] }
 0x34f   :  { %7323 = vmatprep.subr.bf16.mxu1 %v8610_v26  ;;  %v4090_v26 = vld [vmem:[#allocation8 + $0x330] sm:$0xff] }
 0x350   :  { %7437 = vmatpush1.bf16.msra.mxu0 %v8395_v2  ;;  %v4193_v2 = vld [vmem:[#allocation8 + $0x668] sm:$0xff] }
 0x351   :  { %7438 = vmatprep.subr.bf16.mxu0 %v8388_v20  ;;  %v8475_v20 = vcombine.low %v4102_v54, %v4106_v56  ;;  %v8562_v8 = vcombine.high %v4189_v45, %v4193_v2  ;;  %v8561_v33 = vcombine.low %v4189_v45, %v4193_v2  ;;  %v4054_v56 = vld [vmem:[#allocation8 + $0x210] sm:$0xff]  ;;  %v4397_v2 = vld [vmem:[#allocation8 + $0xcc8] sm:$0xff] }
 0x352   :  { %7324 = vmatpush2.bf16.msra.mxu1 %v8609_v11  ;;  %v8460_v11 = vcombine.high %v4086_v23, %v4090_v26 }
 0x353   :  { %7325 = vmatprep.subr.bf16.mxu1 %v8602_v35  ;;  %v4082_v35 = vld [vmem:[#allocation8 + $0x2f0] sm:$0xff] }
 0x354   :  { %7439 = vmatpush1.bf16.msra.mxu0 %v8387_v9  ;;  %v4185_v9 = vld [vmem:[#allocation8 + $0x628] sm:$0xff] }
 0x355   :  { %7440 = vmatprep.subr.bf16.mxu0 %v8380_v10  ;;  %v8467_v10 = vcombine.low %v4094_v30, %v4098_v50  ;;  %v8554_v12 = vcombine.high %v4181_v28, %v4185_v9  ;;  %v8553_v13 = vcombine.low %v4181_v28, %v4185_v9  ;;  %v4302_v50 = vld [vmem:[#allocation8 + $0x9d0] sm:$0xff]  ;;  %v4389_v9 = vld [vmem:[#allocation8 + $0xc88] sm:$0xff] }
 0x356   :  { %7326 = vmatpush2.bf16.msra.mxu1 %v8601_v41  ;;  %v8452_v41 = vcombine.high %v4078_v19, %v4082_v35 }
 0x357   :  { %7327 = vmatprep.subr.bf16.mxu1 %v8594_v32  ;;  %v4074_v32 = vld [vmem:[#allocation8 + $0x2b0] sm:$0xff] }
 0x358   :  { %7441 = vmatpush1.bf16.msra.mxu0 %v8379_v22  ;;  %v4433_v22 = vld [vmem:[#allocation8 + $0xde8] sm:$0xff] }
 0x359   :  { %7442 = vmatprep.subr.bf16.mxu0 %v8372_v24  ;;  %v8459_v24 = vcombine.low %v4086_v23, %v4090_v26  ;;  %v8802_v37 = vcombine.high %v4429_v25, %v4433_v22  ;;  %v8801_v44 = vcombine.low %v4429_v25, %v4433_v22  ;;  %v4294_v26 = vld [vmem:[#allocation8 + $0x990] sm:$0xff] }
 0x35a   :  { %7328 = vmatpush2.bf16.msra.mxu1 %v8593_v43  ;;  %v8444_v43 = vcombine.high %v4070_v29, %v4074_v32 }
 0x35b   :  { %7329 = vmatprep.subr.bf16.mxu1 %v8586_v47  ;;  %v4066_v47 = vld [vmem:[#allocation8 + $0x270] sm:$0xff] }
 0x35c   :  { %7443 = vmatpush1.bf16.msra.mxu0 %v8371_v61  ;;  %v4425_v61 = vld [vmem:[#allocation8 + $0xda8] sm:$0xff] }
 0x35d   :  { %7444 = vmatprep.subr.bf16.mxu0 %v8364_v17  ;;  %v8451_v17 = vcombine.low %v4078_v19, %v4082_v35  ;;  %v8794_v58 = vcombine.high %v4421_v42, %v4425_v61  ;;  %v8793_v54 = vcombine.low %v4421_v42, %v4425_v61  ;;  %v4286_v35 = vld [vmem:[#allocation8 + $0x950] sm:$0xff] }
 0x35e   :  { %7330 = vmatpush2.bf16.msra.mxu1 %v8585_v46  ;;  %v8436_v46 = vcombine.high %v4062_v49, %v4066_v47 }
 0x35f   :  { %7331 = vmatprep.subr.bf16.mxu1 %v8578_v57  ;;  %v4058_v57 = vld [vmem:[#allocation8 + $0x230] sm:$0xff] }
 0x360   :  { %7445 = vmatpush1.bf16.msra.mxu0 %v8363_v34  ;;  %v4417_v34 = vld [vmem:[#allocation8 + $0xd68] sm:$0xff] }
 0x361   :  { %7446 = vmatprep.subr.bf16.mxu0 %v8484_v53  ;;  %v8443_v53 = vcombine.low %v4070_v29, %v4074_v32  ;;  %v8786_v60 = vcombine.high %v4413_v3, %v4417_v34  ;;  %v8785_v30 = vcombine.low %v4413_v3, %v4417_v34 }
 0x362   :  { %7332 = vmatpush2.bf16.msra.mxu1 %v8577_v1  ;;  %v8428_v1 = vcombine.high %v4054_v56, %v4058_v57 }
 0x363   :  { %7333 = vmatprep.subr.bf16.mxu1 %v8570_v52  ;;  %v4306_v52 = vld [vmem:[#allocation8 + $0x9f0] sm:$0xff] }
 0x364   :  { %7447 = vmatpush2.bf16.msra.mxu0 %v8483_v63  ;;  %v4409_v63 = vld [vmem:[#allocation8 + $0xd28] sm:$0xff] }
 0x365   :  { %7448 = vmatprep.subr.bf16.mxu0 %v8476_v21  ;;  %v8435_v21 = vcombine.low %v4062_v49, %v4066_v47  ;;  %v8778_v45 = vcombine.high %v4405_v62, %v4409_v63  ;;  %v8777_v23 = vcombine.low %v4405_v62, %v4409_v63  ;;  %v4373_v47 = vld [vmem:[#allocation8 + $0xc08] sm:$0xff] }
 0x366   :  { %7334 = vmatpush2.bf16.msra.mxu1 %v8569_v6  ;;  %v8676_v6 = vcombine.high %v4302_v50, %v4306_v52 }
 0x367   :  { %7335 = vmatprep.subr.bf16.mxu1 %v8562_v8  ;;  %v4298_v8 = vld [vmem:[#allocation8 + $0x9b0] sm:$0xff] }
 0x368   :  { %7449 = vmatpush2.bf16.msra.mxu0 %v8475_v20  ;;  %v4401_v20 = vld [vmem:[#allocation8 + $0xce8] sm:$0xff]  ;;  %v8667_v29 = vcombine.low %v4294_v26, %v4298_v8 }
 0x369   :  { %7450 = vmatprep.subr.bf16.mxu0 %v8468_v4  ;;  %v8427_v4 = vcombine.low %v4054_v56, %v4058_v57  ;;  %v8770_v28 = vcombine.high %v4397_v2, %v4401_v20  ;;  %v8769_v19 = vcombine.low %v4397_v2, %v4401_v20  ;;  %v4497_v57 = vld [vmem:[#allocation8 + $0xfe8] sm:$0xff] }
 0x36a   :  { %7336 = vmatpush2.bf16.msra.mxu1 %v8561_v33  ;;  %v8668_v33 = vcombine.high %v4294_v26, %v4298_v8  ;;  %v4477_v26 = vld [vmem:[#allocation8 + $0xf48] sm:$0xff] }
 0x36b   :  { %7337 = vmatprep.subr.bf16.mxu1 %v8554_v12  ;;  %v4290_v12 = vld [vmem:[#allocation8 + $0x970] sm:$0xff]  ;;  %v4481_v8 = vld [vmem:[#allocation8 + $0xf68] sm:$0xff] }
 0x36c   :  { %7451 = vmatpush2.bf16.msra.mxu0 %v8467_v10  ;;  %v4393_v10 = vld [vmem:[#allocation8 + $0xca8] sm:$0xff] }
 0x36d   :  { %7452 = vmatprep.subr.bf16.mxu0 %v8460_v11  ;;  %v8675_v11 = vcombine.low %v4302_v50, %v4306_v52  ;;  %v8762_v25 = vcombine.high %v4389_v9, %v4393_v10  ;;  %v8761_v42 = vcombine.low %v4389_v9, %v4393_v10  ;;  %v4485_v50 = vld [vmem:[#allocation8 + $0xf88] sm:$0xff] }
 0x36e   :  { %7338 = vmatpush2.bf16.msra.mxu1 %v8553_v13  ;;  %v4489_v52 = vld [vmem:[#allocation8 + $0xfa8] sm:$0xff] }
 0x36f   :  { %7389 = vmatprep.subr.bf16.mxu1 %v8802_v37  ;;  %v8660_v37 = vcombine.high %v4286_v35, %v4290_v12  ;;  %v8857_v10 = vcombine.low %v4485_v50, %v4489_v52 }
 0x370   :  { %7453 = vmatpush2.bf16.msra.mxu0 %v8459_v24  ;;  %v4381_v24 = vld [vmem:[#allocation8 + $0xc48] sm:$0xff] }
 0x371   :  { %7454 = vmatprep.subr.bf16.mxu0 %v8452_v41  ;;  %7340 = vmatmul.mubr.bf16.vlgmr.msra.gmra.mxu1 %v9254_v27  ;;  %v4385_v41 = vld [vmem:[#allocation8 + $0xc68] sm:$0xff] }
 0x372   :  { %7390 = vmatpush1.bf16.msra.mxu1 %v8801_v44  ;;  %7421 = vmatprep.mubr.bf16.mxu1 %v9317_v36  ;;  %v8754_v44 = vcombine.high %v4381_v24, %v4385_v41 }
 0x373   :  { %7391 = vmatprep.subr.bf16.mxu1 %v8794_v58  ;;  %v8659_v58 = vcombine.low %v4286_v35, %v4290_v12  ;;  %v4469_v35 = vld [vmem:[#allocation8 + $0xf08] sm:$0xff] }
 0x374   :  { %7455 = vmatpush2.bf16.msra.mxu0 %v8451_v17  ;;  %v4278_v17 = vld [vmem:[#allocation8 + $0x910] sm:$0xff]  ;;  %v4473_v12 = vld [vmem:[#allocation8 + $0xf28] sm:$0xff] }
 0x375   :  { %7456 = vmatprep.subr.bf16.mxu0 %v8444_v43  ;;  %v4282_v43 = vld [vmem:[#allocation8 + $0x930] sm:$0xff] }
 0x376   :  { %7392 = vmatpush1.bf16.msra.mxu1 %v8793_v54  ;;  %v8652_v34 = vcombine.high %v4278_v17, %v4282_v43  ;;  %v4274_v54 = vld [vmem:[#allocation8 + $0x8f0] sm:$0xff] }
 0x377   :  { %7393 = vmatprep.subr.bf16.mxu1 %v8786_v60  ;;  %v8651_v60 = vcombine.low %v4278_v17, %v4282_v43 }
 0x378   :  { %7457 = vmatpush2.bf16.msra.mxu0 %v8443_v53  ;;  %v8753_v53 = vcombine.low %v4381_v24, %v4385_v41  ;;  %v8849_v24 = vcombine.low %v4477_v26, %v4481_v8  ;;  %v4366_v41 = vld [vmem:[#allocation8 + $0xbd0] sm:$0xff] }
 0x379   :  { %7458 = vmatprep.subr.bf16.mxu0 %v8436_v46  ;;  %v4270_v46 = vld [vmem:[#allocation8 + $0x8d0] sm:$0xff] }
 0x37a   :  { %7394 = vmatpush1.bf16.msra.mxu1 %v8785_v30  ;;  %v8644_v62 = vcombine.high %v4270_v46, %v4274_v54 }
 0x37b   :  { %7395 = vmatprep.subr.bf16.mxu1 %v8778_v45  ;;  %v8643_v45 = vcombine.low %v4270_v46, %v4274_v54  ;;  %v4350_v54 = vld [vmem:[#allocation8 + $0xb50] sm:$0xff] }
 0x37c   :  { %7459 = vmatpush2.bf16.msra.mxu0 %v8435_v21  ;;  %v4262_v21 = vld [vmem:[#allocation8 + $0x890] sm:$0xff] }
 0x37d   :  { %7460 = vmatprep.subr.bf16.mxu0 %v8428_v1  ;;  %v4266_v1 = vld [vmem:[#allocation8 + $0x8b0] sm:$0xff] }
 0x37e   :  { %7396 = vmatpush1.bf16.msra.mxu1 %v8777_v23  ;;  %v8636_v2 = vcombine.high %v4262_v21, %v4266_v1  ;;  %v8858_v23 = vcombine.high %v4485_v50, %v4489_v52  ;;  %v4437_v52 = vld [vmem:[#allocation8 + $0xe08] sm:$0xff] }
 0x37f   :  { %7397 = vmatprep.subr.bf16.mxu1 %v8770_v28  ;;  %v8635_v28 = vcombine.low %v4262_v21, %v4266_v1  ;;  %v4342_v1 = vld [vmem:[#allocation8 + $0xb10] sm:$0xff] }
 0x380   :  { %7461 = vmatpush2.bf16.msra.mxu0 %v8427_v4  ;;  %v4254_v4 = vld [vmem:[#allocation8 + $0x850] sm:$0xff] }
 0x381   :  { %7512 = vmatprep.subr.bf16.mxu0 %v8676_v6  ;;  %v4258_v6 = vld [vmem:[#allocation8 + $0x870] sm:$0xff] }
 0x382   :  { %7398 = vmatpush1.bf16.msra.mxu1 %v8769_v19  ;;  %v8628_v9 = vcombine.high %v4254_v4, %v4258_v6  ;;  %v8850_v19 = vcombine.high %v4477_v26, %v4481_v8  ;;  %v4174_v8 = vld [vmem:[#allocation8 + $0x5d0] sm:$0xff] }
 0x383   :  { %v7218_v22 = vpop.f32.mrf.mxu0  ;;  %7463 = vmatmul.mubr.bf16.vlgmr.msra.gmra.mxu0 %v9252_v18  ;;  %7399 = vmatprep.subr.bf16.mxu1 %v8762_v25  ;;  %v8627_v25 = vcombine.low %v4254_v4, %v4258_v6  ;;  %v4334_v6 = vld [vmem:[#allocation8 + $0xad0] sm:$0xff] }
 0x384   :  { %v9341_v13 = vadd.f32 %v7218_v22, %v9333_v31  ;;  %7513 = vmatpush1.bf16.msra.mxu0 %v8675_v11  ;;  %7544 = vmatprep.mubr.bf16.mxu0 %v9276_v51  ;;  %v4377_v31 = vld [vmem:[#allocation8 + $0xc28] sm:$0xff]  ;;  %v4246_v11 = vld [vmem:[#allocation8 + $0x810] sm:$0xff] }
 0x385   :  { %v7220_v32 = vpop.f32.mrf.mxu0  ;;  %7514 = vmatprep.subr.bf16.mxu0 %v8668_v33  ;;  %v8746_v56 = vcombine.high %v4373_v47, %v4377_v31  ;;  %v8745_v63 = vcombine.low %v4373_v47, %v4377_v31  ;;  %v4250_v33 = vld [vmem:[#allocation8 + $0x830] sm:$0xff] }
 0x386   :  { %v9345_v61 = vadd.f32 %v7220_v32, %v9335_v55  ;;  %7400 = vmatpush1.bf16.msra.mxu1 %v8761_v42  ;;  %v4493_v55 = vld [vmem:[#allocation8 + $0xfc8] sm:$0xff]  ;;  %v8620_v22 = vcombine.high %v4246_v11, %v4250_v33  ;;  %v8842_v32 = vcombine.high %v4469_v35, %v4473_v12  ;;  %v8619_v17 = vcombine.low %v4246_v11, %v4250_v33  ;;  %v4362_v47 = vld [vmem:[#allocation8 + $0xbb0] sm:$0xff] }
 0x387   :  { %v7222_v49 = vpop.f32.mrf.mxu0  ;;  %7401 = vmatprep.subr.bf16.mxu1 %v8754_v44  ;;  %v8866_v30 = vcombine.high %v4493_v55, %v4497_v57  ;;  %v8865_v20 = vcombine.low %v4493_v55, %v4497_v57  ;;  %v4465_v42 = vld [vmem:[#allocation8 + $0xee8] sm:$0xff]  ;;  %v8841_v44 = vcombine.low %v4469_v35, %v4473_v12  ;;  %v4326_v33 = vld [vmem:[#allocation8 + $0xa90] sm:$0xff] }
 0x388   :  { %7515 = vmatpush1.bf16.msra.mxu0 %v8667_v29  ;;  %v4370_v29 = vld [vmem:[#allocation8 + $0xbf0] sm:$0xff]  ;;  %v4445_v57 = vld [vmem:[#allocation8 + $0xe48] sm:$0xff] }
 0x389   :  { %v7223_v3 = vpop.f32.mrf.mxu0  ;;  %7516 = vmatprep.subr.bf16.mxu0 %v8660_v37  ;;  %v4461_v37 = vld [vmem:[#allocation8 + $0xec8] sm:$0xff]  ;;  %v8740_v43 = vcombine.high %v4366_v41, %v4370_v29  ;;  %v4358_v49 = vld [vmem:[#allocation8 + $0xb90] sm:$0xff] }
 0x38a   :  { %7402 = vmatpush1.bf16.msra.mxu1 %v8753_v53  ;;  %v8834_v31 = vcombine.high %v4461_v37, %v4465_v42  ;;  %v4457_v3 = vld [vmem:[#allocation8 + $0xea8] sm:$0xff]  ;;  %v8732_v53 = vcombine.high %v4358_v49, %v4362_v47  ;;  %v8833_v46 = vcombine.low %v4461_v37, %v4465_v42  ;;  %v4166_v12 = vld [vmem:[#allocation8 + $0x590] sm:$0xff] }
 0x38b   :  { %7403 = vmatprep.subr.bf16.mxu1 %v8746_v56  ;;  %v4354_v56 = vld [vmem:[#allocation8 + $0xb70] sm:$0xff] }
 0x38c   :  { %7517 = vmatpush1.bf16.msra.mxu0 %v8659_v58  ;;  %v4453_v58 = vld [vmem:[#allocation8 + $0xe88] sm:$0xff]  ;;  %v4158_v42 = vld [vmem:[#allocation8 + $0x550] sm:$0xff] }
 0x38d   :  { %7518 = vmatprep.subr.bf16.mxu0 %v8652_v34  ;;  %v8739_v34 = vcombine.low %v4366_v41, %v4370_v29  ;;  %v8826_v55 = vcombine.high %v4453_v58, %v4457_v3  ;;  %v8825_v21 = vcombine.low %v4453_v58, %v4457_v3  ;;  %v4318_v29 = vld [vmem:[#allocation8 + $0xa50] sm:$0xff] }
 0x38e   :  { %7404 = vmatpush1.bf16.msra.mxu1 %v8745_v63  ;;  %v8724_v63 = vcombine.high %v4350_v54, %v4354_v56  ;;  %v4150_v3 = vld [vmem:[#allocation8 + $0x510] sm:$0xff] }
 0x38f   :  { %7405 = vmatprep.subr.bf16.mxu1 %v8866_v30  ;;  %v4346_v30 = vld [vmem:[#allocation8 + $0xb30] sm:$0xff] }
 0x390   :  { %7519 = vmatpush1.bf16.msra.mxu0 %v8651_v60  ;;  %v4449_v60 = vld [vmem:[#allocation8 + $0xe68] sm:$0xff] }
 0x391   :  { %7520 = vmatprep.subr.bf16.mxu0 %v8644_v62  ;;  %v8731_v62 = vcombine.low %v4358_v49, %v4362_v47  ;;  %v8818_v50 = vcombine.high %v4445_v57, %v4449_v60  ;;  %v8817_v4 = vcombine.low %v4445_v57, %v4449_v60  ;;  %v4310_v47 = vld [vmem:[#allocation8 + $0xa10] sm:$0xff] }
 0x392   :  { %7406 = vmatpush2.bf16.msra.mxu1 %v8865_v20  ;;  %v8716_v20 = vcombine.high %v4342_v1, %v4346_v30  ;;  %v4142_v60 = vld [vmem:[#allocation8 + $0x4d0] sm:$0xff] }
 0x393   :  { %7407 = vmatprep.subr.bf16.mxu1 %v8858_v23  ;;  %v4338_v23 = vld [vmem:[#allocation8 + $0xaf0] sm:$0xff] }
 0x394   :  { %7521 = vmatpush1.bf16.msra.mxu0 %v8643_v45  ;;  %v4441_v45 = vld [vmem:[#allocation8 + $0xe28] sm:$0xff] }
 0x395   :  { %7522 = vmatprep.subr.bf16.mxu0 %v8636_v2  ;;  %v8723_v2 = vcombine.low %v4350_v54, %v4354_v56  ;;  %v8810_v26 = vcombine.high %v4437_v52, %v4441_v45  ;;  %v8809_v11 = vcombine.low %v4437_v52, %v4441_v45  ;;  %v4047_v56 = vld [vmem:[#allocation8 + $0x1d8] sm:$0xff]  ;;  %v4134_v45 = vld [vmem:[#allocation8 + $0x490] sm:$0xff] }
 0x396   :  { %7408 = vmatpush2.bf16.msra.mxu1 %v8857_v10  ;;  %v8708_v10 = vcombine.high %v4334_v6, %v4338_v23 }
 0x397   :  { %7409 = vmatprep.subr.bf16.mxu1 %v8850_v19  ;;  %v4330_v19 = vld [vmem:[#allocation8 + $0xab0] sm:$0xff] }
 0x398   :  { %7523 = vmatpush1.bf16.msra.mxu0 %v8635_v28  ;;  %v4178_v28 = vld [vmem:[#allocation8 + $0x5f0] sm:$0xff] }
 0x399   :  { %7524 = vmatprep.subr.bf16.mxu0 %v8628_v9  ;;  %v8715_v9 = vcombine.low %v4342_v1, %v4346_v30  ;;  %v8548_v35 = vcombine.high %v4174_v8, %v4178_v28  ;;  %v8547_v41 = vcombine.low %v4174_v8, %v4178_v28  ;;  %v4039_v30 = vld [vmem:[#allocation8 + $0x198] sm:$0xff] }
 0x39a   :  { %7410 = vmatpush2.bf16.msra.mxu1 %v8849_v24  ;;  %v8700_v24 = vcombine.high %v4326_v33, %v4330_v19 }
 0x39b   :  { %7411 = vmatprep.subr.bf16.mxu1 %v8842_v32  ;;  %v4322_v32 = vld [vmem:[#allocation8 + $0xa70] sm:$0xff] }
 0x39c   :  { %7525 = vmatpush1.bf16.msra.mxu0 %v8627_v25  ;;  %v4170_v25 = vld [vmem:[#allocation8 + $0x5b0] sm:$0xff] }
 0x39d   :  { %7526 = vmatprep.subr.bf16.mxu0 %v8620_v22  ;;  %v8707_v22 = vcombine.low %v4334_v6, %v4338_v23  ;;  %v8540_v37 = vcombine.high %v4166_v12, %v4170_v25  ;;  %v8539_v49 = vcombine.low %v4166_v12, %v4170_v25  ;;  %v4031_v23 = vld [vmem:[#allocation8 + $0x158] sm:$0xff] }
 0x39e   :  { %7412 = vmatpush2.bf16.msra.mxu1 %v8841_v44  ;;  %v8692_v44 = vcombine.high %v4318_v29, %v4322_v32  ;;  %v4023_v12 = vld [vmem:[#allocation8 + $0x118] sm:$0xff] }
 0x39f   :  { %7413 = vmatprep.subr.bf16.mxu1 %v8834_v31  ;;  %v4314_v31 = vld [vmem:[#allocation8 + $0xa30] sm:$0xff]  ;;  %v4027_v25 = vld [vmem:[#allocation8 + $0x138] sm:$0xff] }
 0x3a0   :  { %7527 = vmatpush1.bf16.msra.mxu0 %v8619_v17  ;;  %v4162_v17 = vld [vmem:[#allocation8 + $0x570] sm:$0xff] }
 0x3a1   :  { %7528 = vmatprep.subr.bf16.mxu0 %v8740_v43  ;;  %v8699_v43 = vcombine.low %v4326_v33, %v4330_v19  ;;  %v8532_v58 = vcombine.high %v4158_v42, %v4162_v17  ;;  %v8531_v54 = vcombine.low %v4158_v42, %v4162_v17  ;;  %v4015_v17 = vld [vmem:[#allocation8 + $0xd8] sm:$0xff] }
 0x3a2   :  { %7414 = vmatpush2.bf16.msra.mxu1 %v8833_v46  ;;  %v8684_v46 = vcombine.high %v4310_v47, %v4314_v31 }
 0x3a3   :  { %7415 = vmatprep.subr.bf16.mxu1 %v8826_v55  ;;  %v4051_v55 = vld [vmem:[#allocation8 + $0x1f8] sm:$0xff] }
 0x3a4   :  { %7529 = vmatpush2.bf16.msra.mxu0 %v8739_v34  ;;  %v4154_v34 = vld [vmem:[#allocation8 + $0x530] sm:$0xff] }
 0x3a5   :  { %7530 = vmatprep.subr.bf16.mxu0 %v8732_v53  ;;  %v8691_v53 = vcombine.low %v4318_v29, %v4322_v32  ;;  %v8524_v57 = vcombine.high %v4150_v3, %v4154_v34  ;;  %v8523_v1 = vcombine.low %v4150_v3, %v4154_v34  ;;  %v4122_v29 = vld [vmem:[#allocation8 + $0x430] sm:$0xff]  ;;  %v4007_v34 = vld [vmem:[#allocation8 + $0x98] sm:$0xff] }
 0x3a6   :  { %7416 = vmatpush2.bf16.msra.mxu1 %v8825_v21  ;;  %v8422_v21 = vcombine.high %v4047_v56, %v4051_v55 }
 0x3a7   :  { %7417 = vmatprep.subr.bf16.mxu1 %v8818_v50  ;;  %v4043_v50 = vld [vmem:[#allocation8 + $0x1b8] sm:$0xff] }
 0x3a8   :  { %7531 = vmatpush2.bf16.msra.mxu0 %v8731_v62  ;;  %v4146_v62 = vld [vmem:[#allocation8 + $0x4f0] sm:$0xff] }
 0x3a9   :  { %7532 = vmatprep.subr.bf16.mxu0 %v8724_v63  ;;  %v8683_v63 = vcombine.low %v4310_v47, %v4314_v31  ;;  %v8516_v52 = vcombine.high %v4142_v60, %v4146_v62  ;;  %v8515_v6 = vcombine.low %v4142_v60, %v4146_v62  ;;  %v4242_v47 = vld [vmem:[#allocation8 + $0x7f0] sm:$0xff]  ;;  %v8397_v31 = vcombine.low %v4023_v12, %v4027_v25  ;;  %v3999_v62 = vld [vmem:[#allocation8 + $0x58] sm:$0xff] }
 0x3aa   :  { %7418 = vmatpush2.bf16.msra.mxu1 %v8817_v4  ;;  %v8414_v4 = vcombine.high %v4039_v30, %v4043_v50 }
 0x3ab   :  { %7419 = vmatprep.subr.bf16.mxu1 %v8810_v26  ;;  %v4035_v26 = vld [vmem:[#allocation8 + $0x178] sm:$0xff] }
 0x3ac   :  { %7533 = vmatpush2.bf16.msra.mxu0 %v8723_v2  ;;  %v4138_v2 = vld [vmem:[#allocation8 + $0x4b0] sm:$0xff]  ;;  %v8406_v19 = vcombine.high %v4031_v23, %v4035_v26  ;;  %v8405_v32 = vcombine.low %v4031_v23, %v4035_v26 }
 0x3ad   :  { %7534 = vmatprep.subr.bf16.mxu0 %v8716_v20  ;;  %v8421_v20 = vcombine.low %v4047_v56, %v4051_v55  ;;  %v8508_v8 = vcombine.high %v4134_v45, %v4138_v2  ;;  %v4234_v56 = vld [vmem:[#allocation8 + $0x7b0] sm:$0xff] }
 0x3ae   :  { %7420 = vmatpush2.bf16.msra.mxu1 %v8809_v11  ;;  %v8413_v11 = vcombine.low %v4039_v30, %v4043_v50  ;;  %v4226_v30 = vld [vmem:[#allocation8 + $0x770] sm:$0xff] }
 0x3af   :  { %7471 = vmatprep.subr.bf16.mxu1 %v8548_v35  ;;  %v8507_v35 = vcombine.low %v4134_v45, %v4138_v2  ;;  %v3991_v2 = vld [vmem:[#allocation8 + $0x18] sm:$0xff]  ;;  %v4218_v23 = vld [vmem:[#allocation8 + $0x730] sm:$0xff] }
 0x3b0   :  { %7535 = vmatpush2.bf16.msra.mxu0 %v8715_v9  ;;  %v4126_v9 = vld [vmem:[#allocation8 + $0x450] sm:$0xff] }
 0x3b1   :  { %7536 = vmatprep.subr.bf16.mxu0 %v8708_v10  ;;  %7422 = vmatmul.mubr.bf16.vlgmr.msra.gmra.mxu1 %v9319_v39  ;;  %v4130_v10 = vld [vmem:[#allocation8 + $0x470] sm:$0xff] }
 0x3b2   :  { %7472 = vmatpush1.bf16.msra.mxu1 %v8547_v41  ;;  %7503 = vmatprep.mubr.bf16.mxu1 %v9225_v48  ;;  %v4118_v41 = vld [vmem:[#allocation8 + $0x410] sm:$0xff]  ;;  %v8499_v42 = vcombine.low %v4126_v9, %v4130_v10 }
 0x3b3   :  { %7473 = vmatprep.subr.bf16.mxu1 %v8540_v37  ;;  %v8491_v3 = vcombine.low %v4118_v41, %v4122_v29 }
 0x3b4   :  { %7537 = vmatpush2.bf16.msra.mxu0 %v8707_v22  ;;  %v8500_v22 = vcombine.high %v4126_v9, %v4130_v10  ;;  %v4111_v10 = vld [vmem:[#allocation8 + $0x3d8] sm:$0xff] }
 0x3b5   :  { %7538 = vmatprep.subr.bf16.mxu0 %v8700_v24 }
 0x3b6   :  { %7474 = vmatpush1.bf16.msra.mxu1 %v8539_v49  ;;  %v4238_v49 = vld [vmem:[#allocation8 + $0x7d0] sm:$0xff] }
 0x3b7   :  { %7475 = vmatprep.subr.bf16.mxu1 %v8532_v58  ;;  %v8611_v60 = vcombine.low %v4238_v49, %v4242_v47 }
 0x3b8   :  { %7539 = vmatpush2.bf16.msra.mxu0 %v8699_v43  ;;  %v4019_v43 = vld [vmem:[#allocation8 + $0xf8] sm:$0xff] }
 0x3b9   :  { %7540 = vmatprep.subr.bf16.mxu0 %v8692_v44  ;;  %v8492_v44 = vcombine.high %v4118_v41, %v4122_v29  ;;  %v8390_v58 = vcombine.high %v4015_v17, %v4019_v43  ;;  %v8389_v55 = vcombine.low %v4015_v17, %v4019_v43  ;;  %v4103_v41 = vld [vmem:[#allocation8 + $0x398] sm:$0xff] }
 0x3ba   :  { %7476 = vmatpush1.bf16.msra.mxu1 %v8531_v54  ;;  %v4230_v54 = vld [vmem:[#allocation8 + $0x790] sm:$0xff]  ;;  %v4107_v29 = vld [vmem:[#allocation8 + $0x3b8] sm:$0xff] }
 0x3bb   :  { %7477 = vmatprep.subr.bf16.mxu1 %v8524_v57  ;;  %v8603_v45 = vcombine.low %v4230_v54, %v4234_v56  ;;  %v8478_v17 = vcombine.high %v4103_v41, %v4107_v29 }
 0x3bc   :  { %7541 = vmatpush2.bf16.msra.mxu0 %v8691_v53  ;;  %v4011_v53 = vld [vmem:[#allocation8 + $0xb8] sm:$0xff] }
 0x3bd   :  { %7542 = vmatprep.subr.bf16.mxu0 %v8684_v46  ;;  %v8612_v46 = vcombine.high %v4238_v49, %v4242_v47  ;;  %v8382_v57 = vcombine.high %v4007_v34, %v4011_v53  ;;  %v8381_v50 = vcombine.low %v4007_v34, %v4011_v53  ;;  %v4099_v49 = vld [vmem:[#allocation8 + $0x378] sm:$0xff] }
 0x3be   :  { %7478 = vmatpush1.bf16.msra.mxu1 %v8523_v1  ;;  %v4222_v1 = vld [vmem:[#allocation8 + $0x750] sm:$0xff] }
 0x3bf   :  { %7479 = vmatprep.subr.bf16.mxu1 %v8516_v52  ;;  %v8595_v9 = vcombine.low %v4222_v1, %v4226_v30 }
 0x3c0   :  { %7543 = vmatpush2.bf16.msra.mxu0 %v8683_v63  ;;  %v4003_v63 = vld [vmem:[#allocation8 + $0x78] sm:$0xff] }
 0x3c1   :  { %7594 = vmatprep.subr.bf16.mxu0 %v8422_v21  ;;  %v8604_v21 = vcombine.high %v4230_v54, %v4234_v56  ;;  %v8374_v52 = vcombine.high %v3999_v62, %v4003_v63  ;;  %v8373_v26 = vcombine.low %v3999_v62, %v4003_v63  ;;  %v4091_v54 = vld [vmem:[#allocation8 + $0x338] sm:$0xff] }
 0x3c2   :  { %7480 = vmatpush1.bf16.msra.mxu1 %v8515_v6  ;;  %v4214_v6 = vld [vmem:[#allocation8 + $0x710] sm:$0xff] }
 0x3c3   :  { %v9349_v28 = vpop.f32.mrf.mxu0  ;;  %7545 = vmatmul.mubr.bf16.vlgmr.msra.gmra.mxu0 %v9288_v15  ;;  %7481 = vmatprep.subr.bf16.mxu1 %v8508_v8 }
 0x3c4   :  { %7595 = vmatpush1.bf16.msra.mxu0 %v8421_v20  ;;  %7626 = vmatprep.mubr.bf16.mxu0 %v9222_v38  ;;  %v8398_v38 = vcombine.high %v4023_v12, %v4027_v25  ;;  %v3995_v20 = vld [vmem:[#allocation8 + $0x38] sm:$0xff]  ;;  %v4210_v12 = vld [vmem:[#allocation8 + $0x6f0] sm:$0xff] }
 0x3c5   :  { %v9353_v33 = vpop.f32.mrf.mxu0  ;;  %7596 = vmatprep.subr.bf16.mxu0 %v8414_v4  ;;  %v8596_v4 = vcombine.high %v4222_v1, %v4226_v30  ;;  %v8366_v8 = vcombine.high %v3991_v2, %v3995_v20  ;;  %v8365_v25 = vcombine.low %v3991_v2, %v3995_v20  ;;  %v4083_v1 = vld [vmem:[#allocation8 + $0x2f8] sm:$0xff] }
 0x3c6   :  { %7482 = vmatpush1.bf16.msra.mxu1 %v8507_v35  ;;  %v4206_v35 = vld [vmem:[#allocation8 + $0x6d0] sm:$0xff] }
 0x3c7   :  { %v7304_v24 = vpop.f32.mrf.mxu0  ;;  %7483 = vmatprep.subr.bf16.mxu1 %v8500_v22  ;;  %v8579_v43 = vcombine.low %v4206_v35, %v4210_v12 }
 0x3c8   :  { %7597 = vmatpush1.bf16.msra.mxu0 %v8413_v11  ;;  %v4115_v11 = vld [vmem:[#allocation8 + $0x3f8] sm:$0xff]  ;;  %v8587_v24 = vcombine.low %v4214_v6, %v4218_v23 }
 0x3c9   :  { %v7305_v37 = vpop.f32.mrf.mxu0  ;;  %7598 = vmatprep.subr.bf16.mxu0 %v8406_v19  ;;  %v8588_v19 = vcombine.high %v4214_v6, %v4218_v23  ;;  %v8486_v22 = vcombine.high %v4111_v10, %v4115_v11  ;;  %v4075_v6 = vld [vmem:[#allocation8 + $0x2b8] sm:$0xff] }
 0x3ca   :  { %7484 = vmatpush1.bf16.msra.mxu1 %v8499_v42  ;;  %v4198_v37 = vld [vmem:[#allocation8 + $0x690] sm:$0xff]  ;;  %v8485_v42 = vcombine.low %v4111_v10, %v4115_v11 }
 0x3cb   :  { %7485 = vmatprep.subr.bf16.mxu1 %v8492_v44  ;;  %v4095_v44 = vld [vmem:[#allocation8 + $0x358] sm:$0xff] }
 0x3cc   :  { %7599 = vmatpush1.bf16.msra.mxu0 %v8405_v32  ;;  %v8580_v32 = vcombine.high %v4206_v35, %v4210_v12  ;;  %v8470_v34 = vcombine.high %v4095_v44, %v4099_v49  ;;  %v4067_v35 = vld [vmem:[#allocation8 + $0x278] sm:$0xff] }
 0x3cd   :  { %7600 = vmatprep.subr.bf16.mxu0 %v8398_v38  ;;  %v4202_v38 = vld [vmem:[#allocation8 + $0x6b0] sm:$0xff] }
 0x3ce   :  { %7486 = vmatpush1.bf16.msra.mxu1 %v8491_v3  ;;  %v8572_v47 = vcombine.high %v4198_v37, %v4202_v38  ;;  %v8477_v3 = vcombine.low %v4103_v41, %v4107_v29  ;;  %v8571_v53 = vcombine.low %v4198_v37, %v4202_v38 }
 0x3cf   :  { %7487 = vmatprep.subr.bf16.mxu1 %v8612_v46  ;;  %v4087_v46 = vld [vmem:[#allocation8 + $0x318] sm:$0xff] }
 0x3d0   :  { %7601 = vmatpush1.bf16.msra.mxu0 %v8397_v31  ;;  %v4190_v31 = vld [vmem:[#allocation8 + $0x650] sm:$0xff]  ;;  %v8462_v62 = vcombine.high %v4087_v46, %v4091_v54 }
 0x3d1   :  { %7602 = vmatprep.subr.bf16.mxu0 %v8390_v58  ;;  %v4194_v58 = vld [vmem:[#allocation8 + $0x670] sm:$0xff] }
 0x3d2   :  { %7488 = vmatpush2.bf16.msra.mxu1 %v8611_v60  ;;  %v8564_v56 = vcombine.high %v4190_v31, %v4194_v58  ;;  %v8469_v60 = vcombine.low %v4095_v44, %v4099_v49  ;;  %v8563_v63 = vcombine.low %v4190_v31, %v4194_v58  ;;  %v4059_v44 = vld [vmem:[#allocation8 + $0x238] sm:$0xff]  ;;  %v4406_v31 = vld [vmem:[#allocation8 + $0xd10] sm:$0xff] }
 0x3d3   :  { %7489 = vmatprep.subr.bf16.mxu1 %v8604_v21  ;;  %v4079_v21 = vld [vmem:[#allocation8 + $0x2d8] sm:$0xff] }
 0x3d4   :  { %7603 = vmatpush1.bf16.msra.mxu0 %v8389_v55  ;;  %v4182_v55 = vld [vmem:[#allocation8 + $0x610] sm:$0xff]  ;;  %v8454_v2 = vcombine.high %v4079_v21, %v4083_v1 }
 0x3d5   :  { %7604 = vmatprep.subr.bf16.mxu0 %v8382_v57  ;;  %v4186_v57 = vld [vmem:[#allocation8 + $0x630] sm:$0xff] }
 0x3d6   :  { %7490 = vmatpush2.bf16.msra.mxu1 %v8603_v45  ;;  %v8556_v30 = vcombine.high %v4182_v55, %v4186_v57  ;;  %v8461_v45 = vcombine.low %v4087_v46, %v4091_v54  ;;  %v8555_v20 = vcombine.low %v4182_v55, %v4186_v57  ;;  %v4307_v54 = vld [vmem:[#allocation8 + $0x9f8] sm:$0xff]  ;;  %v4398_v55 = vld [vmem:[#allocation8 + $0xcd0] sm:$0xff] }
 0x3d7   :  { %7491 = vmatprep.subr.bf16.mxu1 %v8596_v4  ;;  %v4071_v4 = vld [vmem:[#allocation8 + $0x298] sm:$0xff]  ;;  %v4402_v57 = vld [vmem:[#allocation8 + $0xcf0] sm:$0xff] }
 0x3d8   :  { %7605 = vmatpush1.bf16.msra.mxu0 %v8381_v50  ;;  %v4430_v50 = vld [vmem:[#allocation8 + $0xdd0] sm:$0xff]  ;;  %v8446_v10 = vcombine.high %v4071_v4, %v4075_v6  ;;  %v8445_v41 = vcombine.low %v4071_v4, %v4075_v6  ;;  %v4287_v4 = vld [vmem:[#allocation8 + $0x958] sm:$0xff] }
 0x3d9   :  { %7606 = vmatprep.subr.bf16.mxu0 %v8374_v52  ;;  %v4434_v52 = vld [vmem:[#allocation8 + $0xdf0] sm:$0xff]  ;;  %v4291_v6 = vld [vmem:[#allocation8 + $0x978] sm:$0xff] }
 0x3da   :  { %7492 = vmatpush2.bf16.msra.mxu1 %v8595_v9  ;;  %v8804_v23 = vcombine.high %v4430_v50, %v4434_v52  ;;  %v8453_v9 = vcombine.low %v4079_v21, %v4083_v1  ;;  %v8803_v11 = vcombine.low %v4430_v50, %v4434_v52  ;;  %v4295_v21 = vld [vmem:[#allocation8 + $0x998] sm:$0xff]  ;;  %v4390_v50 = vld [vmem:[#allocation8 + $0xc90] sm:$0xff] }
 0x3db   :  { %7493 = vmatprep.subr.bf16.mxu1 %v8588_v19  ;;  %v4063_v19 = vld [vmem:[#allocation8 + $0x258] sm:$0xff]  ;;  %v4394_v52 = vld [vmem:[#allocation8 + $0xcb0] sm:$0xff] }
 0x3dc   :  { %7607 = vmatpush1.bf16.msra.mxu0 %v8373_v26  ;;  %v4422_v26 = vld [vmem:[#allocation8 + $0xd90] sm:$0xff]  ;;  %v8437_v58 = vcombine.low %v4063_v19, %v4067_v35  ;;  %v4299_v1 = vld [vmem:[#allocation8 + $0x9b8] sm:$0xff] }
 0x3dd   :  { %7608 = vmatprep.subr.bf16.mxu0 %v8366_v8  ;;  %v4426_v8 = vld [vmem:[#allocation8 + $0xdb0] sm:$0xff] }
 0x3de   :  { %7494 = vmatpush2.bf16.msra.mxu1 %v8587_v24  ;;  %v8796_v12 = vcombine.high %v4422_v26, %v4426_v8  ;;  %v4418_v24 = vld [vmem:[#allocation8 + $0xd70] sm:$0xff]  ;;  %v8795_v38 = vcombine.low %v4422_v26, %v4426_v8 }
 0x3df   :  { %7495 = vmatprep.subr.bf16.mxu1 %v8580_v32  ;;  %v8438_v32 = vcombine.high %v4063_v19, %v4067_v35  ;;  %v4382_v8 = vld [vmem:[#allocation8 + $0xc50] sm:$0xff]  ;;  %v8662_v35 = vcombine.high %v4287_v4, %v4291_v6 }
 0x3e0   :  { %7609 = vmatpush1.bf16.msra.mxu0 %v8365_v25 }
 0x3e1   :  { %7610 = vmatprep.subr.bf16.mxu0 %v8486_v22  ;;  %v4414_v22 = vld [vmem:[#allocation8 + $0xd50] sm:$0xff] }
 0x3e2   :  { %7496 = vmatpush2.bf16.msra.mxu1 %v8579_v43  ;;  %v4055_v43 = vld [vmem:[#allocation8 + $0x218] sm:$0xff]  ;;  %v8788_v49 = vcombine.high %v4414_v22, %v4418_v24  ;;  %v8787_v46 = vcombine.low %v4414_v22, %v4418_v24 }
 0x3e3   :  { %7497 = vmatprep.subr.bf16.mxu1 %v8572_v47  ;;  %v4279_v22 = vld [vmem:[#allocation8 + $0x918] sm:$0xff] }
 0x3e4   :  { %7611 = vmatpush2.bf16.msra.mxu0 %v8485_v42  ;;  %v4283_v24 = vld [vmem:[#allocation8 + $0x938] sm:$0xff] }
 0x3e5   :  { %7612 = vmatprep.subr.bf16.mxu0 %v8478_v17 }
 0x3e6   :  { %7498 = vmatpush2.bf16.msra.mxu1 %v8571_v53 }
 0x3e7   :  { %7499 = vmatprep.subr.bf16.mxu1 %v8564_v56 }
 0x3e8   :  { %7613 = vmatpush2.bf16.msra.mxu0 %v8477_v3 }
 0x3e9   :  { %7614 = vmatprep.subr.bf16.mxu0 %v8470_v34  ;;  %v8430_v34 = vcombine.high %v4055_v43, %v4059_v44 }
 0x3ea   :  { %7500 = vmatpush2.bf16.msra.mxu1 %v8563_v63 }
 0x3eb   :  { %7501 = vmatprep.subr.bf16.mxu1 %v8556_v30  ;;  %v8772_v30 = vcombine.high %v4398_v55, %v4402_v57 }
 0x3ec   :  { %7615 = vmatpush2.bf16.msra.mxu0 %v8469_v60  ;;  %v8429_v60 = vcombine.low %v4055_v43, %v4059_v44  ;;  %v8654_v44 = vcombine.high %v4279_v22, %v4283_v24 }
 0x3ed   :  { %7616 = vmatprep.subr.bf16.mxu0 %v8462_v62 }
 0x3ee   :  { %7502 = vmatpush2.bf16.msra.mxu1 %v8555_v20  ;;  %v8771_v20 = vcombine.low %v4398_v55, %v4402_v57  ;;  %v4486_v55 = vld [vmem:[#allocation8 + $0xf90] sm:$0xff] }
 0x3ef   :  { %7553 = vmatprep.subr.bf16.mxu1 %v8804_v23  ;;  %v8764_v23 = vcombine.high %v4390_v50, %v4394_v52  ;;  %v4490_v57 = vld [vmem:[#allocation8 + $0xfb0] sm:$0xff] }
 0x3f0   :  { %7617 = vmatpush2.bf16.msra.mxu0 %v8461_v45 }
 0x3f1   :  { %7618 = vmatprep.subr.bf16.mxu0 %v8454_v2  ;;  %v7259_v25 = vpop.f32.mrf.mxu1  ;;  %7504 = vmatmul.mubr.bf16.vlgmr.msra.gmra.mxu1 %v9254_v27  ;;  %v8670_v2 = vcombine.high %v4295_v21, %v4299_v1 }
 0x3f2   :  { %v9357_v29 = vadd.f32 %v7259_v25, %v9341_v13  ;;  %7554 = vmatpush1.bf16.msra.mxu1 %v8803_v11  ;;  %7585 = vmatprep.mubr.bf16.mxu1 %v9317_v36  ;;  %v4410_v13 = vld [vmem:[#allocation8 + $0xd30] sm:$0xff] }
 0x3f3   :  { %v7261_v37 = vpop.f32.mrf.mxu1  ;;  %7555 = vmatprep.subr.bf16.mxu1 %v8796_v12  ;;  %v8780_v56 = vcombine.high %v4406_v31, %v4410_v13  ;;  %v8779_v63 = vcombine.low %v4406_v31, %v4410_v13  ;;  %v8763_v12 = vcombine.low %v4390_v50, %v4394_v52  ;;  %v4275_v31 = vld [vmem:[#allocation8 + $0x8f8] sm:$0xff]  ;;  %v4478_v50 = vld [vmem:[#allocation8 + $0xf50] sm:$0xff] }
 0x3f4   :  { %7619 = vmatpush2.bf16.msra.mxu0 %v8453_v9  ;;  %v8871_v42 = vmul.f32 -1.442695, %v9357_v29  ;;  %v9362_v17 = vadd.f32 %v7261_v37, %v9345_v61  ;;  %v4303_v61 = vld [vmem:[#allocation8 + $0x9d8] sm:$0xff]  ;;  %v4386_v9 = vld [vmem:[#allocation8 + $0xc70] sm:$0xff] }
 0x3f5   :  { %7620 = vmatprep.subr.bf16.mxu0 %v8446_v10  ;;  %v7263_v47 = vpop.f32.mrf.mxu1  ;;  %v8678_v62 = vcombine.high %v4303_v61, %v4307_v54  ;;  %v8677_v45 = vcombine.low %v4303_v61, %v4307_v54  ;;  %v8669_v10 = vcombine.low %v4295_v21, %v4299_v1  ;;  %v4374_v37 = vld [vmem:[#allocation8 + $0xc10] sm:$0xff]  ;;  %v4263_v61 = vld [vmem:[#allocation8 + $0x898] sm:$0xff] }
 0x3f6   :  { %8920 = vpow2.f32 %v8871_v42  ;;  %v8872_v3 = vmul.f32 -1.442695, %v9362_v17  ;;  %7556 = vmatpush1.bf16.msra.mxu1 %v8795_v38  ;;  %v4378_v38 = vld [vmem:[#allocation8 + $0xc30] sm:$0xff]  ;;  %v4271_v47 = vld [vmem:[#allocation8 + $0x8d8] sm:$0xff] }
 0x3f7   :  { %v7264_v53 = vpop.f32.mrf.mxu1  ;;  %7557 = vmatprep.subr.bf16.mxu1 %v8788_v49  ;;  %v8755_v49 = vcombine.low %v4382_v8, %v4386_v9  ;;  %v8748_v13 = vcombine.high %v4374_v37, %v4378_v38  ;;  %v4267_v54 = vld [vmem:[#allocation8 + $0x8b8] sm:$0xff]  ;;  %v4482_v52 = vld [vmem:[#allocation8 + $0xf70] sm:$0xff] }
 0x3f8   :  { %7621 = vmatpush2.bf16.msra.mxu0 %v8445_v41  ;;  %8922 = vpow2.f32 %v8872_v3  ;;  %v8756_v41 = vcombine.high %v4382_v8, %v4386_v9  ;;  %v4498_v3 = vld [vmem:[#allocation8 + $0xff0] sm:$0xff]  ;;  %v8646_v53 = vcombine.high %v4271_v47, %v4275_v31  ;;  %v4255_v21 = vld [vmem:[#allocation8 + $0x858] sm:$0xff]  ;;  %v8852_v9 = vcombine.high %v4478_v50, %v4482_v52 }
 0x3f9   :  { %7622 = vmatprep.subr.bf16.mxu0 %v8438_v32  ;;  %v4259_v1 = vld [vmem:[#allocation8 + $0x878] sm:$0xff] }
 0x3fa   :  { %7558 = vmatpush1.bf16.msra.mxu1 %v8787_v46  ;;  %v8747_v46 = vcombine.low %v4374_v37, %v4378_v38  ;;  %v4251_v8 = vld [vmem:[#allocation8 + $0x838] sm:$0xff]  ;;  %v4466_v37 = vld [vmem:[#allocation8 + $0xef0] sm:$0xff] }
 0x3fb   :  { %7559 = vmatprep.subr.bf16.mxu1 %v8780_v56 }
 0x3fc   :  { %7623 = vmatpush2.bf16.msra.mxu0 %v8437_v58  ;;  %v4494_v58 = vld [vmem:[#allocation8 + $0xfd0] sm:$0xff] }
 0x3fd   :  { %7624 = vmatprep.subr.bf16.mxu0 %v8430_v34  ;;  %v8653_v34 = vcombine.low %v4279_v22, %v4283_v24  ;;  %v8868_v56 = vcombine.high %v4494_v58, %v4498_v3  ;;  %v8851_v24 = vcombine.low %v4478_v50, %v4482_v52  ;;  %v4335_v52 = vld [vmem:[#allocation8 + $0xad8] sm:$0xff] }
 0x3fe   :  { %7560 = vmatpush1.bf16.msra.mxu1 %v8779_v63  ;;  %v8867_v63 = vcombine.low %v4494_v58, %v4498_v3  ;;  %v4351_v3 = vld [vmem:[#allocation8 + $0xb58] sm:$0xff] }
 0x3ff   :  { %7561 = vmatprep.subr.bf16.mxu1 %v8772_v30  ;;  %v8860_v30 = vcombine.high %v4486_v55, %v4490_v57 }
 0x400   :  { %7625 = vmatpush2.bf16.msra.mxu0 %v8429_v60  ;;  %v8645_v60 = vcombine.low %v4271_v47, %v4275_v31  ;;  %v4458_v47 = vld [vmem:[#allocation8 + $0xeb0] sm:$0xff] }
 0x401   :  { %7676 = vmatprep.subr.bf16.mxu0 %v8678_v62  ;;  %v8638_v62 = vcombine.high %v4263_v61, %v4267_v54 }
 0x402   :  { %7562 = vmatpush1.bf16.msra.mxu1 %v8771_v20  ;;  %v8630_v20 = vcombine.high %v4255_v21, %v4259_v1 }
 0x403   :  { %v9365_v26 = vpop.f32.mrf.mxu0  ;;  %7627 = vmatmul.mubr.bf16.vlgmr.msra.gmra.mxu0 %v9252_v18  ;;  %v8921_v11 = vpop.eup %8920  ;;  %7563 = vmatprep.subr.bf16.mxu1 %v8764_v23  ;;  %v4247_v23 = vld [vmem:[#allocation8 + $0x818] sm:$0xff] }
 0x404   :  { %7677 = vmatpush1.bf16.msra.mxu0 %v8677_v45  ;;  %7708 = vmatprep.mubr.bf16.mxu0 %v9276_v51  ;;  %v7782_v25 = vadd.f32 1.0, %v8921_v11  ;;  %v8661_v51 = vcombine.low %v4287_v4, %v4291_v6  ;;  %v8637_v45 = vcombine.low %v4263_v61, %v4267_v54  ;;  %v8859_v4 = vcombine.low %v4486_v55, %v4490_v57  ;;  %v4470_v11 = vld [vmem:[#allocation8 + $0xf10] sm:$0xff]  ;;  %v4343_v57 = vld [vmem:[#allocation8 + $0xb18] sm:$0xff] }
 0x405   :  { %v9369_v19 = vpop.f32.mrf.mxu0  ;;  %7678 = vmatprep.subr.bf16.mxu0 %v8670_v2  ;;  %v8923_v32 = vpop.eup %8922  ;;  %v8622_v22 = vcombine.high %v4247_v23, %v4251_v8  ;;  %v8621_v38 = vcombine.low %v4247_v23, %v4251_v8  ;;  %v4450_v61 = vld [vmem:[#allocation8 + $0xe70] sm:$0xff] }
 0x406   :  { %8924 = vrcp.f32 %v7782_v25  ;;  %v7783_v42 = vadd.f32 1.0, %v8923_v32  ;;  %7564 = vmatpush1.bf16.msra.mxu1 %v8763_v12  ;;  %v8629_v25 = vcombine.low %v4255_v21, %v4259_v1  ;;  %v4442_v21 = vld [vmem:[#allocation8 + $0xe30] sm:$0xff] }
 0x407   :  { %v7386_v18 = vpop.f32.mrf.mxu0  ;;  %7565 = vmatprep.subr.bf16.mxu1 %v8756_v41  ;;  %v4367_v41 = vld [vmem:[#allocation8 + $0xbd8] sm:$0xff] }
 0x408   :  { %7679 = vmatpush1.bf16.msra.mxu0 %v8669_v10  ;;  %8926 = vrcp.f32 %v7783_v42  ;;  %v4462_v18 = vld [vmem:[#allocation8 + $0xed0] sm:$0xff] }
 0x409   :  { %v7387_v43 = vpop.f32.mrf.mxu0  ;;  %7680 = vmatprep.subr.bf16.mxu0 %v8662_v35  ;;  %v4474_v35 = vld [vmem:[#allocation8 + $0xf30] sm:$0xff]  ;;  %v8835_v58 = vcombine.low %v4462_v18, %v4466_v37 }
 0x40a   :  { %7566 = vmatpush1.bf16.msra.mxu1 %v8755_v49  ;;  %v8844_v32 = vcombine.high %v4470_v11, %v4474_v35  ;;  %v4363_v43 = vld [vmem:[#allocation8 + $0xbb8] sm:$0xff]  ;;  %v4454_v49 = vld [vmem:[#allocation8 + $0xe90] sm:$0xff] }
 0x40b   :  { %7567 = vmatprep.subr.bf16.mxu1 %v8748_v13  ;;  %v8827_v55 = vcombine.low %v4454_v49, %v4458_v47 }
 0x40c   :  { %7681 = vmatpush1.bf16.msra.mxu0 %v8661_v51  ;;  %v8843_v51 = vcombine.low %v4470_v11, %v4474_v35  ;;  %v9373_v35 = vld [vmem:[#allocation10] sm:$0xff] }
 0x40d   :  { %7682 = vmatprep.subr.bf16.mxu0 %v8654_v44  ;;  %v8836_v44 = vcombine.high %v4462_v18, %v4466_v37  ;;  %v4319_v18 = vld [vmem:[#allocation8 + $0xa58] sm:$0xff] }
 0x40e   :  { %7568 = vmatpush1.bf16.msra.mxu1 %v8747_v46  ;;  %v4446_v46 = vld [vmem:[#allocation8 + $0xe50] sm:$0xff]  ;;  %v4323_v37 = vld [vmem:[#allocation8 + $0xa78] sm:$0xff] }
 0x40f   :  { %7569 = vmatprep.subr.bf16.mxu1 %v8868_v56  ;;  %v8819_v50 = vcombine.low %v4446_v46, %v4450_v61 }
 0x410   :  { %7683 = vmatpush1.bf16.msra.mxu0 %v8653_v34  ;;  %v4355_v34 = vld [vmem:[#allocation8 + $0xb78] sm:$0xff] }
 0x411   :  { %7684 = vmatprep.subr.bf16.mxu0 %v8646_v53  ;;  %v8828_v53 = vcombine.high %v4454_v49, %v4458_v47  ;;  %v8726_v56 = vcombine.high %v4351_v3, %v4355_v34  ;;  %v8725_v1 = vcombine.low %v4351_v3, %v4355_v34  ;;  %v8694_v47 = vcombine.high %v4319_v18, %v4323_v37  ;;  %v4151_v34 = vld [vmem:[#allocation8 + $0x518] sm:$0xff] }
 0x412   :  { %7570 = vmatpush2.bf16.msra.mxu1 %v8867_v63  ;;  %v4438_v63 = vld [vmem:[#allocation8 + $0xe10] sm:$0xff] }
 0x413   :  { %v8925_v2 = vpop.eup %8924  ;;  %7571 = vmatprep.subr.bf16.mxu1 %v8860_v30  ;;  %v8811_v8 = vcombine.low %v4438_v63, %v4442_v21 }
 0x414   :  { %7685 = vmatpush1.bf16.msra.mxu0 %v8645_v60  ;;  %v7806_v6 = vmul.f32 %v8925_v2, %v9357_v29  ;;  %v4371_v29 = vld [vmem:[#allocation8 + $0xbf8] sm:$0xff]  ;;  %v8812_v2 = vcombine.high %v4438_v63, %v4442_v21 }
 0x415   :  { %7686 = vmatprep.subr.bf16.mxu0 %v8638_v62  ;;  %v8927_v10 = vpop.eup %8926  ;;  %v8742_v42 = vcombine.high %v4367_v41, %v4371_v29  ;;  %v8741_v31 = vcombine.low %v4367_v41, %v4371_v29  ;;  %v4347_v60 = vld [vmem:[#allocation8 + $0xb38] sm:$0xff]  ;;  %v8820_v62 = vcombine.high %v4446_v46, %v4450_v61  ;;  %v4517_v41 = vrot.slane %v9373_v35, %v3890_v14 }
 0x416   :  { %7814 = vst [vmem:[#allocation11] sm:$0xff] %v7806_v6  ;;  %v7807_v12 = vmul.f32 %v8927_v10, %v9362_v17  ;;  %7572 = vmatpush2.bf16.msra.mxu1 %v8859_v4  ;;  %v4359_v17 = vld [vmem:[#allocation8 + $0xb98] sm:$0xff]  ;;  %v8718_v30 = vcombine.high %v4343_v57, %v4347_v60  ;;  %v8717_v6 = vcombine.low %v4343_v57, %v4347_v60 }
 0x417   :  { %7573 = vmatprep.subr.bf16.mxu1 %v8852_v9  ;;  %v8734_v13 = vcombine.high %v4359_v17, %v4363_v43  ;;  %v8733_v54 = vcombine.low %v4359_v17, %v4363_v43  ;;  %v4179_v4 = vld [vmem:[#allocation8 + $0x5f8] sm:$0xff]  ;;  %v7303_v14 = vadd.f32 %v9353_v33, %v4517_v41  ;;  %v8693_v61 = vcombine.low %v4319_v18, %v4323_v37 }
 0x418   :  { %7687 = vmatpush1.bf16.msra.mxu0 %v8637_v45  ;;  %7815 = vst [vmem:[#allocation11 + $0x8] sm:$0xff] %v7807_v12  ;;  %v4339_v45 = vld [vmem:[#allocation8 + $0xaf8] sm:$0xff]  ;;  %v4513_v12 = vrot.slane %v9373_v35, %v3886_v0 }
 0x419   :  { %7688 = vmatprep.subr.bf16.mxu0 %v8630_v20  ;;  %v4175_v20 = vld [vmem:[#allocation8 + $0x5d8] sm:$0xff]  ;;  %v8710_v23 = vcombine.high %v4335_v52, %v4339_v45 }
 0x41a   :  { %7574 = vmatpush2.bf16.msra.mxu1 %v8851_v24  ;;  %v4327_v9 = vld [vmem:[#allocation8 + $0xa98] sm:$0xff]  ;;  %v8550_v11 = vcombine.high %v4175_v20, %v4179_v4  ;;  %v8709_v24 = vcombine.low %v4335_v52, %v4339_v45 }
 0x41b   :  { %7575 = vmatprep.subr.bf16.mxu1 %v8844_v32  ;;  %v4331_v10 = vld [vmem:[#allocation8 + $0xab8] sm:$0xff]  ;;  %v8549_v32 = vcombine.low %v4175_v20, %v4179_v4 }
 0x41c   :  { %7689 = vmatpush1.bf16.msra.mxu0 %v8629_v25  ;;  %v4167_v25 = vld [vmem:[#allocation8 + $0x598] sm:$0xff]  ;;  %v8702_v29 = vcombine.high %v4327_v9, %v4331_v10  ;;  %v8701_v17 = vcombine.low %v4327_v9, %v4331_v10 }
 0x41d   :  { %7690 = vmatprep.subr.bf16.mxu0 %v8622_v22  ;;  %v4171_v22 = vld [vmem:[#allocation8 + $0x5b8] sm:$0xff] }
 0x41e   :  { %7576 = vmatpush2.bf16.msra.mxu1 %v8843_v51  ;;  %v4159_v51 = vld [vmem:[#allocation8 + $0x558] sm:$0xff] }
 0x41f   :  { %7577 = vmatprep.subr.bf16.mxu1 %v8836_v44  ;;  %v4163_v0 = vld [vmem:[#allocation8 + $0x578] sm:$0xff]  ;;  %v8541_v44 = vcombine.low %v4167_v25, %v4171_v22 }
 0x420   :  { %7691 = vmatpush1.bf16.msra.mxu0 %v8621_v38  ;;  %v8542_v38 = vcombine.high %v4167_v25, %v4171_v22  ;;  %v4143_v60 = vld [vmem:[#allocation8 + $0x4d8] sm:$0xff] }
 0x421   :  { %7692 = vmatprep.subr.bf16.mxu0 %v8742_v42  ;;  %v7301_v42 = vadd.f32 %v9349_v28, %v4513_v12  ;;  %v4315_v28 = vld [vmem:[#allocation8 + $0xa38] sm:$0xff] }
 0x422   :  { %7578 = vmatpush2.bf16.msra.mxu1 %v8835_v58  ;;  %v8534_v58 = vcombine.high %v4159_v51, %v4163_v0  ;;  %v4127_v45 = vld [vmem:[#allocation8 + $0x458] sm:$0xff] }
 0x423   :  { %7579 = vmatprep.subr.bf16.mxu1 %v8828_v53  ;;  %v4155_v53 = vld [vmem:[#allocation8 + $0x538] sm:$0xff] }
 0x424   :  { %7693 = vmatpush2.bf16.msra.mxu0 %v8741_v31  ;;  %v8526_v57 = vcombine.high %v4151_v34, %v4155_v53  ;;  %v4123_v9 = vld [vmem:[#allocation8 + $0x438] sm:$0xff] }
 0x425   :  { %7694 = vmatprep.subr.bf16.mxu0 %v8734_v13  ;;  %v4311_v13 = vld [vmem:[#allocation8 + $0xa18] sm:$0xff] }
 0x426   :  { %7580 = vmatpush2.bf16.msra.mxu1 %v8827_v55  ;;  %v8685_v63 = vcombine.low %v4311_v13, %v4315_v28  ;;  %v4239_v25 = vld [vmem:[#allocation8 + $0x7d8] sm:$0xff] }
 0x427   :  { %7581 = vmatprep.subr.bf16.mxu1 %v8820_v62  ;;  %v4147_v62 = vld [vmem:[#allocation8 + $0x4f8] sm:$0xff] }
 0x428   :  { %7695 = vmatpush2.bf16.msra.mxu0 %v8733_v54  ;;  %v8686_v54 = vcombine.high %v4311_v13, %v4315_v28  ;;  %v8518_v21 = vcombine.high %v4143_v60, %v4147_v62  ;;  %v4243_v22 = vld [vmem:[#allocation8 + $0x7f8] sm:$0xff] }
 0x429   :  { %7696 = vmatprep.subr.bf16.mxu0 %v8726_v56  ;;  %v8533_v56 = vcombine.low %v4159_v51, %v4163_v0  ;;  %v4231_v41 = vld [vmem:[#allocation8 + $0x798] sm:$0xff] }
 0x42a   :  { %7582 = vmatpush2.bf16.msra.mxu1 %v8819_v50  ;;  %v8517_v50 = vcombine.low %v4143_v60, %v4147_v62  ;;  %v4223_v37 = vld [vmem:[#allocation8 + $0x758] sm:$0xff] }
 0x42b   :  { %7583 = vmatprep.subr.bf16.mxu1 %v8812_v2  ;;  %v4131_v2 = vld [vmem:[#allocation8 + $0x478] sm:$0xff] }
 0x42c   :  { %7697 = vmatpush2.bf16.msra.mxu0 %v8725_v1  ;;  %v4135_v1 = vld [vmem:[#allocation8 + $0x498] sm:$0xff] }
 0x42d   :  { %7698 = vmatprep.subr.bf16.mxu0 %v8718_v30  ;;  %v4139_v30 = vld [vmem:[#allocation8 + $0x4b8] sm:$0xff] }
 0x42e   :  { %7584 = vmatpush2.bf16.msra.mxu1 %v8811_v8  ;;  %v8509_v4 = vcombine.low %v4135_v1, %v4139_v30  ;;  %v4119_v8 = vld [vmem:[#allocation8 + $0x418] sm:$0xff] }
 0x42f   :  { %7635 = vmatprep.subr.bf16.mxu1 %v8550_v11  ;;  %v8501_v11 = vcombine.low %v4127_v45, %v4131_v2  ;;  %v8494_v12 = vcombine.high %v4119_v8, %v4123_v9  ;;  %v4215_v0 = vld [vmem:[#allocation8 + $0x718] sm:$0xff] }
 0x430   :  { %7699 = vmatpush2.bf16.msra.mxu0 %v8717_v6  ;;  %v8502_v6 = vcombine.high %v4127_v45, %v4131_v2  ;;  %v4199_v13 = vld [vmem:[#allocation8 + $0x698] sm:$0xff] }
 0x431   :  { %7700 = vmatprep.subr.bf16.mxu0 %v8710_v23  ;;  %v7341_v43 = vpop.f32.mrf.mxu1  ;;  %7586 = vmatmul.mubr.bf16.vlgmr.msra.gmra.mxu1 %v9319_v39  ;;  %v4203_v28 = vld [vmem:[#allocation8 + $0x6b8] sm:$0xff] }
 0x432   :  { %v7342_v49 = vadd.f32 %v7341_v43, %v7301_v42  ;;  %7636 = vmatpush1.bf16.msra.mxu1 %v8549_v32  ;;  %7667 = vmatprep.mubr.bf16.mxu1 %v9225_v48  ;;  %v8613_v32 = vcombine.low %v4239_v25, %v4243_v22  ;;  %v4431_v60 = vld [vmem:[#allocation8 + $0xdd8] sm:$0xff] }
 0x433   :  { %v7343_v31 = vpop.f32.mrf.mxu1  ;;  %7637 = vmatprep.subr.bf16.mxu1 %v8542_v38  ;;  %v4227_v38 = vld [vmem:[#allocation8 + $0x778] sm:$0xff] }
 0x434   :  { %7701 = vmatpush2.bf16.msra.mxu0 %v8709_v24  ;;  %v7344_v3 = vadd.f32 %v7343_v31, %v7303_v14  ;;  %v9386_v46 = vadd.f32 %v9365_v26, %v7342_v49  ;;  %v8525_v26 = vcombine.low %v4151_v34, %v4155_v53  ;;  %v8614_v24 = vcombine.high %v4239_v25, %v4243_v22  ;;  %v4207_v14 = vld [vmem:[#allocation8 + $0x6d8] sm:$0xff] }
 0x435   :  { %7702 = vmatprep.subr.bf16.mxu0 %v8702_v29  ;;  %v7345_v33 = vpop.f32.mrf.mxu1  ;;  %v4235_v29 = vld [vmem:[#allocation8 + $0x7b8] sm:$0xff]  ;;  %v8598_v51 = vcombine.high %v4223_v37, %v4227_v38  ;;  %v8597_v43 = vcombine.low %v4223_v37, %v4227_v38 }
 0x436   :  { %7638 = vmatpush1.bf16.msra.mxu1 %v8541_v44  ;;  %v9389_v48 = vadd.f32 %v9369_v19, %v7344_v3  ;;  %v8510_v19 = vcombine.high %v4135_v1, %v4139_v30  ;;  %v8606_v18 = vcombine.high %v4231_v41, %v4235_v29  ;;  %v8605_v42 = vcombine.low %v4231_v41, %v4235_v29  ;;  %v4211_v49 = vld [vmem:[#allocation8 + $0x6f8] sm:$0xff] }
 0x437   :  { %v7346_v55 = vpop.f32.mrf.mxu1  ;;  %7639 = vmatprep.subr.bf16.mxu1 %v8534_v58  ;;  %v8582_v31 = vcombine.high %v4207_v14, %v4211_v49  ;;  %v8581_v58 = vcombine.low %v4207_v14, %v4211_v49  ;;  %v8574_v3 = vcombine.high %v4199_v13, %v4203_v28  ;;  %v4191_v34 = vld [vmem:[#allocation8 + $0x658] sm:$0xff] }
 0x438   :  { %7703 = vmatpush2.bf16.msra.mxu0 %v8701_v17  ;;  %v4219_v17 = vld [vmem:[#allocation8 + $0x738] sm:$0xff] }
 0x439   :  { %7704 = vmatprep.subr.bf16.mxu0 %v8694_v47  ;;  %v8590_v44 = vcombine.high %v4215_v0, %v4219_v17  ;;  %v8589_v47 = vcombine.low %v4215_v0, %v4219_v17  ;;  %v4195_v53 = vld [vmem:[#allocation8 + $0x678] sm:$0xff] }
 0x43a   :  { %7640 = vmatpush1.bf16.msra.mxu1 %v8533_v56  ;;  %v8566_v33 = vcombine.high %v4191_v34, %v4195_v53  ;;  %v4187_v56 = vld [vmem:[#allocation8 + $0x638] sm:$0xff]  ;;  %v8565_v55 = vcombine.low %v4191_v34, %v4195_v53 }
 0x43b   :  { %7641 = vmatprep.subr.bf16.mxu1 %v8526_v57  ;;  %v4435_v62 = vld [vmem:[#allocation8 + $0xdf8] sm:$0xff] }
 0x43c   :  { %7705 = vmatpush2.bf16.msra.mxu0 %v8693_v61  ;;  %v8573_v61 = vcombine.low %v4199_v13, %v4203_v28  ;;  %v4427_v1 = vld [vmem:[#allocation8 + $0xdb8] sm:$0xff]  ;;  %v8805_v30 = vcombine.low %v4431_v60, %v4435_v62 }
 0x43d   :  { %7706 = vmatprep.subr.bf16.mxu0 %v8686_v54  ;;  %v4183_v54 = vld [vmem:[#allocation8 + $0x618] sm:$0xff] }
 0x43e   :  { %7642 = vmatpush1.bf16.msra.mxu1 %v8525_v26  ;;  %v8558_v57 = vcombine.high %v4183_v54, %v4187_v56  ;;  %v8806_v26 = vcombine.high %v4431_v60, %v4435_v62  ;;  %v4419_v45 = vld [vmem:[#allocation8 + $0xd78] sm:$0xff] }
 0x43f   :  { %7643 = vmatprep.subr.bf16.mxu1 %v8518_v21  ;;  %v4423_v21 = vld [vmem:[#allocation8 + $0xd98] sm:$0xff] }
 0x440   :  { %7707 = vmatpush2.bf16.msra.mxu0 %v8685_v63  ;;  %v8557_v63 = vcombine.low %v4183_v54, %v4187_v56  ;;  %v4495_v53 = vld [vmem:[#allocation8 + $0xfd8] sm:$0xff] }
 0x441   :  { %v4487_v56 = vld [vmem:[#allocation8 + $0xf98] sm:$0xff] }
 0x442   :  { %7644 = vmatpush1.bf16.msra.mxu1 %v8517_v50  ;;  %v8798_v50 = vcombine.high %v4423_v21, %v4427_v1  ;;  %v4479_v62 = vld [vmem:[#allocation8 + $0xf58] sm:$0xff] }
 0x443   :  { %v9391_v52 = vpop.f32.mrf.mxu0  ;;  %7709 = vmatmul.mubr.bf16.vlgmr.msra.gmra.mxu0 %v9288_v15  ;;  %7645 = vmatprep.subr.bf16.mxu1 %v8510_v19  ;;  %v8493_v15 = vcombine.low %v4119_v8, %v4123_v9  ;;  %v4415_v19 = vld [vmem:[#allocation8 + $0xd58] sm:$0xff] }
 0x444   :  { %v8790_v8 = vcombine.high %v4415_v19, %v4419_v45 }
 0x445   :  { %v9394_v20 = vpop.f32.mrf.mxu0 }
 0x446   :  { %7646 = vmatpush1.bf16.msra.mxu1 %v8509_v4 }
 0x447   :  { %v7468_v23 = vpop.f32.mrf.mxu0  ;;  %7647 = vmatprep.subr.bf16.mxu1 %v8502_v6  ;;  %v8797_v6 = vcombine.low %v4423_v21, %v4427_v1 }
 0x449   :  { %v7469_v10 = vpop.f32.mrf.mxu0 }
 0x44a   :  { %7648 = vmatpush1.bf16.msra.mxu1 %v8501_v11  ;;  %v4407_v11 = vld [vmem:[#allocation8 + $0xd18] sm:$0xff] }
 0x44b   :  { %7649 = vmatprep.subr.bf16.mxu1 %v8494_v12  ;;  %v4411_v12 = vld [vmem:[#allocation8 + $0xd38] sm:$0xff] }
 0x44c   :  { %v8781_v41 = vcombine.low %v4407_v11, %v4411_v12 }
 0x44e   :  { %7650 = vmatpush1.bf16.msra.mxu1 %v8493_v15  ;;  %v4399_v15 = vld [vmem:[#allocation8 + $0xcd8] sm:$0xff] }
 0x44f   :  { %7651 = vmatprep.subr.bf16.mxu1 %v8614_v24  ;;  %v4403_v24 = vld [vmem:[#allocation8 + $0xcf8] sm:$0xff] }
 0x450   :  { %v8774_v29 = vcombine.high %v4399_v15, %v4403_v24 }
 0x452   :  { %7652 = vmatpush2.bf16.msra.mxu1 %v8613_v32  ;;  %v4395_v32 = vld [vmem:[#allocation8 + $0xcb8] sm:$0xff] }
 0x453   :  { %7653 = vmatprep.subr.bf16.mxu1 %v8606_v18  ;;  %v8773_v18 = vcombine.low %v4399_v15, %v4403_v24  ;;  %v4439_v24 = vld [vmem:[#allocation8 + $0xe18] sm:$0xff] }
 0x456   :  { %7654 = vmatpush2.bf16.msra.mxu1 %v8605_v42  ;;  %v4383_v42 = vld [vmem:[#allocation8 + $0xc58] sm:$0xff] }
 0x457   :  { %7655 = vmatprep.subr.bf16.mxu1 %v8598_v51  ;;  %v4387_v51 = vld [vmem:[#allocation8 + $0xc78] sm:$0xff] }
 0x45a   :  { %7656 = vmatpush2.bf16.msra.mxu1 %v8597_v43 }
 0x45b   :  { %7657 = vmatprep.subr.bf16.mxu1 %v8590_v44  ;;  %v8758_v44 = vcombine.high %v4383_v42, %v4387_v51 }
 0x45e   :  { %7658 = vmatpush2.bf16.msra.mxu1 %v8589_v47  ;;  %v4375_v47 = vld [vmem:[#allocation8 + $0xc18] sm:$0xff] }
 0x45f   :  { %7659 = vmatprep.subr.bf16.mxu1 %v8582_v31  ;;  %v4379_v31 = vld [vmem:[#allocation8 + $0xc38] sm:$0xff] }
 0x460   :  { %v8750_v34 = vcombine.high %v4375_v47, %v4379_v31 }
 0x462   :  { %7660 = vmatpush2.bf16.msra.mxu1 %v8581_v58 }
 0x463   :  { %7661 = vmatprep.subr.bf16.mxu1 %v8574_v3  ;;  %v8757_v3 = vcombine.low %v4383_v42, %v4387_v51 }
 0x466   :  { %7662 = vmatpush2.bf16.msra.mxu1 %v8573_v61  ;;  %v4499_v61 = vld [vmem:[#allocation8 + $0xff8] sm:$0xff] }
 0x467   :  { %7663 = vmatprep.subr.bf16.mxu1 %v8566_v33  ;;  %v8749_v33 = vcombine.low %v4375_v47, %v4379_v31  ;;  %v8870_v54 = vcombine.high %v4495_v53, %v4499_v61 }
 0x46a   :  { %7664 = vmatpush2.bf16.msra.mxu1 %v8565_v55  ;;  %v4491_v55 = vld [vmem:[#allocation8 + $0xfb8] sm:$0xff] }
 0x46b   :  { %7665 = vmatprep.subr.bf16.mxu1 %v8558_v57  ;;  %v8869_v57 = vcombine.low %v4495_v53, %v4499_v61  ;;  %v8862_v60 = vcombine.high %v4487_v56, %v4491_v55 }
 0x46e   :  { %7666 = vmatpush2.bf16.msra.mxu1 %v8557_v63  ;;  %v4483_v63 = vld [vmem:[#allocation8 + $0xf78] sm:$0xff] }
 0x46f   :  { %7717 = vmatprep.subr.bf16.mxu1 %v8806_v26  ;;  %v8861_v26 = vcombine.low %v4487_v56, %v4491_v55  ;;  %v8854_v1 = vcombine.high %v4479_v62, %v4483_v63 }
 0x471   :  { %v7423_v2 = vpop.f32.mrf.mxu1  ;;  %7668 = vmatmul.mubr.bf16.vlgmr.msra.gmra.mxu1 %v9254_v27 }
 0x472   :  { %v9398_v4 = vadd.f32 %v7423_v2, %v9386_v46  ;;  %7718 = vmatpush1.bf16.msra.mxu1 %v8805_v30  ;;  %7749 = vmatprep.mubr.bf16.mxu1 %v9317_v36  ;;  %v8789_v46 = vcombine.low %v4415_v19, %v4419_v45  ;;  %v8782_v36 = vcombine.high %v4407_v11, %v4411_v12  ;;  %v4475_v19 = vld [vmem:[#allocation8 + $0xf38] sm:$0xff] }
 0x473   :  { %v7425_v23 = vpop.f32.mrf.mxu1  ;;  %7719 = vmatprep.subr.bf16.mxu1 %v8798_v50  ;;  %v4471_v50 = vld [vmem:[#allocation8 + $0xf18] sm:$0xff] }
 0x474   :  { %v8873_v9 = vmul.f32 -1.442695, %v9398_v4  ;;  %v9403_v10 = vadd.f32 %v7425_v23, %v9389_v48  ;;  %v4391_v48 = vld [vmem:[#allocation8 + $0xc98] sm:$0xff]  ;;  %v8846_v23 = vcombine.high %v4471_v50, %v4475_v19  ;;  %v8845_v11 = vcombine.low %v4471_v50, %v4475_v19 }
 0x475   :  { %v7427_v25 = vpop.f32.mrf.mxu1  ;;  %v8766_v37 = vcombine.high %v4391_v48, %v4395_v32  ;;  %v8765_v17 = vcombine.low %v4391_v48, %v4395_v32  ;;  %v4533_v50 = vrot.slane %v9373_v35, %v3906_v5 }
 0x476   :  { %8928 = vpow2.f32 %v8873_v9  ;;  %v8874_v27 = vmul.f32 -1.442695, %v9403_v10  ;;  %7720 = vmatpush1.bf16.msra.mxu1 %v8797_v6  ;;  %v8853_v6 = vcombine.low %v4479_v62, %v4483_v63  ;;  %v4467_v9 = vld [vmem:[#allocation8 + $0xef8] sm:$0xff] }
 0x477   :  { %v7428_v22 = vpop.f32.mrf.mxu1  ;;  %7721 = vmatprep.subr.bf16.mxu1 %v8790_v8  ;;  %v4463_v8 = vld [vmem:[#allocation8 + $0xed8] sm:$0xff] }
 0x478   :  { %8930 = vpow2.f32 %v8874_v27  ;;  %v8838_v12 = vcombine.high %v4463_v8, %v4467_v9  ;;  %v4455_v25 = vld [vmem:[#allocation8 + $0xe98] sm:$0xff] }
 0x479   :  { %v4459_v27 = vld [vmem:[#allocation8 + $0xeb8] sm:$0xff] }
 0x47a   :  { %7722 = vmatpush1.bf16.msra.mxu1 %v8789_v46  ;;  %v8830_v46 = vcombine.high %v4455_v25, %v4459_v27  ;;  %v4447_v22 = vld [vmem:[#allocation8 + $0xe58] sm:$0xff] }
 0x47b   :  { %7723 = vmatprep.subr.bf16.mxu1 %v8782_v36  ;;  %v4451_v36 = vld [vmem:[#allocation8 + $0xe78] sm:$0xff] }
 0x47c   :  { %v8822_v15 = vcombine.high %v4447_v22, %v4451_v36 }
 0x47e   :  { %7724 = vmatpush1.bf16.msra.mxu1 %v8781_v41  ;;  %v4443_v41 = vld [vmem:[#allocation8 + $0xe38] sm:$0xff] }
 0x47f   :  { %7725 = vmatprep.subr.bf16.mxu1 %v8774_v29  ;;  %v8821_v29 = vcombine.low %v4447_v22, %v4451_v36  ;;  %v8814_v48 = vcombine.high %v4439_v24, %v4443_v41  ;;  %v8813_v32 = vcombine.low %v4439_v24, %v4443_v41 }
 0x482   :  { %7726 = vmatpush1.bf16.msra.mxu1 %v8773_v18  ;;  %v4521_v18 = vrot.slane %v9373_v35, %v3894_v59 }
 0x483   :  { %v9406_v38 = vpop.f32.mrf.mxu0  ;;  %v8929_v43 = vpop.eup %8928  ;;  %7727 = vmatprep.subr.bf16.mxu1 %v8766_v37  ;;  %v4525_v37 = vrot.slane %v9373_v35, %v3898_v40 }
 0x484   :  { %v7784_v14 = vadd.f32 1.0, %v8929_v43  ;;  %v7465_v42 = vadd.f32 %v9391_v52, %v4521_v18 }
 0x485   :  { %v9408_v0 = vpop.f32.mrf.mxu0  ;;  %v8931_v13 = vpop.eup %8930 }
 0x486   :  { %8932 = vrcp.f32 %v7784_v14  ;;  %v7785_v28 = vadd.f32 1.0, %v8931_v13  ;;  %7728 = vmatpush1.bf16.msra.mxu1 %v8765_v17  ;;  %v7467_v17 = vadd.f32 %v9394_v20, %v4525_v37 }
 0x487   :  { %v7550_v49 = vpop.f32.mrf.mxu0  ;;  %7729 = vmatprep.subr.bf16.mxu1 %v8758_v44 }
 0x488   :  { %8934 = vrcp.f32 %v7785_v28 }
 0x489   :  { %v7551_v58 = vpop.f32.mrf.mxu0 }
 0x48a   :  { %7730 = vmatpush1.bf16.msra.mxu1 %v8757_v3 }
 0x48b   :  { %7731 = vmatprep.subr.bf16.mxu1 %v8750_v34 }
 0x48e   :  { %7732 = vmatpush1.bf16.msra.mxu1 %v8749_v33 }
 0x48f   :  { %7733 = vmatprep.subr.bf16.mxu1 %v8870_v54 }
 0x492   :  { %7734 = vmatpush2.bf16.msra.mxu1 %v8869_v57 }
 0x493   :  { %v8933_v21 = vpop.eup %8932  ;;  %7735 = vmatprep.subr.bf16.mxu1 %v8862_v60 }
 0x494   :  { %v7808_v30 = vmul.f32 %v8933_v21, %v9398_v4  ;;  %v8837_v4 = vcombine.low %v4463_v8, %v4467_v9 }
 0x495   :  { %v8935_v45 = vpop.eup %8934 }
 0x496   :  { %7816 = vst [vmem:[#allocation11 + $0x10] sm:$0xff] %v7808_v30  ;;  %v7809_v2 = vmul.f32 %v8935_v45, %v9403_v10  ;;  %7736 = vmatpush2.bf16.msra.mxu1 %v8861_v26  ;;  %v8829_v10 = vcombine.low %v4455_v25, %v4459_v27  ;;  %v4529_v30 = vrot.slane %v9373_v35, %v3902_v16 }
 0x497   :  { %7737 = vmatprep.subr.bf16.mxu1 %v8854_v1 }
 0x498   :  { %7817 = vst [vmem:[#allocation11 + $0x18] sm:$0xff] %v7809_v2 }
 0x49a   :  { %7738 = vmatpush2.bf16.msra.mxu1 %v8853_v6 }
 0x49b   :  { %7739 = vmatprep.subr.bf16.mxu1 %v8846_v23 }
 0x49e   :  { %7740 = vmatpush2.bf16.msra.mxu1 %v8845_v11 }
 0x49f   :  { %7741 = vmatprep.subr.bf16.mxu1 %v8838_v12 }
 0x4a2   :  { %7742 = vmatpush2.bf16.msra.mxu1 %v8837_v4 }
 0x4a3   :  { %7743 = vmatprep.subr.bf16.mxu1 %v8830_v46 }
 0x4a6   :  { %7744 = vmatpush2.bf16.msra.mxu1 %v8829_v10 }
 0x4a7   :  { %7745 = vmatprep.subr.bf16.mxu1 %v8822_v15 }
 0x4aa   :  { %7746 = vmatpush2.bf16.msra.mxu1 %v8821_v29 }
 0x4ab   :  { %7747 = vmatprep.subr.bf16.mxu1 %v8814_v48 }
 0x4ae   :  { %7748 = vmatpush2.bf16.msra.mxu1 %v8813_v32 }
 0x4b1   :  { %v7505_v51 = vpop.f32.mrf.mxu1  ;;  %7750 = vmatmul.mubr.bf16.vlgmr.msra.gmra.mxu1 %v9319_v39 }
 0x4b2   :  { %v7506_v43 = vadd.f32 %v7505_v51, %v7465_v42 }
 0x4b3   :  { %v7507_v44 = vpop.f32.mrf.mxu1 }
 0x4b4   :  { %v7508_v14 = vadd.f32 %v7507_v44, %v7467_v17  ;;  %v7547_v49 = vadd.f32 %v9406_v38, %v7506_v43 }
 0x4b5   :  { %v7509_v47 = vpop.f32.mrf.mxu1 }
 0x4b6   :  { %v7549_v59 = vadd.f32 %v9408_v0, %v7508_v14 }
 0x4b7   :  { %v7510_v31 = vpop.f32.mrf.mxu1 }
 0x4c3   :  { %v7628_v13 = vpop.f32.mrf.mxu0 }
 0x4c4   :  { %v7629_v19 = vadd.f32 %v7628_v13, %v4529_v30 }
 0x4c5   :  { %v7630_v28 = vpop.f32.mrf.mxu0 }
 0x4c6   :  { %v7631_v2 = vadd.f32 %v7630_v28, %v4533_v50 }
 0x4c7   :  { %v7632_v40 = vpop.f32.mrf.mxu0 }
 0x4c9   :  { %v7633_v58 = vpop.f32.mrf.mxu0 }
 0x4f1   :  { %v7587_v3 = vpop.f32.mrf.mxu1 }
 0x4f2   :  { %v7588_v52 = vadd.f32 %v7587_v3, %v7547_v49 }
 0x4f3   :  { %v7589_v34 = vpop.f32.mrf.mxu1 }
 0x4f4   :  { %v8875_v53 = vmul.f32 -1.442695, %v7588_v52  ;;  %v7590_v39 = vadd.f32 %v7589_v34, %v7549_v59 }
 0x4f5   :  { %v7591_v61 = vpop.f32.mrf.mxu1 }
 0x4f6   :  { %8936 = vpow2.f32 %v8875_v53  ;;  %v8876_v20 = vmul.f32 -1.442695, %v7590_v39 }
 0x4f7   :  { %v7592_v33 = vpop.f32.mrf.mxu1 }
 0x4f8   :  { %8938 = vpow2.f32 %v8876_v20 }
 0x503   :  { %v7710_v54 = vpop.f32.mrf.mxu0  ;;  %v8937_v56 = vpop.eup %8936 }
 0x504   :  { %v7786_v55 = vadd.f32 1.0, %v8937_v56 }
 0x505   :  { %v7712_v38 = vpop.f32.mrf.mxu0  ;;  %v8939_v57 = vpop.eup %8938 }
 0x506   :  { %8940 = vrcp.f32 %v7786_v55  ;;  %v7787_v60 = vadd.f32 1.0, %v8939_v57 }
 0x507   :  { %v7714_v0 = vpop.f32.mrf.mxu0 }
 0x508   :  { %8942 = vrcp.f32 %v7787_v60 }
 0x509   :  { %v7715_v62 = vpop.f32.mrf.mxu0 }
 0x513   :  { %v8941_v63 = vpop.eup %8940 }
 0x514   :  { %v7810_v26 = vmul.f32 %v8941_v63, %v7588_v52 }
 0x515   :  { %v8943_v21 = vpop.eup %8942 }
 0x516   :  { %7818 = vst [vmem:[#allocation11 + $0x20] sm:$0xff] %v7810_v26  ;;  %v7811_v1 = vmul.f32 %v8943_v21, %v7590_v39 }
 0x518   :  { %7819 = vst [vmem:[#allocation11 + $0x28] sm:$0xff] %v7811_v1 }
 0x531   :  { %v7669_v45 = vpop.f32.mrf.mxu1 }
 0x532   :  { %v7670_v6 = vadd.f32 %v7669_v45, %v7629_v19 }
 0x533   :  { %v7671_v23 = vpop.f32.mrf.mxu1 }
 0x534   :  { %v7672_v8 = vadd.f32 %v7671_v23, %v7631_v2  ;;  %v7711_v9 = vadd.f32 %v7710_v54, %v7670_v6 }
 0x535   :  { %v7673_v11 = vpop.f32.mrf.mxu1 }
 0x536   :  { %v7713_v12 = vadd.f32 %v7712_v38, %v7672_v8 }
 0x537   :  { %v7674_v25 = vpop.f32.mrf.mxu1 }
 0x571   :  { %v7751_v27 = vpop.f32.mrf.mxu1 }
 0x572   :  { %v7752_v4 = vadd.f32 %v7751_v27, %v7711_v9 }
 0x573   :  { %v7753_v46 = vpop.f32.mrf.mxu1 }
 0x574   :  { %v8877_v22 = vmul.f32 -1.442695, %v7752_v4  ;;  %v7754_v36 = vadd.f32 %v7753_v46, %v7713_v12 }
 0x575   :  { %v7755_v16 = vpop.f32.mrf.mxu1 }
 0x576   :  { %8944 = vpow2.f32 %v8877_v22  ;;  %v8878_v7 = vmul.f32 -1.442695, %v7754_v36 }
 0x577   :  { %v7756_v10 = vpop.f32.mrf.mxu1 }
 0x578   :  { %8946 = vpow2.f32 %v8878_v7 }
 0x583   :  { %v8945_v5 = vpop.eup %8944 }
 0x584   :  { %v7788_v35 = vadd.f32 1.0, %v8945_v5 }
 0x585   :  { %v8947_v15 = vpop.eup %8946 }
 0x586   :  { %8948 = vrcp.f32 %v7788_v35  ;;  %v7789_v24 = vadd.f32 1.0, %v8947_v15 }
 0x588   :  { %8950 = vrcp.f32 %v7789_v24 }
 0x593   :  { %v8949_v41 = vpop.eup %8948 }
 0x594   :  { %v7812_v29 = vmul.f32 %v8949_v41, %v7752_v4 }
 0x595   :  { %v8951_v48 = vpop.eup %8950 }
 0x596   :  { %7820 = vst [vmem:[#allocation11 + $0x30] sm:$0xff] %v7812_v29  ;;  %v7813_v32 = vmul.f32 %v8951_v48, %v7754_v36 }
 0x598   :  { %7821 = vst [vmem:[#allocation11 + $0x38] sm:$0xff] %v7813_v32 }
 0x599   :  { %9065 = shalt.err (!%p9062_p1)
}
 0x59a   :  { %7831 = dma.vmem_to_hbm [thread:$0]  %s7829_s4, 1024, %s9437_s5, [#allocation4]  }
 0x59b   :  { %9080 = dma.done.wait [#allocation4], 1024  }
 0x59c   :  { %9081 = vsyncadd [#allocation4], 4294966272 }
 0x59d   :  { %7835 = vsyncpa [#allocation3], 1 }
 0x59e   :  { %7836 = vsyncpa [#allocation6], 1 }
 0x59f   :  { %7837 = vsyncpa [#allocation9], 1 }
 0x5a0   :  { %7838 = vsyncpa [#allocation4], 1 }

</bundles_post_ra>
